<compile_context>
chip_gen: v7x
topology: tpu7x:2x2x1
jax: 0.10.0
libtpu: 0.0.40
codegen_flags: <defaults>
</compile_context>

<pallas_src>
import functools

import jax
import jax.numpy as jnp
from jax.experimental import pallas as pl
from jax.experimental.pallas import tpu as pltpu

IN_DIM, H1, H2, OUT_DIM = 784, 400, 200, 10
# hidden / output feature dims lane-padded to 128 multiples (done once at prep)
H1_P, H2_P, OUT_P = 512, 256, 128


def _round_up(n, m):
    return ((n + m - 1) // m) * m


def _pad2(a, rows, cols):
    return jnp.pad(a, ((0, rows - a.shape[0]), (0, cols - a.shape[1])))


def prepare_params(w1, b1, w2, b2, w3, b3):
    """One-time weight prep: lane padding + bf16 cast (hoisted out of hot path).

    Weights are [in_features, out_features] so the kernel computes x @ W + b,
    matching PyTorch nn.Linear (x @ W.T + b).
    """
    w1p = _pad2(w1, IN_DIM, H1_P).astype(jnp.bfloat16)   # (784, 512)
    w2p = _pad2(w2, H1_P, H2_P).astype(jnp.bfloat16)     # (512, 256)
    w3p = _pad2(w3, H2_P, OUT_P).astype(jnp.bfloat16)    # (256, 128)
    b1p = _pad2(b1.reshape(1, H1).astype(jnp.float32), 1, H1_P)
    b2p = _pad2(b2.reshape(1, H2).astype(jnp.float32), 1, H2_P)
    b3p = _pad2(b3.reshape(1, OUT_DIM).astype(jnp.float32), 1, OUT_P)
    return w1p, b1p, w2p, b2p, w3p, b3p


def mlp_kernel(x_ref, w1_ref, b1_ref, w2_ref, b2_ref, w3_ref, b3_ref, o_ref):
    # Activations cast to bf16 on the VPU (MXU-native); accumulation stays f32.
    x = x_ref[...].astype(jnp.bfloat16)                     # [tb, 784]
    # Layer 1: [tb, 784] @ [784, 512] -> f32, bias + ReLU in f32
    h1 = jnp.dot(x, w1_ref[...], preferred_element_type=jnp.float32)
    h1 = jnp.maximum(h1 + b1_ref[...], 0.0)
    # Layer 2: [tb, 512] @ [512, 256]
    h2 = jnp.dot(h1.astype(jnp.bfloat16), w2_ref[...],
                 preferred_element_type=jnp.float32)
    h2 = jnp.maximum(h2 + b2_ref[...], 0.0)
    # Layer 3: [tb, 256] @ [256, 128]   (columns 10..127 are zero-padded)
    o = jnp.dot(h2.astype(jnp.bfloat16), w3_ref[...],
                preferred_element_type=jnp.float32)
    o_ref[...] = (o + b3_ref[...]).astype(o_ref.dtype)


def _choose_batch_tile(B, max_tile):
    """Pick a batch tile that minimizes padded rows and keeps >= 2 grid steps.

    tile_b is a multiple of 16 (bf16 sublane packing).  When the grid would
    collapse to a single step, halve the tile (if that keeps tile_b >= 128) so
    the "parallel" grid axis can shard across both v7x TensorCores.
    """
    n_chunks = max(1, -(-B // max_tile))
    tile_b = max(16, _round_up(-(-B // n_chunks), 16))
    if _round_up(B, tile_b) // tile_b < 2:
        half = _round_up(-(-_round_up(B, tile_b) // 2), 16)
        if half >= 128:
            tile_b = half
    Bp = _round_up(B, tile_b)
    return tile_b, Bp


@functools.partial(jax.jit, static_argnames=("max_tile",))
def mlp_forward(x, w1p, b1p, w2p, b2p, w3p, b3p, *, max_tile=1024):
    B = x.shape[0]
    tile_b, Bp = _choose_batch_tile(B, max_tile)
    xp = x if Bp == B else jnp.pad(x, ((0, Bp - B), (0, 0)))
    grid = (Bp // tile_b,)

    flops = 2 * Bp * (IN_DIM * H1_P + H1_P * H2_P + H2_P * OUT_P)
    bytes_accessed = (
        xp.size * xp.dtype.itemsize
        + (w1p.size + w2p.size + w3p.size) * 2
        + (b1p.size + b2p.size + b3p.size) * 4
        + Bp * OUT_P * 4
    )

    out = pl.pallas_call(
        mlp_kernel,
        out_shape=jax.ShapeDtypeStruct((Bp, OUT_P), jnp.float32),
        grid_spec=pltpu.PrefetchScalarGridSpec(
            num_scalar_prefetch=0,
            grid=grid,
            in_specs=[
                # x: tiled over batch only; 784 = full feature dim (legal block)
                pl.BlockSpec((tile_b, IN_DIM), lambda i: (i, 0)),
                # weights / biases: full arrays, constant index_map -> resident
                pl.BlockSpec((IN_DIM, H1_P), lambda i: (0, 0)),
                pl.BlockSpec((1, H1_P), lambda i: (0, 0)),
                pl.BlockSpec((H1_P, H2_P), lambda i: (0, 0)),
                pl.BlockSpec((1, H2_P), lambda i: (0, 0)),
                pl.BlockSpec((H2_P, OUT_P), lambda i: (0, 0)),
                pl.BlockSpec((1, OUT_P), lambda i: (0, 0)),
            ],
            out_specs=pl.BlockSpec((tile_b, OUT_P), lambda i: (i, 0)),
        ),
        compiler_params=pltpu.CompilerParams(
            dimension_semantics=("parallel",),
        ),
        cost_estimate=pl.CostEstimate(
            flops=flops, transcendentals=0, bytes_accessed=bytes_accessed),
    )(xp, w1p, b1p, w2p, b2p, w3p, b3p)

    # Strip batch and lane padding outside the kernel.
    return out[:B, :OUT_DIM]


def init_params(key):
    # Deterministic init (PyTorch-default-like uniform bounds), float32.
    k = jax.random.split(key, 6)

    def linear(kw, kb, fan_in, fan_out):
        bound = 1.0 / jnp.sqrt(fan_in)
        w = jax.random.uniform(kw, (fan_in, fan_out), jnp.float32, -bound, bound)
        b = jax.random.uniform(kb, (fan_out,), jnp.float32, -bound, bound)
        return w, b

    w1, b1 = linear(k[0], k[1], IN_DIM, H1)
    w2, b2 = linear(k[2], k[3], H1, H2)
    w3, b3 = linear(k[4], k[5], H2, OUT_DIM)
    return w1, b1, w2, b2, w3, b3


if __name__ == "__main__":
    key = jax.random.PRNGKey(0)
    kx, kp = jax.random.split(key)

    B = 512  # -> tile_b=256, 2 grid steps (exercises megacore sharding)
    x = jax.random.normal(kx, (B, IN_DIM), jnp.float32)
    w1, b1, w2, b2, w3, b3 = init_params(kp)

    # One-time parameter prep, outside the per-call hot path.
    params = prepare_params(w1, b1, w2, b2, w3, b3)
    params = tuple(jax.block_until_ready(p) for p in params)

    out = mlp_forward(x, *params)
    out = jax.block_until_ready(out)
    assert out.shape == (B, OUT_DIM)

    # Reference 1: same bf16-input / f32-accumulate math in plain JAX (tight tol).
    xb = x.astype(jnp.bfloat16)
    r1 = jnp.maximum(jnp.dot(xb, w1.astype(jnp.bfloat16),
                             preferred_element_type=jnp.float32) + b1, 0.0)
    r2 = jnp.maximum(jnp.dot(r1.astype(jnp.bfloat16), w2.astype(jnp.bfloat16),
                             preferred_element_type=jnp.float32) + b2, 0.0)
    ref_bf16 = jnp.dot(r2.astype(jnp.bfloat16), w3.astype(jnp.bfloat16),
                       preferred_element_type=jnp.float32) + b3
    assert jnp.allclose(out, ref_bf16, atol=2e-3, rtol=2e-3)

    # Reference 2: pure f32 PyTorch-semantics reference (loose tol: bf16 matmul
    # operands are an intentional precision trade-off vs f32 nn.Linear).
    f1 = jnp.maximum(x @ w1 + b1, 0.0)
    f2 = jnp.maximum(f1 @ w2 + b2, 0.0)
    ref_f32 = f2 @ w3 + b3
    assert jnp.allclose(out, ref_f32, atol=5e-2, rtol=5e-2)

    # Ragged batch: exercises the adaptive tile choice + batch-padding path.
    B2 = 300
    x2 = jax.random.normal(kx, (B2, IN_DIM), jnp.float32)
    out2 = jax.block_until_ready(mlp_forward(x2, *params))
    assert out2.shape == (B2, OUT_DIM)
    g1 = jnp.maximum(x2 @ w1 + b1, 0.0)
    g2 = jnp.maximum(g1 @ w2 + b2, 0.0)
    assert jnp.allclose(out2, g2 @ w3 + b3, atol=5e-2, rtol=5e-2)

    print("KERNEL_OK")
</pallas_src>

<mosaic_0001>
module attributes {stable_mosaic.version = 11 : i64} {
  func.func @mlp_kernel(%arg0: i32, %arg1: memref<256x784xf32, #tpu.memory_space<vmem>>, %arg2: memref<784x512xbf16, #tpu.memory_space<vmem>>, %arg3: memref<1x512xf32, #tpu.memory_space<vmem>>, %arg4: memref<512x256xbf16, #tpu.memory_space<vmem>>, %arg5: memref<1x256xf32, #tpu.memory_space<vmem>>, %arg6: memref<256x128xbf16, #tpu.memory_space<vmem>>, %arg7: memref<1x128xf32, #tpu.memory_space<vmem>>, %arg8: memref<256x128xf32, #tpu.memory_space<vmem>>) attributes {dimension_semantics = [#tpu.dimension_semantics<parallel>], iteration_bounds = array<i64: 2>, scalar_prefetch = 0 : i64, scratch_operands = 0 : i64, tpu.core_type = #tpu.core_type<tc>, window_params = [{transform_indices = @transform_0, window_bounds = array<i64: 256, 784>}, {pipeline_mode = #tpu.pipeline_mode<synchronous>, transform_indices = @transform_1, window_bounds = array<i64: 784, 512>}, {pipeline_mode = #tpu.pipeline_mode<synchronous>, transform_indices = @transform_2, window_bounds = array<i64: 1, 512>}, {pipeline_mode = #tpu.pipeline_mode<synchronous>, transform_indices = @transform_3, window_bounds = array<i64: 512, 256>}, {pipeline_mode = #tpu.pipeline_mode<synchronous>, transform_indices = @transform_4, window_bounds = array<i64: 1, 256>}, {pipeline_mode = #tpu.pipeline_mode<synchronous>, transform_indices = @transform_5, window_bounds = array<i64: 256, 128>}, {pipeline_mode = #tpu.pipeline_mode<synchronous>, transform_indices = @transform_6, window_bounds = array<i64: 1, 128>}, {transform_indices = @transform_7, window_bounds = array<i64: 256, 128>}]} {
    %c0 = arith.constant 0 : index
    %c0_0 = arith.constant 0 : index
    %0 = vector.load %arg1[%c0, %c0_0] : memref<256x784xf32, #tpu.memory_space<vmem>>, vector<256x784xf32>
    %1 = arith.truncf %0 : vector<256x784xf32> to vector<256x784xbf16>
    %c0_1 = arith.constant 0 : index
    %c0_2 = arith.constant 0 : index
    %2 = vector.load %arg2[%c0_1, %c0_2] : memref<784x512xbf16, #tpu.memory_space<vmem>>, vector<784x512xbf16>
    %cst = arith.constant dense<0.000000e+00> : vector<256x512xf32>
    %3 = tpu.matmul %1, %2, %cst {dimension_numbers = #tpu.dot_dimension_numbers<[1], [0], [0], [1], [0, 0, 1, 1], [], []>} : vector<256x784xbf16>, vector<784x512xbf16>, vector<256x512xf32> -> vector<256x512xf32>
    %c0_3 = arith.constant 0 : index
    %c0_4 = arith.constant 0 : index
    %4 = vector.load %arg3[%c0_3, %c0_4] : memref<1x512xf32, #tpu.memory_space<vmem>>, vector<1x512xf32>
    %5 = vector.broadcast %4 : vector<1x512xf32> to vector<256x512xf32>
    %6 = arith.addf %3, %5 : vector<256x512xf32>
    %cst_5 = arith.constant 0.000000e+00 : f32
    %7 = vector.broadcast %cst_5 : f32 to vector<256x512xf32>
    %8 = arith.maximumf %6, %7 : vector<256x512xf32>
    %9 = arith.truncf %8 : vector<256x512xf32> to vector<256x512xbf16>
    %c0_6 = arith.constant 0 : index
    %c0_7 = arith.constant 0 : index
    %10 = vector.load %arg4[%c0_6, %c0_7] : memref<512x256xbf16, #tpu.memory_space<vmem>>, vector<512x256xbf16>
    %cst_8 = arith.constant dense<0.000000e+00> : vector<256x256xf32>
    %11 = tpu.matmul %9, %10, %cst_8 {dimension_numbers = #tpu.dot_dimension_numbers<[1], [0], [0], [1], [0, 0, 1, 1], [], []>} : vector<256x512xbf16>, vector<512x256xbf16>, vector<256x256xf32> -> vector<256x256xf32>
    %c0_9 = arith.constant 0 : index
    %c0_10 = arith.constant 0 : index
    %12 = vector.load %arg5[%c0_9, %c0_10] : memref<1x256xf32, #tpu.memory_space<vmem>>, vector<1x256xf32>
    %13 = vector.broadcast %12 : vector<1x256xf32> to vector<256x256xf32>
    %14 = arith.addf %11, %13 : vector<256x256xf32>
    %cst_11 = arith.constant 0.000000e+00 : f32
    %15 = vector.broadcast %cst_11 : f32 to vector<256x256xf32>
    %16 = arith.maximumf %14, %15 : vector<256x256xf32>
    %17 = arith.truncf %16 : vector<256x256xf32> to vector<256x256xbf16>
    %c0_12 = arith.constant 0 : index
    %c0_13 = arith.constant 0 : index
    %18 = vector.load %arg6[%c0_12, %c0_13] : memref<256x128xbf16, #tpu.memory_space<vmem>>, vector<256x128xbf16>
    %cst_14 = arith.constant dense<0.000000e+00> : vector<256x128xf32>
    %19 = tpu.matmul %17, %18, %cst_14 {dimension_numbers = #tpu.dot_dimension_numbers<[1], [0], [0], [1], [0, 0, 1, 1], [], []>} : vector<256x256xbf16>, vector<256x128xbf16>, vector<256x128xf32> -> vector<256x128xf32>
    %c0_15 = arith.constant 0 : index
    %c0_16 = arith.constant 0 : index
    %20 = vector.load %arg7[%c0_15, %c0_16] : memref<1x128xf32, #tpu.memory_space<vmem>>, vector<1x128xf32>
    %21 = vector.broadcast %20 : vector<1x128xf32> to vector<256x128xf32>
    %22 = arith.addf %19, %21 : vector<256x128xf32>
    %c0_17 = arith.constant 0 : index
    %c0_18 = arith.constant 0 : index
    %23 = vector.load %arg8[%c0_17, %c0_18] : memref<256x128xf32, #tpu.memory_space<vmem>>, vector<256x128xf32>
    tpu.vector_store %arg8[%c0_17, %c0_18], %22 {strides = array<i32>} : memref<256x128xf32, #tpu.memory_space<vmem>>, vector<256x128xf32>,
    return
  }
  func.func @transform_0(%arg0: i32) -> (i32, i32) {
    %c0_i32 = arith.constant 0 : i32
    %c0_i32_0 = arith.constant 0 : i32
    return %arg0, %c0_i32 : i32, i32
  }
  func.func @transform_1(%arg0: i32) -> (i32, i32) {
    %c0_i32 = arith.constant 0 : i32
    %c0_i32_0 = arith.constant 0 : i32
    %c0_i32_1 = arith.constant 0 : i32
    return %c0_i32, %c0_i32_0 : i32, i32
  }
  func.func @transform_2(%arg0: i32) -> (i32, i32) {
    %c0_i32 = arith.constant 0 : i32
    %c0_i32_0 = arith.constant 0 : i32
    %c0_i32_1 = arith.constant 0 : i32
    return %c0_i32, %c0_i32_0 : i32, i32
  }
  func.func @transform_3(%arg0: i32) -> (i32, i32) {
    %c0_i32 = arith.constant 0 : i32
    %c0_i32_0 = arith.constant 0 : i32
    %c0_i32_1 = arith.constant 0 : i32
    return %c0_i32, %c0_i32_0 : i32, i32
  }
  func.func @transform_4(%arg0: i32) -> (i32, i32) {
    %c0_i32 = arith.constant 0 : i32
    %c0_i32_0 = arith.constant 0 : i32
    %c0_i32_1 = arith.constant 0 : i32
    return %c0_i32, %c0_i32_0 : i32, i32
  }
  func.func @transform_5(%arg0: i32) -> (i32, i32) {
    %c0_i32 = arith.constant 0 : i32
    %c0_i32_0 = arith.constant 0 : i32
    %c0_i32_1 = arith.constant 0 : i32
    return %c0_i32, %c0_i32_0 : i32, i32
  }
  func.func @transform_6(%arg0: i32) -> (i32, i32) {
    %c0_i32 = arith.constant 0 : i32
    %c0_i32_0 = arith.constant 0 : i32
    %c0_i32_1 = arith.constant 0 : i32
    return %c0_i32, %c0_i32_0 : i32, i32
  }
  func.func @transform_7(%arg0: i32) -> (i32, i32) {
    %c0_i32 = arith.constant 0 : i32
    %c0_i32_0 = arith.constant 0 : i32
    return %arg0, %c0_i32 : i32, i32
  }
}

</mosaic_0001>

<bundles_post_ra>
// kernel: mlp_forward.1
= control target key start
LH: loop header
LB: loop body
LE: loop exit
PB: predicated region body
PF: predicated region fallthrough
CT: control target
= control target key end

     0   :  { %s6436_s24 = smov 0   ;;  %s8420_s0 = inlined_call_operand.vmem [shape: f32[512,784], index: 0, kind: input, shape index: {}]   ;;  %s8421_s1 = inlined_call_operand.vmem [shape: bf16[784,512], index: 1, kind: input, shape index: {}]   ;;  %s8422_s2 = inlined_call_operand.vmem [shape: f32[1,512], index: 2, kind: input, shape index: {}]   ;;  %s8423_s3 = inlined_call_operand.vmem [shape: bf16[512,256], index: 3, kind: input, shape index: {}]   ;;  %s8424_s4 = inlined_call_operand.vmem [shape: f32[1,256], index: 4, kind: input, shape index: {}]   ;;  %s8425_s5 = inlined_call_operand.vmem [shape: bf16[256,128], index: 5, kind: input, shape index: {}]   ;;  %s8426_s6 = inlined_call_operand.vmem [shape: f32[1,128], index: 6, kind: input, shape index: {}]   ;;  %s8427_s7 = inlined_call_operand.vmem [shape: f32[512,128], index: 7, kind: output, shape index: {}]  }
   0x1 LB: > { %s4867_s25 = sadd.s32 4294967295, %s6393_s24   ;;  %p4871_p0 = scmp.ge.s32.totalorder %s6393_s24, 1  ;;  %s6393_s24 = sphi %s6436_s24, %s17_s24  }
   0x2   : > { %p239_p1 = scmp.lt.s32.totalorder %s6393_s24, 3 }
   0x4   : > { %p240_p2 = pnand %p4871_p0, %p239_p1 }
   0x6   : > { %243 = sbr.rel (%p240_p2) target bundleno = 1310 (0x51e), region = 48 }
   0xd   : > { %v5981_v0 = vld [vmem:[%s8421_s1 + $0x4] ss:$16 sps:$4 sm:$0xff]   ;;  %v5983_v1 = vld [vmem:[%s8421_s1] ss:$16 sps:$4 sm:$0xff]   ;;  %s4872_s11 = sshll.u32 %s4867_s25, 5  ;;  %vm1820_vm0 = vcmask 130048  }
   0xe   : > { %1869 = vmatprep.subr.bf16.mxu0 %v5981_v0  ;;  %5299 = vmatprep.subr.bf16.mxu1 %v5981_v0  ;;  %v5984_v2 = vld [vmem:[%s8421_s1 + $0x24] ss:$16 sps:$4 sm:$0xff]   ;;  %v5986_v3 = vld [vmem:[%s8421_s1 + $0x20] ss:$16 sps:$4 sm:$0xff]   ;;  %p273_p3 = scmp.lt.s32.totalorder %s4872_s11, 63 }
   0xf   : > { %1870 = vmatpush1.bf16.msra.mxu0 %v5983_v1  ;;  %5315 = vmatpush1.bf16.msra.mxu1 %v5983_v1  ;;  %v5987_v4 = vld [vmem:[%s8421_s1 + $0x44] ss:$16 sps:$4 sm:$0xff]   ;;  %v5989_v5 = vld [vmem:[%s8421_s1 + $0x40] ss:$16 sps:$4 sm:$0xff]   ;;  %v6034_v43 = vld [vmem:[%s8421_s1 + $0xc] ss:$16 sps:$4 sm:$0xff]  }
  0x10   : > { %1871 = vmatprep.subr.bf16.mxu0 %v5984_v2  ;;  %5300 = vmatprep.subr.bf16.mxu1 %v5984_v2  ;;  %v5990_v6 = vld [vmem:[%s8421_s1 + $0x64] ss:$16 sps:$4 sm:$0xff]   ;;  %s8449_s11 = smov (!%p273_p3, %s4872_s11), 63  ;;  %v5992_v7 = vld [vmem:[%s8421_s1 + $0x60] ss:$16 sps:$4 sm:$0xff]  }
  0x11   : > { %v5993_v8 = vld [vmem:[%s8421_s1 + $0x84] ss:$16 sps:$4 sm:$0xff]   ;;  %s5971_s22 = smul.u32 56, %s8449_s11  ;;  %v5995_v9 = vld [vmem:[%s8421_s1 + $0x80] ss:$16 sps:$4 sm:$0xff]   ;;  %s4875_s18 = sshll.u32 %s8449_s11, 3 }
  0x12   : > { %v5996_v10 = vld [vmem:[%s8421_s1 + $0xa4] ss:$16 sps:$4 sm:$0xff]   ;;  %v5998_v11 = vld [vmem:[%s8421_s1 + $0xa0] ss:$16 sps:$4 sm:$0xff]   ;;  %v6032_v51 = vld [vmem:[%s8421_s1 + $0x8] ss:$16 sps:$4 sm:$0xff]   ;;  %s8351_s23 = scalar_lea.vmem %s8427_s7, %s4875_s18 }
  0x13   : > { %1872 = vmatpush1.bf16.msra.mxu0 %v5986_v3  ;;  %5316 = vmatpush1.bf16.msra.mxu1 %v5986_v3  ;;  %s6483_s30 = scalar_lea.vmem %s8420_s0, %s5971_s22  ;;  %v5999_v12 = vld [vmem:[%s8421_s1 + $0xc4] ss:$16 sps:$4 sm:$0xff]   ;;  %v6001_v18 = vld [vmem:[%s8421_s1 + $0xc0] ss:$16 sps:$4 sm:$0xff]   ;;  %v6040_v53 = vld [vmem:[%s8421_s1 + $0x2c] ss:$16 sps:$4 sm:$0xff]  }
  0x14   : > { %1873 = vmatprep.subr.bf16.mxu0 %v5987_v4  ;;  %5301 = vmatprep.subr.bf16.mxu1 %v5987_v4  ;;  %v287_v13 = vld [vmem:[%s6483_s30 + $0x8] sm:$0xff]  ;;  %v294_v14 = vld [vmem:[%s6483_s30 + $0x40] sm:$0xff]  ;;  %v293_v39 = vld [vmem:[%s6483_s30 + $0x38] sm:$0xff] }
  0x15   : > { %v6493_v15 = vpack.c.bf16 %v294_v14, %v287_v13  ;;  %v399_v16 = vld [vmem:[%s6483_s30 + $0x388] sm:$0xff]  ;;  %v406_v17 = vld [vmem:[%s6483_s30 + $0x3c0] sm:$0xff]  ;;  %v405_v41 = vld [vmem:[%s6483_s30 + $0x3b8] sm:$0xff] }
  0x16   : > { %v6500_v19 = vpack.c.bf16 %v406_v17, %v399_v16  ;;  %v6002_v20 = vld [vmem:[%s8421_s1 + $0xe4] ss:$16 sps:$4 sm:$0xff]   ;;  %v6004_v21 = vld [vmem:[%s8421_s1 + $0xe0] ss:$16 sps:$4 sm:$0xff]   ;;  %v301_v44 = vld [vmem:[%s6483_s30 + $0x78] sm:$0xff] }
  0x17   : > { %1874 = vmatpush1.bf16.msra.mxu0 %v5989_v5  ;;  %5317 = vmatpush1.bf16.msra.mxu1 %v5989_v5  ;;  %v6005_v22 = vld [vmem:[%s8421_s1 + $0x104] ss:$16 sps:$4 sm:$0xff]   ;;  %v6007_v23 = vld [vmem:[%s8421_s1 + $0x100] ss:$16 sps:$4 sm:$0xff]   ;;  %v413_v48 = vld [vmem:[%s6483_s30 + $0x3f8] sm:$0xff] }
  0x18   : > { %1875 = vmatprep.subr.bf16.mxu0 %v5990_v6  ;;  %5302 = vmatprep.subr.bf16.mxu1 %v5990_v6  ;;  %v6008_v24 = vld [vmem:[%s8421_s1 + $0x124] ss:$16 sps:$4 sm:$0xff]   ;;  %v6010_v25 = vld [vmem:[%s8421_s1 + $0x120] ss:$16 sps:$4 sm:$0xff]   ;;  %v6038_v55 = vld [vmem:[%s8421_s1 + $0x28] ss:$16 sps:$4 sm:$0xff]  }
  0x19   : > { %1901 = vmatprep.mubr.bf16.mxu0 %v6493_v15  ;;  %1981 = vmatprep.mubr.bf16.mxu1 %v6500_v19  ;;  %v6011_v26 = vld [vmem:[%s8421_s1 + $0x144] ss:$16 sps:$4 sm:$0xff]   ;;  %v6013_v27 = vld [vmem:[%s8421_s1 + $0x140] ss:$16 sps:$4 sm:$0xff]   ;;  %v307_v59 = vld [vmem:[%s6483_s30 + $0xa8] sm:$0xff] }
  0x1a   : > { %v6014_v28 = vld [vmem:[%s8421_s1 + $0x164] ss:$16 sps:$4 sm:$0xff]   ;;  %v6016_v29 = vld [vmem:[%s8421_s1 + $0x160] ss:$16 sps:$4 sm:$0xff]   ;;  %v419_v61 = vld [vmem:[%s6483_s30 + $0x428] sm:$0xff] }
  0x1b   : > { %1876 = vmatpush1.bf16.msra.mxu0 %v5992_v7  ;;  %5318 = vmatpush1.bf16.msra.mxu1 %v5992_v7  ;;  %v6017_v30 = vld [vmem:[%s8421_s1 + $0x184] ss:$16 sps:$4 sm:$0xff]   ;;  %v6019_v31 = vld [vmem:[%s8421_s1 + $0x180] ss:$16 sps:$4 sm:$0xff]   ;;  %v6046_v63 = vld [vmem:[%s8421_s1 + $0x4c] ss:$16 sps:$4 sm:$0xff]  }
  0x1c   : > { %1877 = vmatprep.subr.bf16.mxu0 %v5993_v8  ;;  %5303 = vmatprep.subr.bf16.mxu1 %v5993_v8  ;;  %v6020_v32 = vld [vmem:[%s8421_s1 + $0x1a4] ss:$16 sps:$4 sm:$0xff]   ;;  %v6022_v33 = vld [vmem:[%s8421_s1 + $0x1a0] ss:$16 sps:$4 sm:$0xff]   ;;  %v315_v0 = vld [vmem:[%s6483_s30 + $0xe8] sm:$0xff] }
  0x1d   : > { %v6023_v34 = vld [vmem:[%s8421_s1 + $0x1c4] ss:$16 sps:$4 sm:$0xff]   ;;  %v6025_v35 = vld [vmem:[%s8421_s1 + $0x1c0] ss:$16 sps:$4 sm:$0xff]   ;;  %v427_v4 = vld [vmem:[%s6483_s30 + $0x468] sm:$0xff] }
  0x1e   : > { %v6026_v36 = vld [vmem:[%s8421_s1 + $0x1e4] ss:$16 sps:$4 sm:$0xff]   ;;  %v6028_v37 = vld [vmem:[%s8421_s1 + $0x1e0] ss:$16 sps:$4 sm:$0xff]   ;;  %v6044_v7 = vld [vmem:[%s8421_s1 + $0x48] ss:$16 sps:$4 sm:$0xff]  }
  0x1f   : > { %1878 = vmatpush1.bf16.msra.mxu0 %v5995_v9  ;;  %5319 = vmatpush1.bf16.msra.mxu1 %v5995_v9  ;;  %v286_v38 = vld [vmem:[%s6483_s30] sm:$0xff]  ;;  %v308_v47 = vld [vmem:[%s6483_s30 + $0xb0] sm:$0xff]  ;;  %v6052_v9 = vld [vmem:[%s8421_s1 + $0x6c] ss:$16 sps:$4 sm:$0xff]  }
  0x20   : > { %1879 = vmatprep.subr.bf16.mxu0 %v5996_v10  ;;  %5304 = vmatprep.subr.bf16.mxu1 %v5996_v10  ;;  %v398_v40 = vld [vmem:[%s6483_s30 + $0x380] sm:$0xff]  ;;  %v6569_v45 = vpack.c.bf16 %v293_v39, %v286_v38  ;;  %v420_v49 = vld [vmem:[%s6483_s30 + $0x430] sm:$0xff]  ;;  %v6594_v56 = vpack.c.bf16 %v308_v47, %v301_v44  ;;  %v321_v16 = vld [vmem:[%s6483_s30 + $0x118] sm:$0xff] }
  0x21   : > { %v6031_v42 = vld [vmem:[%s8421_s1 + $0x204] ss:$16 sps:$4 sm:$0xff]   ;;  %v6571_v46 = vpack.c.bf16 %v405_v41, %v398_v40  ;;  %v6029_v50 = vld [vmem:[%s8421_s1 + $0x200] ss:$16 sps:$4 sm:$0xff]   ;;  %v6596_v57 = vpack.c.bf16 %v420_v49, %v413_v48  ;;  %v447_v39 = vld [vmem:[%s6483_s30 + $0x508] sm:$0xff] }
  0x22   : > { %v6037_v52 = vld [vmem:[%s8421_s1 + $0x224] ss:$16 sps:$4 sm:$0xff]   ;;  %v6035_v54 = vld [vmem:[%s8421_s1 + $0x220] ss:$16 sps:$4 sm:$0xff]   ;;  %v6070_v41 = vld [vmem:[%s8421_s1 + $0xcc] ss:$16 sps:$4 sm:$0xff]  }
  0x23   : > { %1880 = vmatpush1.bf16.msra.mxu0 %v5998_v11  ;;  %5320 = vmatpush1.bf16.msra.mxu1 %v5998_v11  ;;  %v300_v58 = vld [vmem:[%s6483_s30 + $0x70] sm:$0xff]  ;;  %v322_v3 = vld [vmem:[%s6483_s30 + $0x120] sm:$0xff]  ;;  %v6050_v11 = vld [vmem:[%s8421_s1 + $0x68] ss:$16 sps:$4 sm:$0xff]  }
  0x24   : > { %1881 = vmatprep.subr.bf16.mxu0 %v5999_v12  ;;  %5305 = vmatprep.subr.bf16.mxu1 %v5999_v12  ;;  %v412_v60 = vld [vmem:[%s6483_s30 + $0x3f0] sm:$0xff]  ;;  %v6613_v1 = vpack.c.bf16 %v307_v59, %v300_v58  ;;  %v434_v5 = vld [vmem:[%s6483_s30 + $0x4a0] sm:$0xff]  ;;  %v6638_v12 = vpack.c.bf16 %v322_v3, %v315_v0  ;;  %v455_v49 = vld [vmem:[%s6483_s30 + $0x548] sm:$0xff] }
  0x25   : > { %v6043_v62 = vld [vmem:[%s8421_s1 + $0x244] ss:$16 sps:$4 sm:$0xff]   ;;  %v6615_v2 = vpack.c.bf16 %v419_v61, %v412_v60  ;;  %v6041_v6 = vld [vmem:[%s8421_s1 + $0x240] ss:$16 sps:$4 sm:$0xff]   ;;  %v6640_v13 = vpack.c.bf16 %v434_v5, %v427_v4  ;;  %v349_v61 = vld [vmem:[%s6483_s30 + $0x1f8] sm:$0xff] }
  0x26   : > { %v6049_v8 = vld [vmem:[%s8421_s1 + $0x264] ss:$16 sps:$4 sm:$0xff]   ;;  %v6047_v10 = vld [vmem:[%s8421_s1 + $0x260] ss:$16 sps:$4 sm:$0xff]   ;;  %v6082_v3 = vld [vmem:[%s8421_s1 + $0x10c] ss:$16 sps:$4 sm:$0xff]  }
  0x27   : > { %1882 = vmatpush1.bf16.msra.mxu0 %v6001_v18  ;;  %5321 = vmatpush1.bf16.msra.mxu1 %v6001_v18  ;;  %v314_v14 = vld [vmem:[%s6483_s30 + $0xe0] sm:$0xff]  ;;  %v433_v18 = vld [vmem:[%s6483_s30 + $0x498] sm:$0xff]  ;;  %v440_v38 = vld [vmem:[%s6483_s30 + $0x4d0] sm:$0xff] }
  0x28   : > { %1883 = vmatprep.subr.bf16.mxu0 %v6002_v20  ;;  %5306 = vmatprep.subr.bf16.mxu1 %v6002_v20  ;;  %v426_v17 = vld [vmem:[%s6483_s30 + $0x460] sm:$0xff]  ;;  %v6707_v48 = vpack.c.bf16 %v447_v39, %v440_v38  ;;  %v357_v5 = vld [vmem:[%s6483_s30 + $0x238] sm:$0xff] }
  0x29   : > { %v6055_v20 = vld [vmem:[%s8421_s1 + $0x284] ss:$16 sps:$4 sm:$0xff]   ;;  %v6077_v4 = vld [vmem:[%s8421_s1 + $0x300] ss:$16 sps:$4 sm:$0xff]   ;;  %v6092_v39 = vld [vmem:[%s8421_s1 + $0x148] ss:$16 sps:$4 sm:$0xff]  }
  0x2a   : > { %v6067_v40 = vld [vmem:[%s8421_s1 + $0x2c4] ss:$16 sps:$4 sm:$0xff]  }
  0x2b   : > { %1884 = vmatpush1.bf16.msra.mxu0 %v6004_v21  ;;  %5322 = vmatpush1.bf16.msra.mxu1 %v6004_v21  ;;  %v6058_v21 = vld [vmem:[%s8421_s1 + $0x8c] ss:$16 sps:$4 sm:$0xff]   ;;  %v350_v44 = vld [vmem:[%s6483_s30 + $0x200] sm:$0xff] }
  0x2c   : > { %1885 = vmatprep.subr.bf16.mxu0 %v6005_v22  ;;  %5307 = vmatprep.subr.bf16.mxu1 %v6005_v22  ;;  %v329_v22 = vld [vmem:[%s6483_s30 + $0x158] sm:$0xff]  ;;  %v342_v60 = vld [vmem:[%s6483_s30 + $0x1c0] sm:$0xff] }
  0x2d   : > { %v6079_v0 = vld [vmem:[%s8421_s1 + $0x304] ss:$16 sps:$4 sm:$0xff]  }
  0x2e   : > { %v490_v38 = vld [vmem:[%s6483_s30 + $0x660] sm:$0xff] }
  0x2f   : > { %1886 = vmatpush1.bf16.msra.mxu0 %v6007_v23  ;;  %5323 = vmatpush1.bf16.msra.mxu1 %v6007_v23  ;;  %v6657_v23 = vpack.c.bf16 %v321_v16, %v314_v14  ;;  %v6085_v14 = vld [vmem:[%s8421_s1 + $0x324] ss:$16 sps:$4 sm:$0xff]   ;;  %v6088_v16 = vld [vmem:[%s8421_s1 + $0x12c] ss:$16 sps:$4 sm:$0xff]  }
  0x30   : > { %1887 = vmatprep.subr.bf16.mxu0 %v6008_v24  ;;  %5308 = vmatprep.subr.bf16.mxu1 %v6008_v24  ;;  %v6659_v24 = vpack.c.bf16 %v433_v18, %v426_v17  ;;  %v6083_v17 = vld [vmem:[%s8421_s1 + $0x320] ss:$16 sps:$4 sm:$0xff]   ;;  %v6086_v18 = vld [vmem:[%s8421_s1 + $0x128] ss:$16 sps:$4 sm:$0xff]  }
  0x33   : > { %1888 = vmatpush1.bf16.msra.mxu0 %v6010_v25  ;;  %5324 = vmatpush1.bf16.msra.mxu1 %v6010_v25  ;;  %v336_v25 = vld [vmem:[%s6483_s30 + $0x190] sm:$0xff] }
  0x34   : > { %1889 = vmatprep.subr.bf16.mxu0 %v6011_v26  ;;  %5309 = vmatprep.subr.bf16.mxu1 %v6011_v26  ;;  %v441_v26 = vld [vmem:[%s6483_s30 + $0x4d8] sm:$0xff] }
  0x37   : > { %1890 = vmatpush1.bf16.msra.mxu0 %v6013_v27  ;;  %5325 = vmatpush1.bf16.msra.mxu1 %v6013_v27  ;;  %v448_v27 = vld [vmem:[%s6483_s30 + $0x510] sm:$0xff] }
  0x38   : > { %1891 = vmatprep.subr.bf16.mxu0 %v6014_v28  ;;  %5310 = vmatprep.subr.bf16.mxu1 %v6014_v28  ;;  %v6053_v28 = vld [vmem:[%s8421_s1 + $0x280] ss:$16 sps:$4 sm:$0xff]  }
  0x3b   : > { %1892 = vmatpush1.bf16.msra.mxu0 %v6016_v29  ;;  %5326 = vmatpush1.bf16.msra.mxu1 %v6016_v29  ;;  %v6056_v29 = vld [vmem:[%s8421_s1 + $0x88] ss:$16 sps:$4 sm:$0xff]  }
  0x3c   : > { %1893 = vmatprep.subr.bf16.mxu0 %v6017_v30  ;;  %5311 = vmatprep.subr.bf16.mxu1 %v6017_v30  ;;  %v6061_v30 = vld [vmem:[%s8421_s1 + $0x2a4] ss:$16 sps:$4 sm:$0xff]  }
  0x3f   : > { %1894 = vmatpush1.bf16.msra.mxu0 %v6019_v31  ;;  %5327 = vmatpush1.bf16.msra.mxu1 %v6019_v31  ;;  %v6064_v31 = vld [vmem:[%s8421_s1 + $0xac] ss:$16 sps:$4 sm:$0xff]  }
  0x40   : > { %1895 = vmatprep.subr.bf16.mxu0 %v6020_v32  ;;  %5312 = vmatprep.subr.bf16.mxu1 %v6020_v32  ;;  %v6059_v32 = vld [vmem:[%s8421_s1 + $0x2a0] ss:$16 sps:$4 sm:$0xff]  }
  0x43   : > { %1896 = vmatpush1.bf16.msra.mxu0 %v6022_v33  ;;  %5328 = vmatpush1.bf16.msra.mxu1 %v6022_v33  ;;  %v6062_v33 = vld [vmem:[%s8421_s1 + $0xa8] ss:$16 sps:$4 sm:$0xff]  }
  0x44   : > { %1897 = vmatprep.subr.bf16.mxu0 %v6023_v34  ;;  %5313 = vmatprep.subr.bf16.mxu1 %v6023_v34  ;;  %v6682_v34 = vpack.c.bf16 %v336_v25, %v329_v22  ;;  %v356_v22 = vld [vmem:[%s6483_s30 + $0x230] sm:$0xff]  ;;  %v363_v25 = vld [vmem:[%s6483_s30 + $0x268] sm:$0xff] }
  0x47   : > { %1898 = vmatpush1.bf16.msra.mxu0 %v6025_v35  ;;  %5329 = vmatpush1.bf16.msra.mxu1 %v6025_v35  ;;  %v6684_v35 = vpack.c.bf16 %v448_v27, %v441_v26  ;;  %v468_v26 = vld [vmem:[%s6483_s30 + $0x5b0] sm:$0xff]  ;;  %v475_v27 = vld [vmem:[%s6483_s30 + $0x5e8] sm:$0xff] }
  0x48   : > { %1899 = vmatprep.subr.bf16.mxu0 %v6026_v36  ;;  %5314 = vmatprep.subr.bf16.mxu1 %v6026_v36  ;;  %v328_v36 = vld [vmem:[%s6483_s30 + $0x150] sm:$0xff] }
  0x4b   : > { %1900 = vmatpush1.bf16.msra.mxu0 %v6028_v37  ;;  %5330 = vmatpush1.bf16.msra.mxu1 %v6028_v37  ;;  %v335_v37 = vld [vmem:[%s6483_s30 + $0x188] sm:$0xff] }
  0x4c   : > { %2062 = vmatprep.subr.bf16.mxu0 %v6031_v42  ;;  %2641 = vmatprep.subr.bf16.mxu1 %v6034_v43  ;;  %v6065_v42 = vld [vmem:[%s8421_s1 + $0x2c0] ss:$16 sps:$4 sm:$0xff]   ;;  %v343_v43 = vld [vmem:[%s6483_s30 + $0x1c8] sm:$0xff]  ;;  %v6705_v47 = vpack.c.bf16 %v335_v37, %v328_v36  ;;  %v6795_v36 = vpack.c.bf16 %v475_v27, %v468_v26  ;;  %v6115_v26 = vld [vmem:[%s8421_s1 + $0x3c4] ss:$16 sps:$4 sm:$0xff]  }
  0x4d   : > { %v6726_v58 = vpack.c.bf16 %v350_v44, %v343_v43  ;;  %v483_v37 = vld [vmem:[%s6483_s30 + $0x628] sm:$0xff] }
  0x4e   : > { %1902 = vmatmul.mubr.bf16.vlgmr.msra.gmra.mrb[0].mxu0 %v6569_v45  ;;  %1982 = vmatmul.mubr.bf16.vlgmr.msra.gmra.mrb[0].mxu1 %v6571_v46  ;;  %v6098_v43 = vld [vmem:[%s8421_s1 + $0x168] ss:$16 sps:$4 sm:$0xff]   ;;  %v6118_v27 = vld [vmem:[%s8421_s1 + $0x1cc] ss:$16 sps:$4 sm:$0xff]  }
  0x4f   : > { %2063 = vmatpush1.bf16.msra.mxu0 %v6029_v50  ;;  %2642 = vmatpush1.bf16.msra.mxu1 %v6032_v51  ;;  %v462_v50 = vld [vmem:[%s6483_s30 + $0x580] sm:$0xff]  ;;  %v6068_v51 = vld [vmem:[%s8421_s1 + $0xc8] ss:$16 sps:$4 sm:$0xff]  }
  0x50   : > { %2064 = vmatprep.subr.bf16.mxu0 %v6037_v52  ;;  %2643 = vmatprep.subr.bf16.mxu1 %v6040_v53  ;;  %v6073_v52 = vld [vmem:[%s8421_s1 + $0x2e4] ss:$16 sps:$4 sm:$0xff]   ;;  %v6076_v53 = vld [vmem:[%s8421_s1 + $0xec] ss:$16 sps:$4 sm:$0xff]   ;;  %v6728_v59 = vpack.c.bf16 %v462_v50, %v455_v49  ;;  %v6816_v49 = vpack.c.bf16 %v490_v38, %v483_v37  ;;  %v6116_v37 = vld [vmem:[%s8421_s1 + $0x1c8] ss:$16 sps:$4 sm:$0xff]  }
  0x51   : > { %1911 = vmatprep.mubr.bf16.mxu0 %v6594_v56  ;;  %1991 = vmatprep.mubr.bf16.mxu1 %v6596_v57  ;;  %v370_v50 = vld [vmem:[%s6483_s30 + $0x2a0] sm:$0xff] }
  0x52   : > { %v6121_v38 = vld [vmem:[%s8421_s1 + $0x3e4] ss:$16 sps:$4 sm:$0xff]  }
  0x53   : > { %2065 = vmatpush1.bf16.msra.mxu0 %v6035_v54  ;;  %2644 = vmatpush1.bf16.msra.mxu1 %v6038_v55  ;;  %v6071_v54 = vld [vmem:[%s8421_s1 + $0x2e0] ss:$16 sps:$4 sm:$0xff]   ;;  %v6074_v55 = vld [vmem:[%s8421_s1 + $0xe8] ss:$16 sps:$4 sm:$0xff]  }
  0x54   : > { %2066 = vmatprep.subr.bf16.mxu0 %v6043_v62  ;;  %2645 = vmatprep.subr.bf16.mxu1 %v6046_v63  ;;  %v454_v62 = vld [vmem:[%s6483_s30 + $0x540] sm:$0xff]  ;;  %v461_v63 = vld [vmem:[%s6483_s30 + $0x578] sm:$0xff] }
  0x56   : > { %1912 = vmatmul.mubr.bf16.gmra.mrb[4].mxu0 %v6613_v1  ;;  %1992 = vmatmul.mubr.bf16.gmra.mrb[4].mxu1 %v6615_v2 }
  0x57   : > { %2067 = vmatpush1.bf16.msra.mxu0 %v6041_v6  ;;  %2646 = vmatpush1.bf16.msra.mxu1 %v6044_v7  ;;  %v364_v6 = vld [vmem:[%s6483_s30 + $0x270] sm:$0xff]  ;;  %v6749_v7 = vpack.c.bf16 %v349_v61, %v342_v60  ;;  %v385_v61 = vld [vmem:[%s6483_s30 + $0x318] sm:$0xff] }
  0x58   : > { %2068 = vmatprep.subr.bf16.mxu0 %v6049_v8  ;;  %2647 = vmatprep.subr.bf16.mxu1 %v6052_v9  ;;  %v6751_v8 = vpack.c.bf16 %v461_v63, %v454_v62  ;;  %v469_v9 = vld [vmem:[%s6483_s30 + $0x5b8] sm:$0xff]  ;;  %v6101_v60 = vld [vmem:[%s8421_s1 + $0x380] ss:$16 sps:$4 sm:$0xff]  }
  0x59   : > { %1921 = vmatprep.mubr.bf16.mxu0 %v6638_v12  ;;  %2001 = vmatprep.mubr.bf16.mxu1 %v6640_v13  ;;  %v392_v62 = vld [vmem:[%s6483_s30 + $0x350] sm:$0xff] }
  0x5b   : > { %2069 = vmatpush1.bf16.msra.mxu0 %v6047_v10  ;;  %2648 = vmatpush1.bf16.msra.mxu1 %v6050_v11  ;;  %v476_v10 = vld [vmem:[%s6483_s30 + $0x5f0] sm:$0xff]  ;;  %v6080_v11 = vld [vmem:[%s8421_s1 + $0x108] ss:$16 sps:$4 sm:$0xff]  }
  0x5c   : > { %2070 = vmatprep.subr.bf16.mxu0 %v6055_v20  ;;  %2649 = vmatprep.subr.bf16.mxu1 %v6058_v21  ;;  %v6770_v20 = vpack.c.bf16 %v364_v6, %v357_v5  ;;  %v6772_v21 = vpack.c.bf16 %v476_v10, %v469_v9  ;;  %v6104_v5 = vld [vmem:[%s8421_s1 + $0x188] ss:$16 sps:$4 sm:$0xff]   ;;  %v6109_v6 = vld [vmem:[%s8421_s1 + $0x3a4] ss:$16 sps:$4 sm:$0xff]   ;;  %v6112_v9 = vld [vmem:[%s8421_s1 + $0x1ac] ss:$16 sps:$4 sm:$0xff]  }
  0x5d   : > { %v6107_v10 = vld [vmem:[%s8421_s1 + $0x3a0] ss:$16 sps:$4 sm:$0xff]  }
  0x5e   : > { %1922 = vmatmul.mubr.bf16.gmra.mrb[8].mxu0 %v6657_v23  ;;  %2002 = vmatmul.mubr.bf16.gmra.mrb[8].mxu1 %v6659_v24 }
  0x5f   : > { %2071 = vmatpush1.bf16.msra.mxu0 %v6053_v28  ;;  %2650 = vmatpush1.bf16.msra.mxu1 %v6056_v29  ;;  %v6091_v28 = vld [vmem:[%s8421_s1 + $0x344] ss:$16 sps:$4 sm:$0xff]   ;;  %v6094_v29 = vld [vmem:[%s8421_s1 + $0x14c] ss:$16 sps:$4 sm:$0xff]  }
  0x60   : > { %2072 = vmatprep.subr.bf16.mxu0 %v6061_v30  ;;  %2651 = vmatprep.subr.bf16.mxu1 %v6064_v31  ;;  %v6089_v30 = vld [vmem:[%s8421_s1 + $0x340] ss:$16 sps:$4 sm:$0xff]   ;;  %v371_v31 = vld [vmem:[%s6483_s30 + $0x2a8] sm:$0xff] }
  0x61   : > { %1931 = vmatprep.mubr.bf16.mxu0 %v6682_v34  ;;  %2011 = vmatprep.mubr.bf16.mxu1 %v6684_v35 }
  0x63   : > { %2073 = vmatpush1.bf16.msra.mxu0 %v6059_v32  ;;  %2652 = vmatpush1.bf16.msra.mxu1 %v6062_v33  ;;  %v378_v32 = vld [vmem:[%s6483_s30 + $0x2e0] sm:$0xff]  ;;  %v6793_v33 = vpack.c.bf16 %v363_v25, %v356_v22  ;;  %v496_v22 = vld [vmem:[%s6483_s30 + $0x690] sm:$0xff]  ;;  %v503_v25 = vld [vmem:[%s6483_s30 + $0x6c8] sm:$0xff] }
  0x64   : > { %2074 = vmatprep.subr.bf16.mxu0 %v6067_v40  ;;  %2653 = vmatprep.subr.bf16.mxu1 %v6070_v41  ;;  %v6097_v40 = vld [vmem:[%s8421_s1 + $0x364] ss:$16 sps:$4 sm:$0xff]   ;;  %v6100_v41 = vld [vmem:[%s8421_s1 + $0x16c] ss:$16 sps:$4 sm:$0xff]   ;;  %v6814_v44 = vpack.c.bf16 %v378_v32, %v371_v31 }
  0x65   : > { %v289_v31 = vld [vmem:[%s6483_s30 + $0x18] sm:$0xff]  ;;  %v296_v32 = vld [vmem:[%s6483_s30 + $0x50] sm:$0xff] }
  0x66   : > { %1932 = vmatmul.mubr.bf16.gmra.mrb[12].mxu0 %v6705_v47  ;;  %2012 = vmatmul.mubr.bf16.gmra.mrb[12].mxu1 %v6707_v48 }
  0x67   : > { %2075 = vmatpush1.bf16.msra.mxu0 %v6065_v42  ;;  %2654 = vmatpush1.bf16.msra.mxu1 %v6068_v51  ;;  %v6095_v42 = vld [vmem:[%s8421_s1 + $0x360] ss:$16 sps:$4 sm:$0xff]   ;;  %v377_v51 = vld [vmem:[%s6483_s30 + $0x2d8] sm:$0xff] }
  0x68   : > { %2076 = vmatprep.subr.bf16.mxu0 %v6073_v52  ;;  %2655 = vmatprep.subr.bf16.mxu1 %v6076_v53  ;;  %v482_v52 = vld [vmem:[%s6483_s30 + $0x620] sm:$0xff]  ;;  %v489_v53 = vld [vmem:[%s6483_s30 + $0x658] sm:$0xff]  ;;  %v6837_v63 = vpack.c.bf16 %v377_v51, %v370_v50  ;;  %v295_v50 = vld [vmem:[%s6483_s30 + $0x48] sm:$0xff] }
  0x69   : > { %1941 = vmatprep.mubr.bf16.mxu0 %v6726_v58  ;;  %2021 = vmatprep.mubr.bf16.mxu1 %v6728_v59  ;;  %v6127_v51 = vld [vmem:[%s8421_s1 + $0x404] ss:$16 sps:$4 sm:$0xff]  }
  0x6b   : > { %2077 = vmatpush1.bf16.msra.mxu0 %v6071_v54  ;;  %2656 = vmatpush1.bf16.msra.mxu1 %v6074_v55  ;;  %v6103_v54 = vld [vmem:[%s8421_s1 + $0x384] ss:$16 sps:$4 sm:$0xff]   ;;  %v6106_v55 = vld [vmem:[%s8421_s1 + $0x18c] ss:$16 sps:$4 sm:$0xff]  }
  0x6c   : > { %2078 = vmatprep.subr.bf16.mxu0 %v6079_v0  ;;  %2657 = vmatprep.subr.bf16.mxu1 %v6082_v3  ;;  %v6839_v0 = vpack.c.bf16 %v489_v53, %v482_v52  ;;  %v497_v3 = vld [vmem:[%s6483_s30 + $0x698] sm:$0xff]  ;;  %v303_v53 = vld [vmem:[%s6483_s30 + $0x88] sm:$0xff] }
  0x6d   : > { %v6130_v52 = vld [vmem:[%s8421_s1 + $0x20c] ss:$16 sps:$4 sm:$0xff]  }
  0x6e   : > { %1942 = vmatmul.mubr.bf16.gmra.mrb[16].mxu0 %v6749_v7  ;;  %2022 = vmatmul.mubr.bf16.gmra.mrb[16].mxu1 %v6751_v8 }
  0x6f   : > { %2079 = vmatpush1.bf16.msra.mxu0 %v6077_v4  ;;  %2658 = vmatpush1.bf16.msra.mxu1 %v6080_v11  ;;  %v504_v4 = vld [vmem:[%s6483_s30 + $0x6d0] sm:$0xff]  ;;  %v6110_v11 = vld [vmem:[%s8421_s1 + $0x1a8] ss:$16 sps:$4 sm:$0xff]  }
  0x70   : > { %2080 = vmatprep.subr.bf16.mxu0 %v6085_v14  ;;  %2659 = vmatprep.subr.bf16.mxu1 %v6088_v16  ;;  %v6858_v14 = vpack.c.bf16 %v392_v62, %v385_v61  ;;  %v6860_v16 = vpack.c.bf16 %v504_v4, %v497_v3  ;;  %v6128_v61 = vld [vmem:[%s8421_s1 + $0x208] ss:$16 sps:$4 sm:$0xff]   ;;  %v6131_v4 = vld [vmem:[%s8421_s1 + $0x420] ss:$16 sps:$4 sm:$0xff]  }
  0x71   : > { %1951 = vmatprep.mubr.bf16.mxu0 %v6770_v20  ;;  %2031 = vmatprep.mubr.bf16.mxu1 %v6772_v21  ;;  %v309_v3 = vld [vmem:[%s6483_s30 + $0xb8] sm:$0xff] }
  0x73   : > { %2081 = vmatpush1.bf16.msra.mxu0 %v6083_v17  ;;  %2660 = vmatpush1.bf16.msra.mxu1 %v6086_v18  ;;  %v384_v17 = vld [vmem:[%s6483_s30 + $0x310] sm:$0xff]  ;;  %v391_v18 = vld [vmem:[%s6483_s30 + $0x348] sm:$0xff] }
  0x74   : > { %2082 = vmatprep.subr.bf16.mxu0 %v6091_v28  ;;  %2661 = vmatprep.subr.bf16.mxu1 %v6094_v29  ;;  %v6113_v28 = vld [vmem:[%s8421_s1 + $0x3c0] ss:$16 sps:$4 sm:$0xff]   ;;  %v6879_v29 = vpack.c.bf16 %v391_v18, %v384_v17  ;;  %v6139_v17 = vld [vmem:[%s8421_s1 + $0x444] ss:$16 sps:$4 sm:$0xff]  }
  0x76   : > { %1952 = vmatmul.mubr.bf16.gmra.mrb[20].mxu0 %v6793_v33  ;;  %2032 = vmatmul.mubr.bf16.gmra.mrb[20].mxu1 %v6795_v36 }
  0x77   : > { %2083 = vmatpush1.bf16.msra.mxu0 %v6089_v30  ;;  %2662 = vmatpush1.bf16.msra.mxu1 %v6092_v39  ;;  %v6881_v30 = vpack.c.bf16 %v503_v25, %v496_v22  ;;  %v6124_v39 = vld [vmem:[%s8421_s1 + $0x1ec] ss:$16 sps:$4 sm:$0xff]   ;;  %v6137_v25 = vld [vmem:[%s8421_s1 + $0x440] ss:$16 sps:$4 sm:$0xff]  }
  0x78   : > { %2084 = vmatprep.subr.bf16.mxu0 %v6097_v40  ;;  %2663 = vmatprep.subr.bf16.mxu1 %v6100_v41  ;;  %v6119_v40 = vld [vmem:[%s8421_s1 + $0x3e0] ss:$16 sps:$4 sm:$0xff]   ;;  %v6897_v41 = vpack.c.bf16 %v296_v32, %v289_v31  ;;  %v323_v31 = vld [vmem:[%s6483_s30 + $0x128] sm:$0xff] }
  0x79   : > { %1961 = vmatprep.mubr.bf16.mxu0 %v6814_v44  ;;  %2041 = vmatprep.mubr.bf16.mxu1 %v6816_v49  ;;  %v331_v32 = vld [vmem:[%s6483_s30 + $0x168] sm:$0xff] }
  0x7b   : > { %2085 = vmatpush1.bf16.msra.mxu0 %v6095_v42  ;;  %2664 = vmatpush1.bf16.msra.mxu1 %v6098_v43  ;;  %v6122_v42 = vld [vmem:[%s8421_s1 + $0x1e8] ss:$16 sps:$4 sm:$0xff]   ;;  %v288_v43 = vld [vmem:[%s6483_s30 + $0x10] sm:$0xff] }
  0x7c   : > { %2086 = vmatprep.subr.bf16.mxu0 %v6103_v54  ;;  %2665 = vmatprep.subr.bf16.mxu1 %v6106_v55  ;;  %v310_v54 = vld [vmem:[%s6483_s30 + $0xc0] sm:$0xff]  ;;  %v6916_v55 = vpack.c.bf16 %v295_v50, %v288_v43  ;;  %v6152_v50 = vld [vmem:[%s8421_s1 + $0x288] ss:$16 sps:$4 sm:$0xff]  }
  0x7d   : > { %v6924_v62 = vpack.c.bf16 %v310_v54, %v303_v53  ;;  %v6149_v43 = vld [vmem:[%s8421_s1 + $0x480] ss:$16 sps:$4 sm:$0xff]   ;;  %v6160_v53 = vld [vmem:[%s8421_s1 + $0x2ac] ss:$16 sps:$4 sm:$0xff]  }
  0x7e   : > { %1962 = vmatmul.mubr.bf16.gmra.mrb[24].mxu0 %v6837_v63  ;;  %2042 = vmatmul.mubr.bf16.gmra.mrb[24].mxu1 %v6839_v0  ;;  %v337_v54 = vld [vmem:[%s6483_s30 + $0x198] sm:$0xff] }
  0x7f   : > { %2087 = vmatpush1.bf16.msra.mxu0 %v6101_v60  ;;  %2666 = vmatpush1.bf16.msra.mxu1 %v6104_v5  ;;  %v6125_v60 = vld [vmem:[%s8421_s1 + $0x400] ss:$16 sps:$4 sm:$0xff]   ;;  %v6133_v5 = vld [vmem:[%s8421_s1 + $0x424] ss:$16 sps:$4 sm:$0xff]  }
  0x80   : > { %2088 = vmatprep.subr.bf16.mxu0 %v6109_v6  ;;  %2667 = vmatprep.subr.bf16.mxu1 %v6112_v9  ;;  %v6136_v6 = vld [vmem:[%s8421_s1 + $0x22c] ss:$16 sps:$4 sm:$0xff]   ;;  %v6134_v9 = vld [vmem:[%s8421_s1 + $0x228] ss:$16 sps:$4 sm:$0xff]  }
  0x81   : > { %1971 = vmatprep.mubr.bf16.mxu0 %v6858_v14  ;;  %2051 = vmatprep.mubr.bf16.mxu1 %v6860_v16 }
  0x83   : > { %2089 = vmatpush1.bf16.msra.mxu0 %v6107_v10  ;;  %2668 = vmatpush1.bf16.msra.mxu1 %v6110_v11  ;;  %v317_v10 = vld [vmem:[%s6483_s30 + $0xf8] sm:$0xff]  ;;  %v324_v11 = vld [vmem:[%s6483_s30 + $0x130] sm:$0xff] }
  0x84   : > { %2090 = vmatprep.subr.bf16.mxu0 %v6115_v26  ;;  %2669 = vmatprep.subr.bf16.mxu1 %v6118_v27  ;;  %v6954_v22 = vpack.c.bf16 %v324_v11, %v317_v10  ;;  %v316_v26 = vld [vmem:[%s6483_s30 + $0xf0] sm:$0xff]  ;;  %v6172_v11 = vld [vmem:[%s8421_s1 + $0x2ec] ss:$16 sps:$4 sm:$0xff]  }
  0x85   : > { %v6145_v27 = vld [vmem:[%s8421_s1 + $0x464] ss:$16 sps:$4 sm:$0xff]  }
  0x86   : > { %1972 = vmatmul.mubr.bf16.gmra.mrb[28].mxu0 %v6879_v29  ;;  %2052 = vmatmul.mubr.bf16.gmra.mrb[28].mxu1 %v6881_v30  ;;  %v6169_v10 = vld [vmem:[%s8421_s1 + $0x4e4] ss:$16 sps:$4 sm:$0xff]  }
  0x87   : > { %2091 = vmatpush1.bf16.msra.mxu0 %v6113_v28  ;;  %2670 = vmatpush1.bf16.msra.mxu1 %v6116_v37  ;;  %v6148_v28 = vld [vmem:[%s8421_s1 + $0x26c] ss:$16 sps:$4 sm:$0xff]   ;;  %v338_v37 = vld [vmem:[%s6483_s30 + $0x1a0] sm:$0xff] }
  0x88   : > { %2092 = vmatprep.subr.bf16.mxu0 %v6121_v38  ;;  %2671 = vmatprep.subr.bf16.mxu1 %v6124_v39  ;;  %v6143_v38 = vld [vmem:[%s8421_s1 + $0x460] ss:$16 sps:$4 sm:$0xff]   ;;  %v6146_v39 = vld [vmem:[%s8421_s1 + $0x268] ss:$16 sps:$4 sm:$0xff]  }
  0x89   : > { %2094 = vmatprep.mubr.bf16.mxu0 %v6897_v41  ;;  %2673 = vmatprep.mubr.bf16.mxu1 %v6493_v15  ;;  %v302_v15 = vld [vmem:[%s6483_s30 + $0x80] sm:$0xff] }
  0x8a   : > { %v6952_v18 = vpack.c.bf16 %v309_v3, %v302_v15  ;;  %v6155_v15 = vld [vmem:[%s8421_s1 + $0x4a0] ss:$16 sps:$4 sm:$0xff]   ;;  %v6158_v3 = vld [vmem:[%s8421_s1 + $0x2a8] ss:$16 sps:$4 sm:$0xff]  }
  0x8b   : > { %2093 = vmatpush1.bf16.msra.mxu0 %v6119_v40  ;;  %2672 = vmatpush1.bf16.msra.mxu1 %v6122_v42  ;;  %v6988_v40 = vpack.c.bf16 %v323_v31, %v316_v26  ;;  %v6990_v42 = vpack.c.bf16 %v338_v37, %v331_v32  ;;  %v6167_v26 = vld [vmem:[%s8421_s1 + $0x4e0] ss:$16 sps:$4 sm:$0xff]   ;;  %v6176_v37 = vld [vmem:[%s8421_s1 + $0x308] ss:$16 sps:$4 sm:$0xff]  }
  0x8c   : > { %2255 = vmatprep.subr.bf16.mxu0 %v6127_v51  ;;  %2834 = vmatprep.subr.bf16.mxu1 %v6130_v52  ;;  %v330_v51 = vld [vmem:[%s6483_s30 + $0x160] sm:$0xff] }
  0x8d   : > { %v6157_v52 = vld [vmem:[%s8421_s1 + $0x4a4] ss:$16 sps:$4 sm:$0xff]   ;;  %v6173_v32 = vld [vmem:[%s8421_s1 + $0x500] ss:$16 sps:$4 sm:$0xff]  }
  0x8e   : > { %2095 = vmatmul.mubr.bf16.vlgmr.msra.gmra.mrb[0].mxu0 %v6916_v55  ;;  %2674 = vmatmul.mubr.bf16.vlgmr.msra.gmra.mrb[32].mxu1 %v6569_v45  ;;  %v6142_v45 = vld [vmem:[%s8421_s1 + $0x24c] ss:$16 sps:$4 sm:$0xff]  }
  0x8f   : > { %2256 = vmatpush1.bf16.msra.mxu0 %v6125_v60  ;;  %2835 = vmatpush1.bf16.msra.mxu1 %v6128_v61  ;;  %v345_v60 = vld [vmem:[%s6483_s30 + $0x1d8] sm:$0xff]  ;;  %v352_v61 = vld [vmem:[%s6483_s30 + $0x210] sm:$0xff] }
  0x90   : > { %2104 = vmatprep.mubr.bf16.mxu0 %v6924_v62  ;;  %2683 = vmatprep.mubr.bf16.mxu1 %v6594_v56  ;;  %v6140_v56 = vld [vmem:[%s8421_s1 + $0x248] ss:$16 sps:$4 sm:$0xff]  }
  0x91   : > { %2257 = vmatprep.subr.bf16.mxu0 %v6133_v5  ;;  %2836 = vmatprep.subr.bf16.mxu1 %v6136_v6  ;;  %v7026_v5 = vpack.c.bf16 %v352_v61, %v345_v60  ;;  %v6161_v6 = vld [vmem:[%s8421_s1 + $0x4c0] ss:$16 sps:$4 sm:$0xff]   ;;  %v6188_v60 = vld [vmem:[%s8421_s1 + $0x348] ss:$16 sps:$4 sm:$0xff]  }
  0x93   : > { %2258 = vmatpush1.bf16.msra.mxu0 %v6131_v4  ;;  %2837 = vmatpush1.bf16.msra.mxu1 %v6134_v9  ;;  %v7024_v4 = vpack.c.bf16 %v337_v54, %v330_v51  ;;  %v6164_v9 = vld [vmem:[%s8421_s1 + $0x2c8] ss:$16 sps:$4 sm:$0xff]   ;;  %v6179_v51 = vld [vmem:[%s8421_s1 + $0x520] ss:$16 sps:$4 sm:$0xff]  }
  0x94   : > { %2259 = vmatprep.subr.bf16.mxu0 %v6139_v17  ;;  %2838 = vmatprep.subr.bf16.mxu1 %v6142_v45  ;;  %v344_v17 = vld [vmem:[%s6483_s30 + $0x1d0] sm:$0xff]  ;;  %v351_v45 = vld [vmem:[%s6483_s30 + $0x208] sm:$0xff] }
  0x96   : > { %2105 = vmatmul.mubr.bf16.gmra.mrb[4].mxu0 %v6952_v18  ;;  %2684 = vmatmul.mubr.bf16.gmra.mrb[36].mxu1 %v6613_v1  ;;  %v6151_v1 = vld [vmem:[%s8421_s1 + $0x484] ss:$16 sps:$4 sm:$0xff]  }
  0x97   : > { %2114 = vmatprep.mubr.bf16.mxu0 %v6954_v22  ;;  %2693 = vmatprep.mubr.bf16.mxu1 %v6638_v12  ;;  %v6154_v12 = vld [vmem:[%s8421_s1 + $0x28c] ss:$16 sps:$4 sm:$0xff]  }
  0x98   : > { %2260 = vmatpush1.bf16.msra.mxu0 %v6137_v25  ;;  %2839 = vmatpush1.bf16.msra.mxu1 %v6140_v56  ;;  %v359_v25 = vld [vmem:[%s6483_s30 + $0x248] sm:$0xff]  ;;  %v366_v56 = vld [vmem:[%s6483_s30 + $0x280] sm:$0xff] }
  0x99   : > { %2261 = vmatprep.subr.bf16.mxu0 %v6145_v27  ;;  %2840 = vmatprep.subr.bf16.mxu1 %v6148_v28  ;;  %v6175_v27 = vld [vmem:[%s8421_s1 + $0x504] ss:$16 sps:$4 sm:$0xff]   ;;  %v7060_v28 = vpack.c.bf16 %v351_v45, %v344_v17  ;;  %v7062_v31 = vpack.c.bf16 %v366_v56, %v359_v25  ;;  %v6202_v17 = vld [vmem:[%s8421_s1 + $0x38c] ss:$16 sps:$4 sm:$0xff]   ;;  %v6200_v25 = vld [vmem:[%s8421_s1 + $0x388] ss:$16 sps:$4 sm:$0xff]  }
  0x9c   : > { %2262 = vmatpush1.bf16.msra.mxu0 %v6143_v38  ;;  %2841 = vmatpush1.bf16.msra.mxu1 %v6146_v39  ;;  %v358_v38 = vld [vmem:[%s6483_s30 + $0x240] sm:$0xff]  ;;  %v365_v39 = vld [vmem:[%s6483_s30 + $0x278] sm:$0xff] }
  0x9d   : > { %2263 = vmatprep.subr.bf16.mxu0 %v6151_v1  ;;  %2842 = vmatprep.subr.bf16.mxu1 %v6154_v12  ;;  %v6181_v1 = vld [vmem:[%s8421_s1 + $0x524] ss:$16 sps:$4 sm:$0xff]   ;;  %v6184_v12 = vld [vmem:[%s8421_s1 + $0x32c] ss:$16 sps:$4 sm:$0xff]   ;;  %v7096_v54 = vpack.c.bf16 %v365_v39, %v358_v38  ;;  %v6203_v38 = vld [vmem:[%s8421_s1 + $0x5a0] ss:$16 sps:$4 sm:$0xff]  }
  0x9e   : > { %2115 = vmatmul.mubr.bf16.gmra.mrb[8].mxu0 %v6988_v40  ;;  %2694 = vmatmul.mubr.bf16.gmra.mrb[40].mxu1 %v6657_v23  ;;  %v6163_v23 = vld [vmem:[%s8421_s1 + $0x4c4] ss:$16 sps:$4 sm:$0xff]   ;;  %v6206_v39 = vld [vmem:[%s8421_s1 + $0x3a8] ss:$16 sps:$4 sm:$0xff]  }
  0x9f   : > { %2124 = vmatprep.mubr.bf16.mxu0 %v6990_v42  ;;  %2703 = vmatprep.mubr.bf16.mxu1 %v6682_v34  ;;  %v6166_v34 = vld [vmem:[%s8421_s1 + $0x2cc] ss:$16 sps:$4 sm:$0xff]  }
  0xa0   : > { %2264 = vmatpush1.bf16.msra.mxu0 %v6149_v43  ;;  %2843 = vmatpush1.bf16.msra.mxu1 %v6152_v50  ;;  %v373_v43 = vld [vmem:[%s6483_s30 + $0x2b8] sm:$0xff]  ;;  %v380_v50 = vld [vmem:[%s6483_s30 + $0x2f0] sm:$0xff] }
  0xa1   : > { %2265 = vmatprep.subr.bf16.mxu0 %v6157_v52  ;;  %2844 = vmatprep.subr.bf16.mxu1 %v6160_v53  ;;  %v6182_v52 = vld [vmem:[%s8421_s1 + $0x328] ss:$16 sps:$4 sm:$0xff]   ;;  %v6190_v53 = vld [vmem:[%s8421_s1 + $0x34c] ss:$16 sps:$4 sm:$0xff]   ;;  %v7104_v61 = vpack.c.bf16 %v380_v50, %v373_v43 }
  0xa2   : > { %v6212_v43 = vld [vmem:[%s8421_s1 + $0x3c8] ss:$16 sps:$4 sm:$0xff]  }
  0xa4   : > { %2266 = vmatpush1.bf16.msra.mxu0 %v6155_v15  ;;  %2845 = vmatpush1.bf16.msra.mxu1 %v6158_v3  ;;  %v6193_v15 = vld [vmem:[%s8421_s1 + $0x564] ss:$16 sps:$4 sm:$0xff]   ;;  %v6196_v3 = vld [vmem:[%s8421_s1 + $0x36c] ss:$16 sps:$4 sm:$0xff]  }
  0xa5   : > { %2267 = vmatprep.subr.bf16.mxu0 %v6163_v23  ;;  %2846 = vmatprep.subr.bf16.mxu1 %v6166_v34  ;;  %v372_v23 = vld [vmem:[%s6483_s30 + $0x2b0] sm:$0xff]  ;;  %v379_v34 = vld [vmem:[%s6483_s30 + $0x2e8] sm:$0xff] }
  0xa6   : > { %2125 = vmatmul.mubr.bf16.gmra.mrb[12].mxu0 %v7024_v4  ;;  %2704 = vmatmul.mubr.bf16.gmra.mrb[44].mxu1 %v6705_v47  ;;  %v6170_v47 = vld [vmem:[%s8421_s1 + $0x2e8] ss:$16 sps:$4 sm:$0xff]   ;;  %v7132_v45 = vpack.c.bf16 %v379_v34, %v372_v23  ;;  %v6226_v23 = vld [vmem:[%s8421_s1 + $0x40c] ss:$16 sps:$4 sm:$0xff]  }
  0xa7   : > { %2134 = vmatprep.mubr.bf16.mxu0 %v7026_v5  ;;  %2713 = vmatprep.mubr.bf16.mxu1 %v6726_v58  ;;  %v6178_v58 = vld [vmem:[%s8421_s1 + $0x30c] ss:$16 sps:$4 sm:$0xff]  }
  0xa8   : > { %2268 = vmatpush1.bf16.msra.mxu0 %v6161_v6  ;;  %2847 = vmatpush1.bf16.msra.mxu1 %v6164_v9  ;;  %v387_v6 = vld [vmem:[%s6483_s30 + $0x328] sm:$0xff]  ;;  %v394_v9 = vld [vmem:[%s6483_s30 + $0x360] sm:$0xff] }
  0xa9   : > { %2269 = vmatprep.subr.bf16.mxu0 %v6169_v10  ;;  %2848 = vmatprep.subr.bf16.mxu1 %v6172_v11  ;;  %v6191_v10 = vld [vmem:[%s8421_s1 + $0x560] ss:$16 sps:$4 sm:$0xff]   ;;  %v6194_v11 = vld [vmem:[%s8421_s1 + $0x368] ss:$16 sps:$4 sm:$0xff]   ;;  %v7140_v56 = vpack.c.bf16 %v394_v9, %v387_v6 }
  0xaa   : > { %v421_v9 = vld [vmem:[%s6483_s30 + $0x438] sm:$0xff] }
  0xac   : > { %2270 = vmatpush1.bf16.msra.mxu0 %v6167_v26  ;;  %2849 = vmatpush1.bf16.msra.mxu1 %v6170_v47  ;;  %v6205_v26 = vld [vmem:[%s8421_s1 + $0x5a4] ss:$16 sps:$4 sm:$0xff]   ;;  %v6208_v47 = vld [vmem:[%s8421_s1 + $0x3ac] ss:$16 sps:$4 sm:$0xff]  }
  0xad   : > { %2271 = vmatprep.subr.bf16.mxu0 %v6175_v27  ;;  %2850 = vmatprep.subr.bf16.mxu1 %v6178_v58  ;;  %v386_v27 = vld [vmem:[%s6483_s30 + $0x320] sm:$0xff]  ;;  %v393_v58 = vld [vmem:[%s6483_s30 + $0x358] sm:$0xff] }
  0xae   : > { %2135 = vmatmul.mubr.bf16.gmra.mrb[16].mxu0 %v7060_v28  ;;  %2714 = vmatmul.mubr.bf16.gmra.mrb[48].mxu1 %v6749_v7  ;;  %v6187_v7 = vld [vmem:[%s8421_s1 + $0x544] ss:$16 sps:$4 sm:$0xff]  }
  0xaf   : > { %2144 = vmatprep.mubr.bf16.mxu0 %v7062_v31  ;;  %2723 = vmatprep.mubr.bf16.mxu1 %v6770_v20  ;;  %v6185_v20 = vld [vmem:[%s8421_s1 + $0x540] ss:$16 sps:$4 sm:$0xff]  }
  0xb0   : > { %2272 = vmatpush1.bf16.msra.mxu0 %v6173_v32  ;;  %2851 = vmatpush1.bf16.msra.mxu1 %v6176_v37  ;;  %v401_v32 = vld [vmem:[%s6483_s30 + $0x398] sm:$0xff]  ;;  %v408_v37 = vld [vmem:[%s6483_s30 + $0x3d0] sm:$0xff] }
  0xb1   : > { %2273 = vmatprep.subr.bf16.mxu0 %v6181_v1  ;;  %2852 = vmatprep.subr.bf16.mxu1 %v6184_v12  ;;  %v6214_v1 = vld [vmem:[%s8421_s1 + $0x3cc] ss:$16 sps:$4 sm:$0xff]   ;;  %v7168_v12 = vpack.c.bf16 %v393_v58, %v386_v27  ;;  %v7176_v50 = vpack.c.bf16 %v408_v37, %v401_v32  ;;  %v442_v27 = vld [vmem:[%s6483_s30 + $0x4e0] sm:$0xff] }
  0xb2   : > { %v457_v58 = vld [vmem:[%s6483_s30 + $0x558] sm:$0xff] }
  0xb4   : > { %2274 = vmatpush1.bf16.msra.mxu0 %v6179_v51  ;;  %2853 = vmatpush1.bf16.msra.mxu1 %v6182_v52  ;;  %v6217_v51 = vld [vmem:[%s8421_s1 + $0x5e4] ss:$16 sps:$4 sm:$0xff]   ;;  %v6220_v52 = vld [vmem:[%s8421_s1 + $0x3ec] ss:$16 sps:$4 sm:$0xff]  }
  0xb5   : > { %2275 = vmatprep.subr.bf16.mxu0 %v6187_v7  ;;  %2854 = vmatprep.subr.bf16.mxu1 %v6190_v53  ;;  %v400_v7 = vld [vmem:[%s6483_s30 + $0x390] sm:$0xff]  ;;  %v407_v53 = vld [vmem:[%s6483_s30 + $0x3c8] sm:$0xff] }
  0xb6   : > { %2145 = vmatmul.mubr.bf16.gmra.mrb[20].mxu0 %v7096_v54  ;;  %2724 = vmatmul.mubr.bf16.gmra.mrb[52].mxu1 %v6793_v33  ;;  %v6199_v33 = vld [vmem:[%s8421_s1 + $0x584] ss:$16 sps:$4 sm:$0xff]   ;;  %v7204_v34 = vpack.c.bf16 %v407_v53, %v400_v7  ;;  %v499_v7 = vld [vmem:[%s6483_s30 + $0x6a8] sm:$0xff] }
  0xb7   : > { %2154 = vmatprep.mubr.bf16.mxu0 %v7104_v61  ;;  %2733 = vmatprep.mubr.bf16.mxu1 %v6814_v44  ;;  %v6197_v44 = vld [vmem:[%s8421_s1 + $0x580] ss:$16 sps:$4 sm:$0xff]  }
  0xb8   : > { %2276 = vmatpush1.bf16.msra.mxu0 %v6185_v20  ;;  %2855 = vmatpush1.bf16.msra.mxu1 %v6188_v60  ;;  %v415_v20 = vld [vmem:[%s6483_s30 + $0x408] sm:$0xff]  ;;  %v422_v60 = vld [vmem:[%s6483_s30 + $0x440] sm:$0xff] }
  0xb9   : > { %2277 = vmatprep.subr.bf16.mxu0 %v6193_v15  ;;  %2856 = vmatprep.subr.bf16.mxu1 %v6196_v3  ;;  %v6215_v15 = vld [vmem:[%s8421_s1 + $0x5e0] ss:$16 sps:$4 sm:$0xff]   ;;  %v6218_v3 = vld [vmem:[%s8421_s1 + $0x3e8] ss:$16 sps:$4 sm:$0xff]   ;;  %v7206_v6 = vpack.c.bf16 %v422_v60, %v415_v20 }
  0xba   : > { %v506_v53 = vld [vmem:[%s6483_s30 + $0x6e0] sm:$0xff] }
  0xbb   : > { %v7278_v60 = vpack.c.bf16 %v506_v53, %v499_v7  ;;  %v339_v7 = vld [vmem:[%s6483_s30 + $0x1a8] sm:$0xff] }
  0xbc   : > { %2278 = vmatpush1.bf16.msra.mxu0 %v6191_v10  ;;  %2857 = vmatpush1.bf16.msra.mxu1 %v6194_v11  ;;  %v429_v10 = vld [vmem:[%s6483_s30 + $0x478] sm:$0xff]  ;;  %v436_v11 = vld [vmem:[%s6483_s30 + $0x4b0] sm:$0xff]  ;;  %v347_v53 = vld [vmem:[%s6483_s30 + $0x1e8] sm:$0xff] }
  0xbd   : > { %2279 = vmatprep.subr.bf16.mxu0 %v6199_v33  ;;  %2858 = vmatprep.subr.bf16.mxu1 %v6202_v17  ;;  %v7218_v17 = vpack.c.bf16 %v436_v11, %v429_v10  ;;  %v6221_v11 = vld [vmem:[%s8421_s1 + $0x600] ss:$16 sps:$4 sm:$0xff]  }
  0xbe   : > { %2155 = vmatmul.mubr.bf16.gmra.mrb[24].mxu0 %v7132_v45  ;;  %2734 = vmatmul.mubr.bf16.gmra.mrb[56].mxu1 %v6837_v63  ;;  %v6211_v63 = vld [vmem:[%s8421_s1 + $0x5c4] ss:$16 sps:$4 sm:$0xff]  }
  0xbf   : > { %2164 = vmatprep.mubr.bf16.mxu0 %v7140_v56  ;;  %2743 = vmatprep.mubr.bf16.mxu1 %v6858_v14  ;;  %v6209_v14 = vld [vmem:[%s8421_s1 + $0x5c0] ss:$16 sps:$4 sm:$0xff]  }
  0xc0   : > { %2280 = vmatpush1.bf16.msra.mxu0 %v6197_v44  ;;  %2859 = vmatpush1.bf16.msra.mxu1 %v6200_v25  ;;  %v428_v44 = vld [vmem:[%s6483_s30 + $0x470] sm:$0xff]  ;;  %v435_v25 = vld [vmem:[%s6483_s30 + $0x4a8] sm:$0xff] }
  0xc1   : > { %2281 = vmatprep.subr.bf16.mxu0 %v6205_v26  ;;  %2860 = vmatprep.subr.bf16.mxu1 %v6208_v47  ;;  %v450_v26 = vld [vmem:[%s6483_s30 + $0x520] sm:$0xff] }
  0xc4   : > { %2282 = vmatpush1.bf16.msra.mxu0 %v6203_v38  ;;  %2861 = vmatpush1.bf16.msra.mxu1 %v6206_v39  ;;  %v471_v38 = vld [vmem:[%s6483_s30 + $0x5c8] sm:$0xff]  ;;  %v478_v39 = vld [vmem:[%s6483_s30 + $0x600] sm:$0xff] }
  0xc5   : > { %2283 = vmatprep.subr.bf16.mxu0 %v6211_v63  ;;  %2862 = vmatprep.subr.bf16.mxu1 %v6214_v1  ;;  %v7254_v1 = vpack.c.bf16 %v478_v39, %v471_v38  ;;  %v325_v38 = vld [vmem:[%s6483_s30 + $0x138] sm:$0xff] }
  0xc6   : > { %2165 = vmatmul.mubr.bf16.gmra.mrb[28].mxu0 %v7168_v12  ;;  %2744 = vmatmul.mubr.bf16.gmra.mrb[60].mxu1 %v6879_v29  ;;  %v6223_v29 = vld [vmem:[%s8421_s1 + $0x604] ss:$16 sps:$4 sm:$0xff]   ;;  %v333_v39 = vld [vmem:[%s6483_s30 + $0x178] sm:$0xff] }
  0xc7   : > { %2174 = vmatprep.mubr.bf16.mxu0 %v7176_v50  ;;  %2753 = vmatprep.mubr.bf16.mxu1 %v6500_v19  ;;  %v414_v19 = vld [vmem:[%s6483_s30 + $0x400] sm:$0xff] }
  0xc8   : > { %2284 = vmatpush1.bf16.msra.mxu0 %v6209_v14  ;;  %2863 = vmatpush1.bf16.msra.mxu1 %v6212_v43  ;;  %v7216_v33 = vpack.c.bf16 %v421_v9, %v414_v19  ;;  %v485_v14 = vld [vmem:[%s6483_s30 + $0x638] sm:$0xff]  ;;  %v492_v43 = vld [vmem:[%s6483_s30 + $0x670] sm:$0xff] }
  0xc9   : > { %2285 = vmatprep.subr.bf16.mxu0 %v6217_v51  ;;  %2864 = vmatprep.subr.bf16.mxu1 %v6220_v52  ;;  %v7266_v52 = vpack.c.bf16 %v492_v43, %v485_v14  ;;  %v305_v19 = vld [vmem:[%s6483_s30 + $0x98] sm:$0xff]  ;;  %v312_v9 = vld [vmem:[%s6483_s30 + $0xd0] sm:$0xff] }
  0xca   : > { %v6236_v43 = vld [vmem:[%s8421_s1 + $0x488] ss:$16 sps:$4 sm:$0xff]  }
  0xcc   : > { %2286 = vmatpush1.bf16.msra.mxu0 %v6215_v15  ;;  %2865 = vmatpush1.bf16.msra.mxu1 %v6218_v3  ;;  %v291_v15 = vld [vmem:[%s6483_s30 + $0x28] sm:$0xff]  ;;  %v298_v3 = vld [vmem:[%s6483_s30 + $0x60] sm:$0xff] }
  0xcd   : > { %2448 = vmatprep.subr.bf16.mxu0 %v6223_v29  ;;  %3027 = vmatprep.subr.bf16.mxu1 %v6226_v23  ;;  %v7290_v23 = vpack.c.bf16 %v298_v3, %v291_v15 }
  0xce   : > { %2175 = vmatmul.mubr.bf16.gmra.mrb[32].mxu0 %v7204_v34  ;;  %2754 = vmatmul.mubr.bf16.gmra.mrb[64].mxu1 %v6571_v46  ;;  %v443_v46 = vld [vmem:[%s6483_s30 + $0x4e8] sm:$0xff] }
  0xcf   : > { %2184 = vmatprep.mubr.bf16.mxu0 %v7206_v6  ;;  %2763 = vmatprep.mubr.bf16.mxu1 %v6596_v57  ;;  %v7228_v57 = vpack.c.bf16 %v435_v25, %v428_v44  ;;  %v7230_v47 = vpack.c.bf16 %v450_v26, %v443_v46  ;;  %v7308_v44 = vpack.c.bf16 %v312_v9, %v305_v19  ;;  %v304_v25 = vld [vmem:[%s6483_s30 + $0x90] sm:$0xff]  ;;  %v311_v46 = vld [vmem:[%s6483_s30 + $0xc8] sm:$0xff] }
  0xd0   : > { %v6227_v26 = vld [vmem:[%s8421_s1 + $0x428] ss:$16 sps:$4 sm:$0xff]  }
  0xd1   : > { %v6242_v9 = vld [vmem:[%s8421_s1 + $0x4c8] ss:$16 sps:$4 sm:$0xff]  }
  0xd6   : > { %2185 = vmatmul.mubr.bf16.gmra.mrb[36].mxu0 %v7216_v33  ;;  %2764 = vmatmul.mubr.bf16.gmra.mrb[68].mxu1 %v6615_v2  ;;  %v449_v2 = vld [vmem:[%s6483_s30 + $0x518] sm:$0xff] }
  0xd7   : > { %2194 = vmatprep.mubr.bf16.mxu0 %v7218_v17  ;;  %2773 = vmatprep.mubr.bf16.mxu1 %v6640_v13  ;;  %v464_v13 = vld [vmem:[%s6483_s30 + $0x590] sm:$0xff]  ;;  %v7240_v32 = vpack.c.bf16 %v449_v2, %v442_v27  ;;  %v319_v27 = vld [vmem:[%s6483_s30 + $0x108] sm:$0xff]  ;;  %v326_v2 = vld [vmem:[%s6483_s30 + $0x140] sm:$0xff] }
  0xd8   : > { %v7242_v37 = vpack.c.bf16 %v464_v13, %v457_v58  ;;  %v7327_v58 = vpack.c.bf16 %v311_v46, %v304_v25  ;;  %v7329_v13 = vpack.c.bf16 %v326_v2, %v319_v27  ;;  %v361_v25 = vld [vmem:[%s6483_s30 + $0x258] sm:$0xff]  ;;  %v368_v46 = vld [vmem:[%s6483_s30 + $0x290] sm:$0xff] }
  0xde   : > { %2195 = vmatmul.mubr.bf16.gmra.mrb[40].mxu0 %v7228_v57  ;;  %2774 = vmatmul.mubr.bf16.gmra.mrb[72].mxu1 %v6659_v24  ;;  %v456_v24 = vld [vmem:[%s6483_s30 + $0x550] sm:$0xff] }
  0xdf   : > { %2204 = vmatprep.mubr.bf16.mxu0 %v7230_v47  ;;  %2783 = vmatprep.mubr.bf16.mxu1 %v6684_v35  ;;  %v463_v35 = vld [vmem:[%s6483_s30 + $0x588] sm:$0xff] }
  0xe0   : > { %v7252_v63 = vpack.c.bf16 %v463_v35, %v456_v24  ;;  %v6230_v24 = vld [vmem:[%s8421_s1 + $0x448] ss:$16 sps:$4 sm:$0xff]   ;;  %v318_v35 = vld [vmem:[%s6483_s30 + $0x100] sm:$0xff] }
  0xe1   : > { %v7351_v14 = vpack.c.bf16 %v325_v38, %v318_v35  ;;  %v6248_v35 = vld [vmem:[%s8421_s1 + $0x508] ss:$16 sps:$4 sm:$0xff]   ;;  %v6253_v38 = vld [vmem:[%s8421_s1 + $0x52c] ss:$16 sps:$4 sm:$0xff]  }
  0xe6   : > { %2205 = vmatmul.mubr.bf16.gmra.mrb[44].mxu0 %v7240_v32  ;;  %2784 = vmatmul.mubr.bf16.gmra.mrb[76].mxu1 %v6707_v48  ;;  %v470_v48 = vld [vmem:[%s6483_s30 + $0x5c0] sm:$0xff] }
  0xe7   : > { %2214 = vmatprep.mubr.bf16.mxu0 %v7242_v37  ;;  %2793 = vmatprep.mubr.bf16.mxu1 %v6728_v59  ;;  %v477_v59 = vld [vmem:[%s6483_s30 + $0x5f8] sm:$0xff] }
  0xe8   : > { %v7264_v51 = vpack.c.bf16 %v477_v59, %v470_v48  ;;  %v340_v48 = vld [vmem:[%s6483_s30 + $0x1b0] sm:$0xff]  ;;  %v6233_v59 = vld [vmem:[%s8421_s1 + $0x468] ss:$16 sps:$4 sm:$0xff]  }
  0xee   : > { %2215 = vmatmul.mubr.bf16.gmra.mrb[48].mxu0 %v7252_v63  ;;  %2794 = vmatmul.mubr.bf16.gmra.mrb[80].mxu1 %v6751_v8  ;;  %v484_v8 = vld [vmem:[%s6483_s30 + $0x630] sm:$0xff] }
  0xef   : > { %2224 = vmatprep.mubr.bf16.mxu0 %v7254_v1  ;;  %2803 = vmatprep.mubr.bf16.mxu1 %v6772_v21  ;;  %v491_v21 = vld [vmem:[%s6483_s30 + $0x668] sm:$0xff] }
  0xf0   : > { %v7276_v20 = vpack.c.bf16 %v491_v21, %v484_v8  ;;  %v6241_v8 = vld [vmem:[%s8421_s1 + $0x4ac] ss:$16 sps:$4 sm:$0xff]   ;;  %v332_v21 = vld [vmem:[%s6483_s30 + $0x170] sm:$0xff] }
  0xf1   : > { %v7379_v3 = vpack.c.bf16 %v339_v7, %v332_v21 }
  0xf6   : > { %2225 = vmatmul.mubr.bf16.gmra.mrb[52].mxu0 %v7264_v51  ;;  %2804 = vmatmul.mubr.bf16.gmra.mrb[84].mxu1 %v6795_v36  ;;  %v498_v36 = vld [vmem:[%s6483_s30 + $0x6a0] sm:$0xff] }
  0xf7   : > { %2234 = vmatprep.mubr.bf16.mxu0 %v7266_v52  ;;  %2813 = vmatprep.mubr.bf16.mxu1 %v6816_v49  ;;  %v505_v49 = vld [vmem:[%s6483_s30 + $0x6d8] sm:$0xff] }
  0xf8   : > { %v7288_v29 = vpack.c.bf16 %v505_v49, %v498_v36  ;;  %v354_v36 = vld [vmem:[%s6483_s30 + $0x220] sm:$0xff]  ;;  %v6239_v49 = vld [vmem:[%s8421_s1 + $0x4a8] ss:$16 sps:$4 sm:$0xff]  }
  0xfe   : > { %2235 = vmatmul.mubr.bf16.gmra.mrb[56].mxu0 %v7276_v20  ;;  %2814 = vmatmul.mubr.bf16.gmra.mrb[88].mxu1 %v6839_v0  ;;  %v290_v0 = vld [vmem:[%s6483_s30 + $0x20] sm:$0xff] }
  0xff   : > { %2244 = vmatprep.mubr.bf16.mxu0 %v7278_v60  ;;  %2823 = vmatprep.mubr.bf16.mxu1 %v6860_v16  ;;  %v297_v16 = vld [vmem:[%s6483_s30 + $0x58] sm:$0xff] }
 0x100   : > { %v7300_v10 = vpack.c.bf16 %v297_v16, %v290_v0  ;;  %v7383_v16 = vpack.c.bf16 %v354_v36, %v347_v53 }
 0x106   : > { %2245 = vmatmul.mubr.bf16.gmra.mrb[60].mxu0 %v7288_v29  ;;  %2824 = vmatmul.mubr.bf16.gmra.mrb[92].mxu1 %v6881_v30  ;;  %v6224_v30 = vld [vmem:[%s8421_s1 + $0x408] ss:$16 sps:$4 sm:$0xff]  }
 0x107   : > { %2287 = vmatprep.mubr.bf16.mxu0 %v7290_v23  ;;  %2866 = vmatprep.mubr.bf16.mxu1 %v6897_v41  ;;  %v6229_v41 = vld [vmem:[%s8421_s1 + $0x42c] ss:$16 sps:$4 sm:$0xff]  }
 0x10e   : > { %2288 = vmatmul.mubr.bf16.vlgmr.msra.gmra.mrb[0].mxu0 %v7300_v10  ;;  %2867 = vmatmul.mubr.bf16.vlgmr.msra.gmra.mrb[32].mxu1 %v6916_v55  ;;  %v6232_v55 = vld [vmem:[%s8421_s1 + $0x44c] ss:$16 sps:$4 sm:$0xff]  }
 0x10f   : > { %2449 = vmatpush1.bf16.msra.mxu0 %v6221_v11  ;;  %3028 = vmatpush1.bf16.msra.mxu1 %v6224_v30  ;;  %v6247_v11 = vld [vmem:[%s8421_s1 + $0x4ec] ss:$16 sps:$4 sm:$0xff]   ;;  %v346_v30 = vld [vmem:[%s6483_s30 + $0x1e0] sm:$0xff] }
 0x110   : > { %2297 = vmatprep.mubr.bf16.mxu0 %v7308_v44  ;;  %2876 = vmatprep.mubr.bf16.mxu1 %v6924_v62  ;;  %v6235_v62 = vld [vmem:[%s8421_s1 + $0x46c] ss:$16 sps:$4 sm:$0xff]  }
 0x111   : > { %3029 = vmatprep.subr.bf16.mxu1 %v6229_v41  ;;  %v353_v41 = vld [vmem:[%s6483_s30 + $0x218] sm:$0xff] }
 0x112   : > { %v7411_v2 = vpack.c.bf16 %v353_v41, %v346_v30  ;;  %v389_v30 = vld [vmem:[%s6483_s30 + $0x338] sm:$0xff]  ;;  %v396_v41 = vld [vmem:[%s6483_s30 + $0x370] sm:$0xff] }
 0x113   : > { %3030 = vmatpush1.bf16.msra.mxu1 %v6227_v26  ;;  %v6245_v26 = vld [vmem:[%s8421_s1 + $0x4e8] ss:$16 sps:$4 sm:$0xff]  }
 0x114   : > { %3031 = vmatprep.subr.bf16.mxu1 %v6232_v55 }
 0x116   : > { %2298 = vmatmul.mubr.bf16.gmra.mrb[4].mxu0 %v7327_v58  ;;  %2877 = vmatmul.mubr.bf16.gmra.mrb[36].mxu1 %v6952_v18  ;;  %v6238_v18 = vld [vmem:[%s8421_s1 + $0x48c] ss:$16 sps:$4 sm:$0xff]  }
 0x117   : > { %2307 = vmatprep.mubr.bf16.mxu0 %v7329_v13  ;;  %2886 = vmatprep.mubr.bf16.mxu1 %v6954_v22  ;;  %v7353_v22 = vpack.c.bf16 %v340_v48, %v333_v39  ;;  %v360_v39 = vld [vmem:[%s6483_s30 + $0x250] sm:$0xff]  ;;  %v367_v48 = vld [vmem:[%s6483_s30 + $0x288] sm:$0xff] }
 0x118   : > { %3032 = vmatpush1.bf16.msra.mxu1 %v6230_v24  ;;  %v7415_v24 = vpack.c.bf16 %v368_v46, %v361_v25  ;;  %v7443_v21 = vpack.c.bf16 %v367_v48, %v360_v39  ;;  %v6257_v25 = vld [vmem:[%s8421_s1 + $0x568] ss:$16 sps:$4 sm:$0xff]   ;;  %v6265_v48 = vld [vmem:[%s8421_s1 + $0x5ac] ss:$16 sps:$4 sm:$0xff]  }
 0x119   : > { %3033 = vmatprep.subr.bf16.mxu1 %v6235_v62  ;;  %v6260_v39 = vld [vmem:[%s8421_s1 + $0x588] ss:$16 sps:$4 sm:$0xff]  }
 0x11c   : > { %3034 = vmatpush1.bf16.msra.mxu1 %v6233_v59  ;;  %v375_v59 = vld [vmem:[%s6483_s30 + $0x2c8] sm:$0xff] }
 0x11d   : > { %3035 = vmatprep.subr.bf16.mxu1 %v6238_v18  ;;  %v382_v18 = vld [vmem:[%s6483_s30 + $0x300] sm:$0xff] }
 0x11e   : > { %2308 = vmatmul.mubr.bf16.gmra.mrb[8].mxu0 %v7351_v14  ;;  %2887 = vmatmul.mubr.bf16.gmra.mrb[40].mxu1 %v6988_v40  ;;  %v6244_v40 = vld [vmem:[%s8421_s1 + $0x4cc] ss:$16 sps:$4 sm:$0xff]   ;;  %v7447_v53 = vpack.c.bf16 %v382_v18, %v375_v59  ;;  %v388_v59 = vld [vmem:[%s6483_s30 + $0x330] sm:$0xff] }
 0x11f   : > { %2317 = vmatprep.mubr.bf16.mxu0 %v7353_v22  ;;  %2896 = vmatprep.mubr.bf16.mxu1 %v6990_v42  ;;  %v395_v18 = vld [vmem:[%s6483_s30 + $0x368] sm:$0xff] }
 0x120   : > { %3036 = vmatpush1.bf16.msra.mxu1 %v6236_v43  ;;  %v6251_v43 = vld [vmem:[%s8421_s1 + $0x528] ss:$16 sps:$4 sm:$0xff]  }
 0x121   : > { %v7372_v15 = vpop.f32.mrb[0].mxu1  ;;  %3037 = vmatprep.subr.bf16.mxu1 %v6241_v8 }
 0x122   : > { %v7377_v42 = vpop.f32.mrb[1].mxu1 }
 0x123   : > { %v7381_v0 = vpop.f32.mrb[2].mxu1 }
 0x124   : > { %v7385_v19 = vpop.f32.mrb[3].mxu1  ;;  %3038 = vmatpush1.bf16.msra.mxu1 %v6239_v49  ;;  %v6254_v49 = vld [vmem:[%s8421_s1 + $0x548] ss:$16 sps:$4 sm:$0xff]  }
 0x125   : > { %3039 = vmatprep.subr.bf16.mxu1 %v6244_v40  ;;  %v6259_v40 = vld [vmem:[%s8421_s1 + $0x56c] ss:$16 sps:$4 sm:$0xff]  }
 0x126   : > { %2318 = vmatmul.mubr.bf16.gmra.mrb[12].mxu0 %v7379_v3  ;;  %2897 = vmatmul.mubr.bf16.gmra.mrb[44].mxu1 %v7024_v4  ;;  %v6250_v4 = vld [vmem:[%s8421_s1 + $0x50c] ss:$16 sps:$4 sm:$0xff]  }
 0x127   : > { %2327 = vmatprep.mubr.bf16.mxu0 %v7383_v16  ;;  %2906 = vmatprep.mubr.bf16.mxu1 %v7026_v5 }
 0x128   : > { %3040 = vmatpush1.bf16.msra.mxu1 %v6242_v9  ;;  %v374_v9 = vld [vmem:[%s6483_s30 + $0x2c0] sm:$0xff] }
 0x129   : > { %v7404_v27 = vpop.f32.mrb[4].mxu1  ;;  %3041 = vmatprep.subr.bf16.mxu1 %v6247_v11  ;;  %v381_v11 = vld [vmem:[%s6483_s30 + $0x2f8] sm:$0xff] }
 0x12a   : > { %v7409_v5 = vpop.f32.mrb[5].mxu1 }
 0x12b   : > { %v7413_v55 = vpop.f32.mrb[6].mxu1 }
 0x12c   : > { %v7417_v62 = vpop.f32.mrb[7].mxu1  ;;  %3042 = vmatpush1.bf16.msra.mxu1 %v6245_v26  ;;  %v7475_v26 = vpack.c.bf16 %v381_v11, %v374_v9  ;;  %v7507_v9 = vpack.c.bf16 %v395_v18, %v388_v59  ;;  %v417_v59 = vld [vmem:[%s6483_s30 + $0x418] sm:$0xff]  ;;  %v424_v18 = vld [vmem:[%s6483_s30 + $0x450] sm:$0xff] }
 0x12d   : > { %3043 = vmatprep.subr.bf16.mxu1 %v6250_v4 }
 0x12e   : > { %2328 = vmatmul.mubr.bf16.gmra.mrb[16].mxu0 %v7411_v2  ;;  %2907 = vmatmul.mubr.bf16.gmra.mrb[48].mxu1 %v7060_v28  ;;  %v6256_v28 = vld [vmem:[%s8421_s1 + $0x54c] ss:$16 sps:$4 sm:$0xff]  }
 0x12f   : > { %2337 = vmatprep.mubr.bf16.mxu0 %v7415_v24  ;;  %2916 = vmatprep.mubr.bf16.mxu1 %v7062_v31 }
 0x130   : > { %3044 = vmatpush1.bf16.msra.mxu1 %v6248_v35  ;;  %v7479_v35 = vpack.c.bf16 %v396_v41, %v389_v30 }
 0x131   : > { %v7436_v8 = vpop.f32.mrb[8].mxu1  ;;  %3045 = vmatprep.subr.bf16.mxu1 %v6253_v38 }
 0x132   : > { %v7441_v31 = vpop.f32.mrb[9].mxu1 }
 0x133   : > { %v7445_v7 = vpop.f32.mrb[10].mxu1 }
 0x134   : > { %v7449_v36 = vpop.f32.mrb[11].mxu1  ;;  %3046 = vmatpush1.bf16.msra.mxu1 %v6251_v43  ;;  %v403_v43 = vld [vmem:[%s6483_s30 + $0x3a8] sm:$0xff] }
 0x135   : > { %3047 = vmatprep.subr.bf16.mxu1 %v6256_v28  ;;  %v410_v28 = vld [vmem:[%s6483_s30 + $0x3e0] sm:$0xff] }
 0x136   : > { %2338 = vmatmul.mubr.bf16.gmra.mrb[20].mxu0 %v7443_v21  ;;  %2917 = vmatmul.mubr.bf16.gmra.mrb[52].mxu1 %v7096_v54  ;;  %v6262_v54 = vld [vmem:[%s8421_s1 + $0x58c] ss:$16 sps:$4 sm:$0xff]   ;;  %v7511_v30 = vpack.c.bf16 %v410_v28, %v403_v43  ;;  %v6269_v43 = vld [vmem:[%s8421_s1 + $0x5e8] ss:$16 sps:$4 sm:$0xff]  }
 0x137   : > { %2347 = vmatprep.mubr.bf16.mxu0 %v7447_v53  ;;  %2926 = vmatprep.mubr.bf16.mxu1 %v7104_v61 }
 0x138   : > { %3048 = vmatpush1.bf16.msra.mxu1 %v6254_v49  ;;  %v6263_v49 = vld [vmem:[%s8421_s1 + $0x5a8] ss:$16 sps:$4 sm:$0xff]  }
 0x139   : > { %v7468_v46 = vpop.f32.mrb[12].mxu1  ;;  %3049 = vmatprep.subr.bf16.mxu1 %v6259_v40 }
 0x13a   : > { %v7473_v61 = vpop.f32.mrb[13].mxu1 }
 0x13b   : > { %v7477_v4 = vpop.f32.mrb[14].mxu1 }
 0x13c   : > { %v7481_v38 = vpop.f32.mrb[15].mxu1  ;;  %3050 = vmatpush1.bf16.msra.mxu1 %v6257_v25  ;;  %v6266_v25 = vld [vmem:[%s8421_s1 + $0x5c8] ss:$16 sps:$4 sm:$0xff]  }
 0x13d   : > { %3051 = vmatprep.subr.bf16.mxu1 %v6262_v54  ;;  %v6271_v54 = vld [vmem:[%s8421_s1 + $0x5ec] ss:$16 sps:$4 sm:$0xff]  }
 0x13e   : > { %2348 = vmatmul.mubr.bf16.gmra.mrb[24].mxu0 %v7475_v26  ;;  %2927 = vmatmul.mubr.bf16.gmra.mrb[56].mxu1 %v7132_v45  ;;  %v6268_v45 = vld [vmem:[%s8421_s1 + $0x5cc] ss:$16 sps:$4 sm:$0xff]  }
 0x13f   : > { %2357 = vmatprep.mubr.bf16.mxu0 %v7479_v35  ;;  %2936 = vmatprep.mubr.bf16.mxu1 %v7140_v56 }
 0x140   : > { %3052 = vmatpush1.bf16.msra.mxu1 %v6260_v39  ;;  %v402_v39 = vld [vmem:[%s6483_s30 + $0x3a0] sm:$0xff] }
 0x141   : > { %v7500_v40 = vpop.f32.mrb[16].mxu1  ;;  %3053 = vmatprep.subr.bf16.mxu1 %v6265_v48  ;;  %v409_v48 = vld [vmem:[%s6483_s30 + $0x3d8] sm:$0xff] }
 0x142   : > { %v7505_v56 = vpop.f32.mrb[17].mxu1 }
 0x143   : > { %v7509_v11 = vpop.f32.mrb[18].mxu1 }
 0x144   : > { %v7513_v41 = vpop.f32.mrb[19].mxu1  ;;  %3054 = vmatpush1.bf16.msra.mxu1 %v6263_v49  ;;  %v7539_v49 = vpack.c.bf16 %v409_v48, %v402_v39  ;;  %v423_v39 = vld [vmem:[%s6483_s30 + $0x448] sm:$0xff] }
 0x145   : > { %8428 = vst [vmem:[#allocation2_spill] sm:$0xff] %v7513_v41  ;;  %3055 = vmatprep.subr.bf16.mxu1 %v6268_v45  ;;  %v431_v48 = vld [vmem:[%s6483_s30 + $0x488] sm:$0xff] }
 0x146   : > { %2358 = vmatmul.mubr.bf16.gmra.mrb[28].mxu0 %v7507_v9  ;;  %2937 = vmatmul.mubr.bf16.gmra.mrb[60].mxu1 %v7168_v12  ;;  %v6274_v12 = vld [vmem:[%s8421_s1 + $0x60c] ss:$16 sps:$4 sm:$0xff]  }
 0x147   : > { %2367 = vmatprep.mubr.bf16.mxu0 %v7511_v30  ;;  %2946 = vmatprep.mubr.bf16.mxu1 %v7176_v50 }
 0x148   : > { %3056 = vmatpush1.bf16.msra.mxu1 %v6266_v25  ;;  %v7543_v25 = vpack.c.bf16 %v424_v18, %v417_v59  ;;  %v438_v59 = vld [vmem:[%s6483_s30 + $0x4c0] sm:$0xff] }
 0x149   : > { %v7532_v28 = vpop.f32.mrb[20].mxu1  ;;  %3057 = vmatprep.subr.bf16.mxu1 %v6271_v54  ;;  %v416_v54 = vld [vmem:[%s6483_s30 + $0x410] sm:$0xff] }
 0x14a   : > { %v7537_v50 = vpop.f32.mrb[21].mxu1 }
 0x14b   : > { %v7541_v45 = vpop.f32.mrb[22].mxu1 }
 0x14c   : > { %8429 = vst [vmem:[#allocation3_spill] sm:$0xff] %v7541_v45  ;;  %v7545_v41 = vpop.f32.mrb[23].mxu1  ;;  %3058 = vmatpush1.bf16.msra.mxu1 %v6269_v43 }
 0x14d   : > { %8430 = vst [vmem:[#allocation4_spill] sm:$0xff] %v7545_v41  ;;  %3220 = vmatprep.subr.bf16.mxu1 %v6274_v12  ;;  %v7559_v12 = vpack.c.bf16 %v423_v39, %v416_v54  ;;  %v437_v54 = vld [vmem:[%s6483_s30 + $0x4b8] sm:$0xff] }
 0x14e   : > { %2368 = vmatmul.mubr.bf16.gmra.mrb[32].mxu0 %v7539_v49  ;;  %2947 = vmatmul.mubr.bf16.gmra.mrb[64].mxu1 %v7204_v34  ;;  %v7563_v34 = vpack.c.bf16 %v438_v59, %v431_v48  ;;  %v445_v39 = vld [vmem:[%s6483_s30 + $0x4f8] sm:$0xff] }
 0x14f   : > { %2377 = vmatprep.mubr.bf16.mxu0 %v7543_v25  ;;  %2956 = vmatprep.mubr.bf16.mxu1 %v7206_v6  ;;  %v430_v6 = vld [vmem:[%s6483_s30 + $0x480] sm:$0xff] }
 0x151   : > { %v7555_v18 = vpop.f32.mrb[24].mxu1 }
 0x152   : > { %8431 = vst [vmem:[#allocation5_spill] sm:$0xff] %v7555_v18  ;;  %v7557_v43 = vpop.f32.mrb[25].mxu1 }
 0x153   : > { %8432 = vst [vmem:[#allocation6_spill] sm:$0xff] %v7557_v43  ;;  %v7561_v41 = vpop.f32.mrb[26].mxu1 }
 0x154   : > { %8433 = vst [vmem:[#allocation7_spill] sm:$0xff] %v7561_v41  ;;  %v7565_v45 = vpop.f32.mrb[27].mxu1  ;;  %v452_v41 = vld [vmem:[%s6483_s30 + $0x530] sm:$0xff] }
 0x155   : > { %8434 = vst [vmem:[#allocation8_spill] sm:$0xff] %v7565_v45  ;;  %v7579_v45 = vpack.c.bf16 %v437_v54, %v430_v6  ;;  %v451_v6 = vld [vmem:[%s6483_s30 + $0x528] sm:$0xff] }
 0x156   : > { %2378 = vmatmul.mubr.bf16.gmra.mrb[36].mxu0 %v7559_v12  ;;  %2957 = vmatmul.mubr.bf16.gmra.mrb[68].mxu1 %v7216_v33  ;;  %v7583_v33 = vpack.c.bf16 %v452_v41, %v445_v39  ;;  %v459_v54 = vld [vmem:[%s6483_s30 + $0x568] sm:$0xff] }
 0x157   : > { %2387 = vmatprep.mubr.bf16.mxu0 %v7563_v34  ;;  %2966 = vmatprep.mubr.bf16.mxu1 %v7218_v17  ;;  %v444_v17 = vld [vmem:[%s6483_s30 + $0x4f0] sm:$0xff] }
 0x158   : > { %v7595_v41 = vpack.c.bf16 %v451_v6, %v444_v17  ;;  %v465_v17 = vld [vmem:[%s6483_s30 + $0x598] sm:$0xff]  ;;  %v480_v6 = vld [vmem:[%s6483_s30 + $0x610] sm:$0xff] }
 0x159   : > { %v7575_v48 = vpop.f32.mrb[28].mxu1 }
 0x15a   : > { %v7577_v59 = vpop.f32.mrb[29].mxu1 }
 0x15b   : > { %8435 = vst [vmem:[#allocation9_spill] sm:$0xff] %v7577_v59  ;;  %v7581_v43 = vpop.f32.mrb[30].mxu1  ;;  %v487_v59 = vld [vmem:[%s6483_s30 + $0x648] sm:$0xff] }
 0x15c   : > { %8436 = vst [vmem:[#allocation10_spill] sm:$0xff] %v7581_v43  ;;  %v7585_v18 = vpop.f32.mrb[31].mxu1  ;;  %v466_v43 = vld [vmem:[%s6483_s30 + $0x5a0] sm:$0xff] }
 0x15d   : > { %8437 = vst [vmem:[#allocation11_spill] sm:$0xff] %v7585_v18  ;;  %v7597_v39 = vpack.c.bf16 %v466_v43, %v459_v54  ;;  %v473_v43 = vld [vmem:[%s6483_s30 + $0x5d8] sm:$0xff]  ;;  %v479_v18 = vld [vmem:[%s6483_s30 + $0x608] sm:$0xff] }
 0x15e   : > { %2388 = vmatmul.mubr.bf16.gmra.mrb[40].mxu0 %v7579_v45  ;;  %2967 = vmatmul.mubr.bf16.gmra.mrb[72].mxu1 %v7228_v57  ;;  %v6277_v57 = vld [vmem:[%s8423_s3 + $0x4] ss:$8 sps:$4 sm:$0xff]  }
 0x15f   : > { %2397 = vmatprep.mubr.bf16.mxu0 %v7583_v33  ;;  %2976 = vmatprep.mubr.bf16.mxu1 %v7230_v47  ;;  %v458_v47 = vld [vmem:[%s6483_s30 + $0x560] sm:$0xff] }
 0x160   : > { %4001 = vmatprep.subr.bf16.mxu0 %v6277_v57  ;;  %v7610_v54 = vpack.c.bf16 %v465_v17, %v458_v47  ;;  %v494_v57 = vld [vmem:[%s6483_s30 + $0x680] sm:$0xff] }
 0x161   : > { %v7624_v17 = vpack.c.bf16 %v494_v57, %v487_v59  ;;  %v6395_v57 = vmov 0  }
 0x166   : > { %2398 = vmatmul.mubr.bf16.gmra.mrb[44].mxu0 %v7595_v41  ;;  %2977 = vmatmul.mubr.bf16.gmra.mrb[76].mxu1 %v7240_v32  ;;  %v7612_v32 = vpack.c.bf16 %v480_v6, %v473_v43  ;;  %v501_v43 = vld [vmem:[%s6483_s30 + $0x6b8] sm:$0xff]  ;;  %v508_v6 = vld [vmem:[%s6483_s30 + $0x6f0] sm:$0xff] }
 0x167   : > { %2407 = vmatprep.mubr.bf16.mxu0 %v7597_v39  ;;  %2986 = vmatprep.mubr.bf16.mxu1 %v7242_v37  ;;  %v472_v37 = vld [vmem:[%s6483_s30 + $0x5d0] sm:$0xff] }
 0x168   : > { %v7622_v47 = vpack.c.bf16 %v479_v18, %v472_v37  ;;  %v7636_v37 = vpack.c.bf16 %v508_v6, %v501_v43  ;;  %v6275_v43 = vld [vmem:[%s8423_s3] ss:$8 sps:$4 sm:$0xff]   ;;  %v313_v6 = vld [vmem:[%s6483_s30 + $0xd8] sm:$0xff] }
 0x16e   : > { %2408 = vmatmul.mubr.bf16.gmra.mrb[48].mxu0 %v7610_v54  ;;  %2987 = vmatmul.mubr.bf16.gmra.mrb[80].mxu1 %v7252_v63  ;;  %v486_v63 = vld [vmem:[%s6483_s30 + $0x640] sm:$0xff] }
 0x16f   : > { %2417 = vmatprep.mubr.bf16.mxu0 %v7612_v32  ;;  %2996 = vmatprep.mubr.bf16.mxu1 %v7254_v1  ;;  %v493_v1 = vld [vmem:[%s6483_s30 + $0x678] sm:$0xff] }
 0x170   : > { %v7634_v18 = vpack.c.bf16 %v493_v1, %v486_v63  ;;  %v299_v63 = vld [vmem:[%s6483_s30 + $0x68] sm:$0xff] }
 0x176   : > { %2418 = vmatmul.mubr.bf16.gmra.mrb[52].mxu0 %v7622_v47  ;;  %2997 = vmatmul.mubr.bf16.gmra.mrb[84].mxu1 %v7264_v51  ;;  %v500_v51 = vld [vmem:[%s6483_s30 + $0x6b0] sm:$0xff] }
 0x177   : > { %2427 = vmatprep.mubr.bf16.mxu0 %v7624_v17  ;;  %3006 = vmatprep.mubr.bf16.mxu1 %v7266_v52  ;;  %v507_v52 = vld [vmem:[%s6483_s30 + $0x6e8] sm:$0xff] }
 0x178   : > { %v7644_v59 = vpack.c.bf16 %v507_v52, %v500_v51  ;;  %v6278_v51 = vld [vmem:[%s8423_s3 + $0x10] ss:$8 sps:$4 sm:$0xff]   ;;  %v6283_v52 = vld [vmem:[%s8423_s3 + $0x24] ss:$8 sps:$4 sm:$0xff]  }
 0x17e   : > { %2428 = vmatmul.mubr.bf16.gmra.mrb[56].mxu0 %v7634_v18  ;;  %3007 = vmatmul.mubr.bf16.gmra.mrb[88].mxu1 %v7276_v20  ;;  %v292_v20 = vld [vmem:[%s6483_s30 + $0x30] sm:$0xff] }
 0x17f   : > { %2437 = vmatprep.mubr.bf16.mxu0 %v7636_v37  ;;  %3016 = vmatprep.mubr.bf16.mxu1 %v7278_v60  ;;  %v7652_v1 = vpack.c.bf16 %v299_v63, %v292_v20  ;;  %v6272_v60 = vld [vmem:[%s8421_s1 + $0x608] ss:$16 sps:$4 sm:$0xff]   ;;  %v320_v63 = vld [vmem:[%s6483_s30 + $0x110] sm:$0xff] }
 0x180   : > { %v6281_v20 = vld [vmem:[%s8423_s3 + $0x20] ss:$8 sps:$4 sm:$0xff]  }
 0x186   : > { %2438 = vmatmul.mubr.bf16.gmra.mrb[60].mxu0 %v7644_v59  ;;  %3017 = vmatmul.mubr.bf16.gmra.mrb[92].mxu1 %v7288_v29  ;;  %v6280_v29 = vld [vmem:[%s8423_s3 + $0x14] ss:$8 sps:$4 sm:$0xff]  }
 0x187   : > { %2480 = vmatprep.mubr.bf16.mxu0 %v6395_v57  ;;  %3059 = vmatprep.mubr.bf16.mxu1 %v7290_v23  ;;  %v306_v23 = vld [vmem:[%s6483_s30 + $0xa0] sm:$0xff] }
 0x18e   : > { %5072 = vmatmul.mubr.msk.bf16.vlgmr.msra.gmra.mrb[0].mxu0 %vm1820_vm0, %v7652_v1  ;;  %3060 = vmatmul.mubr.bf16.vlgmr.msra.gmra.mrb[32].mxu1 %v7300_v10  ;;  %v7676_v10 = vpack.c.bf16 %v313_v6, %v306_v23  ;;  %v334_v6 = vld [vmem:[%s6483_s30 + $0x180] sm:$0xff] }
 0x18f   : > { %3221 = vmatpush1.bf16.msra.mxu1 %v6272_v60  ;;  %2490 = vmatprep.mubr.bf16.mxu0 %v6395_v57  ;;  %v327_v60 = vld [vmem:[%s6483_s30 + $0x148] sm:$0xff] }
 0x190   : > { %3069 = vmatprep.mubr.bf16.mxu1 %v7308_v44  ;;  %4002 = vmatpush1.bf16.msra.mxu0 %v6275_v43  ;;  %v6286_v44 = vld [vmem:[%s8423_s3 + $0x34] ss:$8 sps:$4 sm:$0xff]   ;;  %v6284_v43 = vld [vmem:[%s8423_s3 + $0x30] ss:$8 sps:$4 sm:$0xff]   ;;  %v7697_v23 = vpack.c.bf16 %v327_v60, %v320_v63  ;;  %v355_v60 = vld [vmem:[%s6483_s30 + $0x228] sm:$0xff] }
 0x191   : > { %4003 = vmatprep.subr.bf16.mxu0 %v6280_v29  ;;  %v6289_v29 = vld [vmem:[%s8423_s3 + $0x44] ss:$8 sps:$4 sm:$0xff]   ;;  %v348_v63 = vld [vmem:[%s6483_s30 + $0x1f0] sm:$0xff] }
 0x194   : > { %4004 = vmatpush1.bf16.msra.mxu0 %v6278_v51  ;;  %v341_v51 = vld [vmem:[%s6483_s30 + $0x1b8] sm:$0xff] }
 0x195   : > { %4005 = vmatprep.subr.bf16.mxu0 %v6283_v52  ;;  %v6290_v52 = vld [vmem:[%s8423_s3 + $0x50] ss:$8 sps:$4 sm:$0xff]  }
 0x196   : > { %5073 = vmatmul.mubr.msk.bf16.gmra.mrb[4].mxu0 %vm1820_vm0, %v7676_v10  ;;  %3070 = vmatmul.mubr.bf16.gmra.mrb[36].mxu1 %v7327_v58  ;;  %v6287_v58 = vld [vmem:[%s8423_s3 + $0x40] ss:$8 sps:$4 sm:$0xff]  }
 0x197   : > { %2500 = vmatprep.mubr.bf16.mxu0 %v6395_v57  ;;  %3079 = vmatprep.mubr.bf16.mxu1 %v7329_v13  ;;  %v6292_v13 = vld [vmem:[%s8423_s3 + $0x54] ss:$8 sps:$4 sm:$0xff]  }
 0x198   : > { %4006 = vmatpush1.bf16.msra.mxu0 %v6281_v20  ;;  %v6295_v20 = vld [vmem:[%s8423_s3 + $0x64] ss:$8 sps:$4 sm:$0xff]  }
 0x199   : > { %4007 = vmatprep.subr.bf16.mxu0 %v6286_v44  ;;  %v7718_v44 = vpack.c.bf16 %v341_v51, %v334_v6  ;;  %v369_v6 = vld [vmem:[%s6483_s30 + $0x298] sm:$0xff] }
 0x19a   : > { %v6302_v51 = vld [vmem:[%s8423_s3 + $0x90] ss:$8 sps:$4 sm:$0xff]  }
 0x19c   : > { %4008 = vmatpush1.bf16.msra.mxu0 %v6284_v43  ;;  %v6296_v43 = vld [vmem:[%s8423_s3 + $0x70] ss:$8 sps:$4 sm:$0xff]  }
 0x19d   : > { %4009 = vmatprep.subr.bf16.mxu0 %v6289_v29  ;;  %v6301_v29 = vld [vmem:[%s8423_s3 + $0x84] ss:$8 sps:$4 sm:$0xff]  }
 0x19e   : > { %5074 = vmatmul.mubr.msk.bf16.gmra.mrb[8].mxu0 %vm1820_vm0, %v7697_v23  ;;  %3080 = vmatmul.mubr.bf16.gmra.mrb[40].mxu1 %v7351_v14  ;;  %v6293_v14 = vld [vmem:[%s8423_s3 + $0x60] ss:$8 sps:$4 sm:$0xff]  }
 0x19f   : > { %2510 = vmatprep.mubr.bf16.mxu0 %v6395_v57  ;;  %3089 = vmatprep.mubr.bf16.mxu1 %v7353_v22  ;;  %v6298_v22 = vld [vmem:[%s8423_s3 + $0x74] ss:$8 sps:$4 sm:$0xff]  }
 0x1a0   : > { %4010 = vmatpush1.bf16.msra.mxu0 %v6287_v58  ;;  %v7739_v58 = vpack.c.bf16 %v355_v60, %v348_v63  ;;  %v390_v63 = vld [vmem:[%s6483_s30 + $0x340] sm:$0xff]  ;;  %v397_v60 = vld [vmem:[%s6483_s30 + $0x378] sm:$0xff] }
 0x1a1   : > { %4011 = vmatprep.subr.bf16.mxu0 %v6292_v13  ;;  %v362_v13 = vld [vmem:[%s6483_s30 + $0x260] sm:$0xff] }
 0x1a4   : > { %4012 = vmatpush1.bf16.msra.mxu0 %v6290_v52  ;;  %v7757_v52 = vpack.c.bf16 %v369_v6, %v362_v13  ;;  %v418_v13 = vld [vmem:[%s6483_s30 + $0x420] sm:$0xff]  ;;  %v425_v6 = vld [vmem:[%s6483_s30 + $0x458] sm:$0xff] }
 0x1a5   : > { %4013 = vmatprep.subr.bf16.mxu0 %v6295_v20  ;;  %v376_v20 = vld [vmem:[%s6483_s30 + $0x2d0] sm:$0xff] }
 0x1a6   : > { %5075 = vmatmul.mubr.msk.bf16.gmra.mrb[12].mxu0 %vm1820_vm0, %v7718_v44  ;;  %3090 = vmatmul.mubr.bf16.gmra.mrb[44].mxu1 %v7379_v3  ;;  %v6299_v3 = vld [vmem:[%s8423_s3 + $0x80] ss:$8 sps:$4 sm:$0xff]  }
 0x1a7   : > { %2520 = vmatprep.mubr.bf16.mxu0 %v6395_v57  ;;  %3099 = vmatprep.mubr.bf16.mxu1 %v7383_v16  ;;  %v6304_v16 = vld [vmem:[%s8423_s3 + $0x94] ss:$8 sps:$4 sm:$0xff]  }
 0x1a8   : > { %4014 = vmatpush1.bf16.msra.mxu0 %v6293_v14  ;;  %v383_v14 = vld [vmem:[%s6483_s30 + $0x308] sm:$0xff] }
 0x1a9   : > { %4015 = vmatprep.subr.bf16.mxu0 %v6298_v22  ;;  %v7772_v22 = vpack.c.bf16 %v383_v14, %v376_v20  ;;  %v453_v14 = vld [vmem:[%s6483_s30 + $0x538] sm:$0xff] }
 0x1ac   : > { %4016 = vmatpush1.bf16.msra.mxu0 %v6296_v43  ;;  %v7787_v43 = vpack.c.bf16 %v397_v60, %v390_v63  ;;  %v6325_v60 = vld [vmem:[%s8423_s3 + $0x104] ss:$8 sps:$4 sm:$0xff]  }
 0x1ad   : > { %4017 = vmatprep.subr.bf16.mxu0 %v6301_v29  ;;  %v404_v29 = vld [vmem:[%s6483_s30 + $0x3b0] sm:$0xff] }
 0x1ae   : > { %5076 = vmatmul.mubr.msk.bf16.gmra.mrb[16].mxu0 %vm1820_vm0, %v7739_v58  ;;  %3100 = vmatmul.mubr.bf16.gmra.mrb[48].mxu1 %v7411_v2  ;;  %v6305_v2 = vld [vmem:[%s8423_s3 + $0xa0] ss:$8 sps:$4 sm:$0xff]  }
 0x1af   : > { %2530 = vmatprep.mubr.bf16.mxu0 %v6395_v57  ;;  %3109 = vmatprep.mubr.bf16.mxu1 %v7415_v24  ;;  %v6307_v24 = vld [vmem:[%s8423_s3 + $0xa4] ss:$8 sps:$4 sm:$0xff]  }
 0x1b0   : > { %4018 = vmatpush1.bf16.msra.mxu0 %v6299_v3  ;;  %v411_v3 = vld [vmem:[%s6483_s30 + $0x3e8] sm:$0xff] }
 0x1b1   : > { %4019 = vmatprep.subr.bf16.mxu0 %v6304_v16  ;;  %v7802_v16 = vpack.c.bf16 %v411_v3, %v404_v29  ;;  %v502_v29 = vld [vmem:[%s6483_s30 + $0x6c0] sm:$0xff]  ;;  %v509_v3 = vld [vmem:[%s6483_s30 + $0x6f8] sm:$0xff] }
 0x1b4   : > { %4020 = vmatpush1.bf16.msra.mxu0 %v6302_v51  ;;  %v7817_v51 = vpack.c.bf16 %v425_v6, %v418_v13 }
 0x1b5   : > { %4021 = vmatprep.subr.bf16.mxu0 %v6307_v24  ;;  %v439_v24 = vld [vmem:[%s6483_s30 + $0x4c8] sm:$0xff] }
 0x1b6   : > { %5077 = vmatmul.mubr.msk.bf16.gmra.mrb[20].mxu0 %vm1820_vm0, %v7757_v52  ;;  %3110 = vmatmul.mubr.bf16.gmra.mrb[52].mxu1 %v7443_v21  ;;  %v6308_v21 = vld [vmem:[%s8423_s3 + $0xb0] ss:$8 sps:$4 sm:$0xff]  }
 0x1b7   : > { %2540 = vmatprep.mubr.bf16.mxu0 %v6395_v57  ;;  %3119 = vmatprep.mubr.bf16.mxu1 %v7447_v53  ;;  %v6310_v53 = vld [vmem:[%s8423_s3 + $0xb4] ss:$8 sps:$4 sm:$0xff]  }
 0x1b8   : > { %4022 = vmatpush1.bf16.msra.mxu0 %v6305_v2  ;;  %v432_v2 = vld [vmem:[%s6483_s30 + $0x490] sm:$0xff] }
 0x1b9   : > { %4023 = vmatprep.subr.bf16.mxu0 %v6310_v53  ;;  %v7832_v20 = vpack.c.bf16 %v439_v24, %v432_v2  ;;  %v6320_v53 = vld [vmem:[%s8423_s3 + $0xf0] ss:$8 sps:$4 sm:$0xff]  }
 0x1bc   : > { %4024 = vmatpush1.bf16.msra.mxu0 %v6308_v21  ;;  %v6322_v21 = vld [vmem:[%s8423_s3 + $0xf4] ss:$8 sps:$4 sm:$0xff]  }
 0x1be   : > { %5078 = vmatmul.mubr.msk.bf16.gmra.mrb[24].mxu0 %vm1820_vm0, %v7772_v22  ;;  %3120 = vmatmul.mubr.bf16.gmra.mrb[56].mxu1 %v7475_v26  ;;  %v6311_v26 = vld [vmem:[%s8423_s3 + $0xc0] ss:$8 sps:$4 sm:$0xff]  }
 0x1bf   : > { %2550 = vmatprep.mubr.bf16.mxu0 %v6395_v57  ;;  %3129 = vmatprep.mubr.bf16.mxu1 %v7479_v35  ;;  %v6313_v35 = vld [vmem:[%s8423_s3 + $0xc4] ss:$8 sps:$4 sm:$0xff]  }
 0x1c0   : > { %4025 = vmatprep.subr.bf16.mxu0 %v6313_v35 }
 0x1c1   : > { %4026 = vmatpush1.bf16.msra.mxu0 %v6311_v26 }
 0x1c6   : > { %5079 = vmatmul.mubr.msk.bf16.gmra.mrb[28].mxu0 %vm1820_vm0, %v7787_v43  ;;  %3130 = vmatmul.mubr.bf16.gmra.mrb[60].mxu1 %v7507_v9  ;;  %v6314_v9 = vld [vmem:[%s8423_s3 + $0xd0] ss:$8 sps:$4 sm:$0xff]  }
 0x1c7   : > { %2560 = vmatprep.mubr.bf16.mxu0 %v6395_v57  ;;  %3139 = vmatprep.mubr.bf16.mxu1 %v7511_v30  ;;  %v6316_v30 = vld [vmem:[%s8423_s3 + $0xd4] ss:$8 sps:$4 sm:$0xff]  }
 0x1c8   : > { %4027 = vmatprep.subr.bf16.mxu0 %v6316_v30 }
 0x1c9   : > { %4028 = vmatpush1.bf16.msra.mxu0 %v6314_v9 }
 0x1ce   : > { %5080 = vmatmul.mubr.msk.bf16.gmra.mrb[32].mxu0 %vm1820_vm0, %v7802_v16  ;;  %3140 = vmatmul.mubr.bf16.gmra.mrb[64].mxu1 %v7539_v49  ;;  %v6317_v49 = vld [vmem:[%s8423_s3 + $0xe0] ss:$8 sps:$4 sm:$0xff]  }
 0x1cf   : > { %2570 = vmatprep.mubr.bf16.mxu0 %v6395_v57  ;;  %3149 = vmatprep.mubr.bf16.mxu1 %v7543_v25  ;;  %v6319_v25 = vld [vmem:[%s8423_s3 + $0xe4] ss:$8 sps:$4 sm:$0xff]  }
 0x1d0   : > { %4029 = vmatprep.subr.bf16.mxu0 %v6319_v25 }
 0x1d1   : > { %4030 = vmatpush1.bf16.msra.mxu0 %v6317_v49 }
 0x1d2   : > { %4031 = vmatprep.subr.bf16.mxu0 %v6322_v21  ;;  %v6328_v21 = vld [vmem:[%s8423_s3 + $0x114] ss:$8 sps:$4 sm:$0xff]  }
 0x1d5   : > { %4032 = vmatpush1.bf16.msra.mxu0 %v6320_v53 }
 0x1d6   : > { %5081 = vmatmul.mubr.msk.bf16.gmra.mrb[36].mxu0 %vm1820_vm0, %v7817_v51  ;;  %3150 = vmatmul.mubr.bf16.gmra.mrb[68].mxu1 %v7559_v12  ;;  %v446_v12 = vld [vmem:[%s6483_s30 + $0x500] sm:$0xff] }
 0x1d7   : > { %2580 = vmatprep.mubr.bf16.mxu0 %v6395_v57  ;;  %3159 = vmatprep.mubr.bf16.mxu1 %v7563_v34  ;;  %v7841_v34 = vpack.c.bf16 %v453_v14, %v446_v12 }
 0x1d8   : > { %4194 = vmatprep.subr.bf16.mxu0 %v6325_v60 }
 0x1de   : > { %5082 = vmatmul.mubr.msk.bf16.gmra.mrb[40].mxu0 %vm1820_vm0, %v7832_v20  ;;  %3160 = vmatmul.mubr.bf16.gmra.mrb[72].mxu1 %v7579_v45  ;;  %v460_v45 = vld [vmem:[%s6483_s30 + $0x570] sm:$0xff] }
 0x1df   : > { %2590 = vmatprep.mubr.bf16.mxu0 %v6395_v57  ;;  %3169 = vmatprep.mubr.bf16.mxu1 %v7583_v33  ;;  %v467_v33 = vld [vmem:[%s6483_s30 + $0x5a8] sm:$0xff] }
 0x1e0   : > { %v7856_v63 = vpack.c.bf16 %v467_v33, %v460_v45 }
 0x1e6   : > { %5083 = vmatmul.mubr.msk.bf16.gmra.mrb[44].mxu0 %vm1820_vm0, %v7841_v34  ;;  %3170 = vmatmul.mubr.bf16.gmra.mrb[76].mxu1 %v7595_v41  ;;  %v474_v41 = vld [vmem:[%s6483_s30 + $0x5e0] sm:$0xff] }
 0x1e7   : > { %2600 = vmatprep.mubr.bf16.mxu0 %v6395_v57  ;;  %3179 = vmatprep.mubr.bf16.mxu1 %v7597_v39  ;;  %v481_v39 = vld [vmem:[%s6483_s30 + $0x618] sm:$0xff] }
 0x1e8   : > { %v7868_v26 = vpack.c.bf16 %v481_v39, %v474_v41  ;;  %v6326_v39 = vld [vmem:[%s8423_s3 + $0x110] ss:$8 sps:$4 sm:$0xff]  }
 0x1ee   : > { %5084 = vmatmul.mubr.msk.bf16.gmra.mrb[48].mxu0 %vm1820_vm0, %v7856_v63  ;;  %3180 = vmatmul.mubr.bf16.gmra.mrb[80].mxu1 %v7610_v54  ;;  %v488_v54 = vld [vmem:[%s6483_s30 + $0x650] sm:$0xff] }
 0x1ef   : > { %2610 = vmatprep.mubr.bf16.mxu0 %v6395_v57  ;;  %3189 = vmatprep.mubr.bf16.mxu1 %v7612_v32  ;;  %v495_v32 = vld [vmem:[%s6483_s30 + $0x688] sm:$0xff] }
 0x1f0   : > { %v7877_v35 = vpack.c.bf16 %v495_v32, %v488_v54  ;;  %v6331_v32 = vld [vmem:[%s8423_s3 + $0x124] ss:$8 sps:$4 sm:$0xff]  }
 0x1f6   : > { %5085 = vmatmul.mubr.msk.bf16.gmra.mrb[52].mxu0 %vm1820_vm0, %v7868_v26  ;;  %3190 = vmatmul.mubr.bf16.gmra.mrb[84].mxu1 %v7622_v47  ;;  %v7886_v47 = vpack.c.bf16 %v509_v3, %v502_v29 }
 0x1f7   : > { %2620 = vmatprep.mubr.bf16.mxu0 %v6395_v57  ;;  %3199 = vmatprep.mubr.bf16.mxu1 %v7624_v17  ;;  %v820_v17 = vlaneseq }
 0x1fe   : > { %5086 = vmatmul.mubr.msk.bf16.gmra.mrb[56].mxu0 %vm1820_vm0, %v7877_v35  ;;  %3200 = vmatmul.mubr.bf16.gmra.mrb[88].mxu1 %v7634_v18  ;;  %v7922_v18 = vshrl.u32 %v820_v17, 7 }
 0x1ff   : > { %2630 = vmatprep.mubr.bf16.mxu0 %v6395_v57  ;;  %3209 = vmatprep.mubr.bf16.mxu1 %v7636_v37 }
 0x200   : > { %v822_v37 = vsub.s32 0, %v7922_v18 }
 0x206   : > { %5087 = vmatmul.mubr.msk.bf16.gmra.mrb[60].mxu0 %vm1820_vm0, %v7886_v47  ;;  %3210 = vmatmul.mubr.bf16.gmra.mrb[92].mxu1 %v7644_v59  ;;  %v7928_v59 = vld [vmem:[%s8422_s2] sm:$0xf] }
 0x207   : > { %3252 = vmatprep.mubr.bf16.mxu1 %v6395_v57 }
 0x20e   : > { %5088 = vmatmul.mubr.msk.bf16.vlgmr.msra.gmra.mrb[32].mxu1 %vm1820_vm0, %v7652_v1  ;;  %v826_v1 = vsub.s32 1, %v7922_v18 }
 0x20f   : > { %3262 = vmatprep.mubr.bf16.mxu1 %v6395_v57 }
 0x216   : > { %5089 = vmatmul.mubr.msk.bf16.gmra.mrb[36].mxu1 %vm1820_vm0, %v7676_v10  ;;  %v7937_v10 = vrot.slane %v7928_v59, %v822_v37 }
 0x217   : > { %3272 = vmatprep.mubr.bf16.mxu1 %v6395_v57 }
 0x21e   : > { %5090 = vmatmul.mubr.msk.bf16.gmra.mrb[40].mxu1 %vm1820_vm0, %v7697_v23  ;;  %v7942_v23 = vrot.slane %v7928_v59, %v826_v1 }
 0x21f   : > { %3282 = vmatprep.mubr.bf16.mxu1 %v6395_v57 }
 0x226   : > { %5091 = vmatmul.mubr.msk.bf16.gmra.mrb[44].mxu1 %vm1820_vm0, %v7718_v44 }
 0x227   : > { %3292 = vmatprep.mubr.bf16.mxu1 %v6395_v57 }
 0x22e   : > { %5092 = vmatmul.mubr.msk.bf16.gmra.mrb[48].mxu1 %vm1820_vm0, %v7739_v58 }
 0x22f   : > { %3302 = vmatprep.mubr.bf16.mxu1 %v6395_v57 }
 0x236   : > { %5093 = vmatmul.mubr.msk.bf16.gmra.mrb[52].mxu1 %vm1820_vm0, %v7757_v52 }
 0x237   : > { %3312 = vmatprep.mubr.bf16.mxu1 %v6395_v57 }
 0x23e   : > { %5094 = vmatmul.mubr.msk.bf16.gmra.mrb[56].mxu1 %vm1820_vm0, %v7772_v22 }
 0x23f   : > { %3322 = vmatprep.mubr.bf16.mxu1 %v6395_v57 }
 0x246   : > { %5095 = vmatmul.mubr.msk.bf16.gmra.mrb[60].mxu1 %vm1820_vm0, %v7787_v43 }
 0x247   : > { %3332 = vmatprep.mubr.bf16.mxu1 %v6395_v57 }
 0x24e   : > { %5096 = vmatmul.mubr.msk.bf16.gmra.mrb[64].mxu1 %vm1820_vm0, %v7802_v16 }
 0x24f   : > { %3342 = vmatprep.mubr.bf16.mxu1 %v6395_v57 }
 0x256   : > { %5097 = vmatmul.mubr.msk.bf16.gmra.mrb[68].mxu1 %vm1820_vm0, %v7817_v51 }
 0x257   : > { %3352 = vmatprep.mubr.bf16.mxu1 %v6395_v57 }
 0x25e   : > { %5098 = vmatmul.mubr.msk.bf16.gmra.mrb[72].mxu1 %vm1820_vm0, %v7832_v20  ;;  %v6323_v20 = vld [vmem:[%s8423_s3 + $0x100] ss:$8 sps:$4 sm:$0xff]  }
 0x25f   : > { %3362 = vmatprep.mubr.bf16.mxu1 %v6395_v57 }
 0x261   : > { %v2482_v44 = vpop.f32.mrb[0].mxu0 }
 0x262   : > { %v5331_v58 = vadd.f32 %v2482_v44, %v7937_v10  ;;  %v2484_v52 = vpop.f32.mrb[1].mxu0 }
 0x263   : > { %v5332_v22 = vadd.f32 %v2484_v52, %v7942_v23  ;;  %v2486_v43 = vpop.f32.mrb[2].mxu0  ;;  %v6329_v52 = vld [vmem:[%s8423_s3 + $0x120] ss:$8 sps:$4 sm:$0xff]  }
 0x264   : > { %v5333_v16 = vadd.f32 %v2486_v43, %v7937_v10  ;;  %v2488_v9 = vpop.f32.mrb[3].mxu0  ;;  %v3413_v13 = vmax.f32 %v5331_v58, 0.0  ;;  %v6334_v43 = vld [vmem:[%s8423_s3 + $0x134] ss:$8 sps:$4 sm:$0xff]  }
 0x265   : > { %v5334_v30 = vadd.f32 %v2488_v9, %v7942_v23  ;;  %v3414_v51 = vmax.f32 %v5332_v22, 0.0 }
 0x266   : > { %v3417_v6 = vmax.f32 %v5333_v16, 0.0  ;;  %5099 = vmatmul.mubr.msk.bf16.gmra.mrb[76].mxu1 %vm1820_vm0, %v7841_v34 }
 0x267   : > { %v3418_v49 = vmax.f32 %v5334_v30, 0.0  ;;  %3372 = vmatprep.mubr.bf16.mxu1 %v6395_v57 }
 0x268   : > { %v3541_v25 = vpack.c.bf16 %v3417_v6, %v3413_v13 }
 0x269   : > { %v3542_v2 = vpack.c.bf16 %v3418_v49, %v3414_v51  ;;  %v2492_v24 = vpop.f32.mrb[4].mxu0  ;;  %v6332_v51 = vld [vmem:[%s8423_s3 + $0x130] ss:$8 sps:$4 sm:$0xff]  }
 0x26a   : > { %v5335_v12 = vadd.f32 %v2492_v24, %v7937_v10  ;;  %v2494_v14 = vpop.f32.mrb[5].mxu0 }
 0x26b   : > { %v5336_v34 = vadd.f32 %v2494_v14, %v7942_v23  ;;  %v2496_v45 = vpop.f32.mrb[6].mxu0  ;;  %4033 = vmatprep.mubr.bf16.mxu0 %v3542_v2  ;;  %v6337_v2 = vld [vmem:[%s8423_s3 + $0x144] ss:$8 sps:$4 sm:$0xff]  }
 0x26c   : > { %v5337_v33 = vadd.f32 %v2496_v45, %v7937_v10  ;;  %v2498_v53 = vpop.f32.mrb[7].mxu0  ;;  %4034 = vmatmul.mubr.bf16.vlgmr.msra.gmra.mrb[64].mxu0 %v3541_v25  ;;  %v3421_v60 = vmax.f32 %v5335_v12, 0.0 }
 0x26d   : > { %v5338_v41 = vadd.f32 %v2498_v53, %v7942_v23  ;;  %4195 = vmatpush1.bf16.msra.mxu0 %v6323_v20  ;;  %v3422_v29 = vmax.f32 %v5336_v34, 0.0  ;;  %v6335_v34 = vld [vmem:[%s8423_s3 + $0x140] ss:$8 sps:$4 sm:$0xff]  }
 0x26e   : > { %v3425_v54 = vmax.f32 %v5337_v33, 0.0  ;;  %5100 = vmatmul.mubr.msk.bf16.gmra.mrb[80].mxu1 %vm1820_vm0, %v7856_v63  ;;  %4196 = vmatprep.subr.bf16.mxu0 %v6328_v21  ;;  %v6340_v33 = vld [vmem:[%s8423_s3 + $0x154] ss:$8 sps:$4 sm:$0xff]  }
 0x26f   : > { %v3426_v3 = vmax.f32 %v5338_v41, 0.0  ;;  %3382 = vmatprep.mubr.bf16.mxu1 %v6395_v57 }
 0x270   : > { %v3545_v17 = vpack.c.bf16 %v3425_v54, %v3421_v60 }
 0x271   : > { %v3546_v44 = vpack.c.bf16 %v3426_v3, %v3422_v29  ;;  %v2502_v58 = vpop.f32.mrb[8].mxu0  ;;  %4197 = vmatpush1.bf16.msra.mxu0 %v6326_v39 }
 0x272   : > { %v5339_v22 = vadd.f32 %v2502_v58, %v7937_v10  ;;  %v2504_v63 = vpop.f32.mrb[9].mxu0  ;;  %4198 = vmatprep.subr.bf16.mxu0 %v6331_v32  ;;  %v6338_v32 = vld [vmem:[%s8423_s3 + $0x150] ss:$8 sps:$4 sm:$0xff]  }
 0x273   : > { %v5340_v16 = vadd.f32 %v2504_v63, %v7942_v23  ;;  %v2506_v9 = vpop.f32.mrb[10].mxu0  ;;  %4043 = vmatprep.mubr.bf16.mxu0 %v3546_v44 }
 0x274   : > { %v5341_v30 = vadd.f32 %v2506_v9, %v7937_v10  ;;  %v2508_v13 = vpop.f32.mrb[11].mxu0  ;;  %4044 = vmatmul.mubr.bf16.gmra.mrb[68].mxu0 %v3545_v17  ;;  %v3429_v49 = vmax.f32 %v5339_v22, 0.0  ;;  %v6343_v17 = vld [vmem:[%s8423_s3 + $0x164] ss:$8 sps:$4 sm:$0xff]   ;;  %v6346_v9 = vld [vmem:[%s8423_s3 + $0x174] ss:$8 sps:$4 sm:$0xff]  }
 0x275   : > { %v5342_v6 = vadd.f32 %v2508_v13, %v7942_v23  ;;  %4199 = vmatpush1.bf16.msra.mxu0 %v6329_v52  ;;  %v3430_v24 = vmax.f32 %v5340_v16, 0.0 }
 0x276   : > { %v3433_v25 = vmax.f32 %v5341_v30, 0.0  ;;  %5101 = vmatmul.mubr.msk.bf16.gmra.mrb[84].mxu1 %vm1820_vm0, %v7868_v26  ;;  %4200 = vmatprep.subr.bf16.mxu0 %v6334_v43  ;;  %v6341_v43 = vld [vmem:[%s8423_s3 + $0x160] ss:$8 sps:$4 sm:$0xff]  }
 0x277   : > { %v3434_v20 = vmax.f32 %v5342_v6, 0.0  ;;  %3392 = vmatprep.mubr.bf16.mxu1 %v6395_v57 }
 0x278   : > { %v3549_v12 = vpack.c.bf16 %v3433_v25, %v3429_v49  ;;  %v6344_v49 = vld [vmem:[%s8423_s3 + $0x170] ss:$8 sps:$4 sm:$0xff]  }
 0x279   : > { %v3550_v14 = vpack.c.bf16 %v3434_v20, %v3430_v24  ;;  %v2512_v21 = vpop.f32.mrb[12].mxu0  ;;  %4201 = vmatpush1.bf16.msra.mxu0 %v6332_v51  ;;  %v6349_v24 = vld [vmem:[%s8423_s3 + $0x184] ss:$8 sps:$4 sm:$0xff]  }
 0x27a   : > { %v5343_v45 = vadd.f32 %v2512_v21, %v7937_v10  ;;  %v2514_v26 = vpop.f32.mrb[13].mxu0  ;;  %4202 = vmatprep.subr.bf16.mxu0 %v6337_v2 }
 0x27b   : > { %v5344_v53 = vadd.f32 %v2514_v26, %v7942_v23  ;;  %v2516_v41 = vpop.f32.mrb[14].mxu0  ;;  %4053 = vmatprep.mubr.bf16.mxu0 %v3550_v14 }
 0x27c   : > { %v5345_v39 = vadd.f32 %v2516_v41, %v7937_v10  ;;  %v2518_v60 = vpop.f32.mrb[15].mxu0  ;;  %4054 = vmatmul.mubr.bf16.gmra.mrb[72].mxu0 %v3549_v12  ;;  %v3437_v29 = vmax.f32 %v5343_v45, 0.0  ;;  %v6347_v45 = vld [vmem:[%s8423_s3 + $0x180] ss:$8 sps:$4 sm:$0xff]  }
 0x27d   : > { %v5346_v54 = vadd.f32 %v2518_v60, %v7942_v23  ;;  %4203 = vmatpush1.bf16.msra.mxu0 %v6335_v34  ;;  %v3438_v44 = vmax.f32 %v5344_v53, 0.0 }
 0x27e   : > { %v3441_v3 = vmax.f32 %v5345_v39, 0.0  ;;  %5102 = vmatmul.mubr.msk.bf16.gmra.mrb[88].mxu1 %vm1820_vm0, %v7877_v35  ;;  %4204 = vmatprep.subr.bf16.mxu0 %v6340_v33 }
 0x27f   : > { %v3442_v58 = vmax.f32 %v5346_v54, 0.0  ;;  %3402 = vmatprep.mubr.bf16.mxu1 %v6395_v57 }
 0x280   : > { %v3553_v52 = vpack.c.bf16 %v3441_v3, %v3437_v29 }
 0x281   : > { %v3554_v22 = vpack.c.bf16 %v3442_v58, %v3438_v44  ;;  %v2522_v63 = vpop.f32.mrb[16].mxu0  ;;  %4205 = vmatpush1.bf16.msra.mxu0 %v6338_v32  ;;  %v6350_v32 = vld [vmem:[%s8423_s3 + $0x190] ss:$8 sps:$4 sm:$0xff]  }
 0x282   : > { %v5347_v16 = vadd.f32 %v2522_v63, %v7937_v10  ;;  %v2524_v35 = vpop.f32.mrb[17].mxu0  ;;  %4206 = vmatprep.subr.bf16.mxu0 %v6343_v17  ;;  %v6355_v17 = vld [vmem:[%s8423_s3 + $0x1a4] ss:$8 sps:$4 sm:$0xff]  }
 0x283   : > { %v5348_v30 = vadd.f32 %v2524_v35, %v7942_v23  ;;  %v2526_v13 = vpop.f32.mrb[18].mxu0  ;;  %4063 = vmatprep.mubr.bf16.mxu0 %v3554_v22 }
 0x284   : > { %v5349_v57 = vadd.f32 %v2526_v13, %v7937_v10  ;;  %v2528_v6 = vpop.f32.mrb[19].mxu0  ;;  %4064 = vmatmul.mubr.bf16.gmra.mrb[76].mxu0 %v3553_v52  ;;  %v3445_v25 = vmax.f32 %v5347_v16, 0.0 }
 0x285   : > { %v5350_v51 = vadd.f32 %v2528_v6, %v7942_v23  ;;  %4207 = vmatpush1.bf16.msra.mxu0 %v6341_v43  ;;  %v3446_v20 = vmax.f32 %v5348_v30, 0.0  ;;  %v6353_v43 = vld [vmem:[%s8423_s3 + $0x1a0] ss:$8 sps:$4 sm:$0xff]  }
 0x286   : > { %v3449_v2 = vmax.f32 %v5349_v57, 0.0  ;;  %5103 = vmatmul.mubr.msk.bf16.gmra.mrb[92].mxu1 %vm1820_vm0, %v7886_v47  ;;  %4208 = vmatprep.subr.bf16.mxu0 %v6346_v9  ;;  %v6352_v47 = vld [vmem:[%s8423_s3 + $0x194] ss:$8 sps:$4 sm:$0xff]  }
 0x287   : > { %v3450_v12 = vmax.f32 %v5350_v51, 0.0  ;;  %v6358_v9 = vld [vmem:[%s8423_s3 + $0x1b4] ss:$8 sps:$4 sm:$0xff]  }
 0x288   : > { %v3557_v14 = vpack.c.bf16 %v3449_v2, %v3445_v25 }
 0x289   : > { %v3558_v21 = vpack.c.bf16 %v3450_v12, %v3446_v20  ;;  %v2532_v34 = vpop.f32.mrb[20].mxu0  ;;  %4209 = vmatpush1.bf16.msra.mxu0 %v6344_v49  ;;  %v6356_v49 = vld [vmem:[%s8423_s3 + $0x1b0] ss:$8 sps:$4 sm:$0xff]  }
 0x28a   : > { %v5351_v26 = vadd.f32 %v2532_v34, %v7937_v10  ;;  %v2534_v33 = vpop.f32.mrb[21].mxu0  ;;  %4210 = vmatprep.subr.bf16.mxu0 %v6349_v24  ;;  %v6361_v24 = vld [vmem:[%s8423_s3 + $0x1c4] ss:$8 sps:$4 sm:$0xff]  }
 0x28b   : > { %v5352_v53 = vadd.f32 %v2534_v33, %v7942_v23  ;;  %v2536_v41 = vpop.f32.mrb[22].mxu0  ;;  %4073 = vmatprep.mubr.bf16.mxu0 %v3558_v21 }
 0x28c   : > { %v5353_v39 = vadd.f32 %v2536_v41, %v7937_v10  ;;  %v2538_v60 = vpop.f32.mrb[23].mxu0  ;;  %4074 = vmatmul.mubr.bf16.gmra.mrb[80].mxu0 %v3557_v14  ;;  %v3453_v29 = vmax.f32 %v5351_v26, 0.0 }
 0x28d   : > { %v5354_v54 = vadd.f32 %v2538_v60, %v7942_v23  ;;  %4211 = vmatpush1.bf16.msra.mxu0 %v6347_v45  ;;  %v3454_v44 = vmax.f32 %v5352_v53, 0.0  ;;  %v6359_v45 = vld [vmem:[%s8423_s3 + $0x1c0] ss:$8 sps:$4 sm:$0xff]  }
 0x28e   : > { %v3457_v3 = vmax.f32 %v5353_v39, 0.0  ;;  %4212 = vmatprep.subr.bf16.mxu0 %v6352_v47  ;;  %v6364_v47 = vld [vmem:[%s8423_s3 + $0x1d4] ss:$8 sps:$4 sm:$0xff]  }
 0x28f   : > { %v3458_v58 = vmax.f32 %v5354_v54, 0.0 }
 0x290   : > { %v3561_v52 = vpack.c.bf16 %v3457_v3, %v3453_v29 }
 0x291   : > { %v3562_v22 = vpack.c.bf16 %v3458_v58, %v3454_v44  ;;  %v2542_v63 = vpop.f32.mrb[24].mxu0  ;;  %4213 = vmatpush1.bf16.msra.mxu0 %v6350_v32  ;;  %v6362_v32 = vld [vmem:[%s8423_s3 + $0x1d0] ss:$8 sps:$4 sm:$0xff]  }
 0x292   : > { %v5355_v16 = vadd.f32 %v2542_v63, %v7937_v10  ;;  %v2544_v35 = vpop.f32.mrb[25].mxu0  ;;  %4214 = vmatprep.subr.bf16.mxu0 %v6355_v17  ;;  %v6367_v17 = vld [vmem:[%s8423_s3 + $0x1e4] ss:$8 sps:$4 sm:$0xff]   ;;  %v1986_v63 = vadd.f32 %v7377_v42, %v7942_v23  ;;  %v1990_v42 = vadd.f32 %v7385_v19, %v7942_v23  ;;  %v1994_v19 = vadd.f32 %v7404_v27, %v7937_v10 }
 0x293   : > { %v5356_v30 = vadd.f32 %v2544_v35, %v7942_v23  ;;  %v2546_v13 = vpop.f32.mrb[26].mxu0  ;;  %4083 = vmatprep.mubr.bf16.mxu0 %v3562_v22  ;;  %v6365_v35 = vld [vmem:[%s8423_s3 + $0x1e0] ss:$8 sps:$4 sm:$0xff]  }
 0x294   : > { %v5357_v57 = vadd.f32 %v2546_v13, %v7937_v10  ;;  %v2548_v6 = vpop.f32.mrb[27].mxu0  ;;  %4084 = vmatmul.mubr.bf16.gmra.mrb[84].mxu0 %v3561_v52  ;;  %v3461_v25 = vmax.f32 %v5355_v16, 0.0  ;;  %v1984_v52 = vadd.f32 %v7372_v15, %v7937_v10  ;;  %v6370_v15 = vld [vmem:[%s8423_s3 + $0x1f4] ss:$8 sps:$4 sm:$0xff]  }
 0x295   : > { %v5358_v51 = vadd.f32 %v2548_v6, %v7942_v23  ;;  %4215 = vmatpush1.bf16.msra.mxu0 %v6353_v43  ;;  %v3462_v20 = vmax.f32 %v5356_v30, 0.0 }
 0x296   : > { %v3465_v2 = vmax.f32 %v5357_v57, 0.0  ;;  %4216 = vmatprep.subr.bf16.mxu0 %v6358_v9  ;;  %v1988_v9 = vadd.f32 %v7381_v0, %v7937_v10  ;;  %v6368_v0 = vld [vmem:[%s8423_s3 + $0x1f0] ss:$8 sps:$4 sm:$0xff]  }
 0x297   : > { %v3466_v12 = vmax.f32 %v5358_v51, 0.0 }
 0x298   : > { %v3565_v14 = vpack.c.bf16 %v3465_v2, %v3461_v25 }
 0x299   : > { %v3566_v21 = vpack.c.bf16 %v3466_v12, %v3462_v20  ;;  %v2552_v34 = vpop.f32.mrb[28].mxu0  ;;  %4217 = vmatpush1.bf16.msra.mxu0 %v6356_v49 }
 0x29a   : > { %v5359_v26 = vadd.f32 %v2552_v34, %v7937_v10  ;;  %v2554_v33 = vpop.f32.mrb[29].mxu0  ;;  %4218 = vmatprep.subr.bf16.mxu0 %v6361_v24 }
 0x29b   : > { %v5360_v53 = vadd.f32 %v2554_v33, %v7942_v23  ;;  %v2556_v41 = vpop.f32.mrb[30].mxu0  ;;  %4093 = vmatprep.mubr.bf16.mxu0 %v3566_v21  ;;  %v1996_v21 = vadd.f32 %v7409_v5, %v7942_v23 }
 0x29c   : > { %v5361_v39 = vadd.f32 %v2556_v41, %v7937_v10  ;;  %v2558_v60 = vpop.f32.mrb[31].mxu0  ;;  %4094 = vmatmul.mubr.bf16.gmra.mrb[88].mxu0 %v3565_v14  ;;  %v3469_v29 = vmax.f32 %v5359_v26, 0.0  ;;  %v1998_v26 = vadd.f32 %v7413_v55, %v7937_v10 }
 0x29d   : > { %v5362_v54 = vadd.f32 %v2558_v60, %v7942_v23  ;;  %4219 = vmatpush1.bf16.msra.mxu0 %v6359_v45  ;;  %v3470_v44 = vmax.f32 %v5360_v53, 0.0  ;;  %v2000_v53 = vadd.f32 %v7417_v62, %v7942_v23 }
 0x29e   : > { %v3473_v3 = vmax.f32 %v5361_v39, 0.0  ;;  %4220 = vmatprep.subr.bf16.mxu0 %v6364_v47 }
 0x29f   : > { %v3474_v58 = vmax.f32 %v5362_v54, 0.0 }
 0x2a0   : > { %v3569_v22 = vpack.c.bf16 %v3473_v3, %v3469_v29 }
 0x2a1   : > { %v3570_v43 = vpack.c.bf16 %v3474_v58, %v3470_v44  ;;  %v2562_v16 = vpop.f32.mrb[32].mxu0  ;;  %4221 = vmatpush1.bf16.msra.mxu0 %v6362_v32  ;;  %v2006_v44 = vadd.f32 %v7441_v31, %v7942_v23 }
 0x2a2   : > { %v5364_v30 = vadd.f32 %v2562_v16, %v1984_v52  ;;  %v2564_v13 = vpop.f32.mrb[33].mxu0  ;;  %4222 = vmatprep.subr.bf16.mxu0 %v6367_v17  ;;  %v2004_v17 = vadd.f32 %v7436_v8, %v7937_v10  ;;  %v2008_v52 = vadd.f32 %v7445_v7, %v7937_v10 }
 0x2a3   : > { %v5366_v57 = vadd.f32 %v2564_v13, %v1986_v63  ;;  %v2566_v6 = vpop.f32.mrb[34].mxu0  ;;  %4103 = vmatprep.mubr.bf16.mxu0 %v3570_v43  ;;  %v2010_v43 = vadd.f32 %v7449_v36, %v7942_v23 }
 0x2a4   : > { %v5368_v51 = vadd.f32 %v2566_v6, %v1988_v9  ;;  %v2568_v49 = vpop.f32.mrb[35].mxu0  ;;  %4104 = vmatmul.mubr.bf16.gmra.mrb[92].mxu0 %v3569_v22  ;;  %v3477_v2 = vmax.f32 %v5364_v30, 0.0  ;;  %v2016_v6 = vadd.f32 %v7473_v61, %v7942_v23 }
 0x2a5   : > { %v5370_v25 = vadd.f32 %v2568_v49, %v1990_v42  ;;  %4223 = vmatpush1.bf16.msra.mxu0 %v6365_v35  ;;  %v3478_v20 = vmax.f32 %v5366_v57, 0.0  ;;  %v2014_v57 = vadd.f32 %v7468_v46, %v7937_v10  ;;  %v2018_v49 = vadd.f32 %v7477_v4, %v7937_v10 }
 0x2a6   : > { %v3481_v24 = vmax.f32 %v5368_v51, 0.0  ;;  %4224 = vmatprep.subr.bf16.mxu0 %v6370_v15 }
 0x2a7   : > { %v3482_v12 = vmax.f32 %v5370_v25, 0.0 }
 0x2a8   : > { %v3573_v14 = vpack.c.bf16 %v3481_v24, %v3477_v2  ;;  %v2020_v2 = vadd.f32 %v7481_v38, %v7942_v23 }
 0x2a9   : > { %v3574_v34 = vpack.c.bf16 %v3482_v12, %v3478_v20  ;;  %v2572_v45 = vpop.f32.mrb[36].mxu0  ;;  %4225 = vmatpush1.bf16.msra.mxu0 %v6368_v0 }
 0x2aa   : > { %v5372_v33 = vadd.f32 %v2572_v45, %v1994_v19  ;;  %v2574_v47 = vpop.f32.mrb[37].mxu0  ;;  %v2024_v45 = vadd.f32 %v7500_v40, %v7937_v10 }
 0x2ab   : > { %v5374_v41 = vadd.f32 %v2574_v47, %v1996_v21  ;;  %v2576_v39 = vpop.f32.mrb[38].mxu0  ;;  %4113 = vmatprep.mubr.bf16.mxu0 %v3574_v34  ;;  %v2028_v47 = vadd.f32 %v7509_v11, %v7937_v10 }
 0x2ac   : > { %v5376_v60 = vadd.f32 %v2576_v39, %v1998_v26  ;;  %v2578_v27 = vpop.f32.mrb[39].mxu0  ;;  %4114 = vmatmul.mubr.bf16.gmra.mrb[96].mxu0 %v3573_v14  ;;  %v3485_v32 = vmax.f32 %v5372_v33, 0.0  ;;  %v2026_v26 = vadd.f32 %v7505_v56, %v7942_v23  ;;  %v8438_v39 = vld [vmem:[#allocation2_spill] sm:$0xff] }
 0x2ad   : > { %v5378_v54 = vadd.f32 %v2578_v27, %v2000_v53  ;;  %v3486_v29 = vmax.f32 %v5374_v41, 0.0 }
 0x2ae   : > { %v3489_v5 = vmax.f32 %v5376_v60, 0.0  ;;  %v2030_v60 = vadd.f32 %v8438_v39, %v7942_v23  ;;  %v8445_v39 = vld [vmem:[#allocation9_spill] sm:$0xff] }
 0x2af   : > { %v3490_v3 = vmax.f32 %v5378_v54, 0.0 }
 0x2b0   : > { %v3577_v55 = vpack.c.bf16 %v3489_v5, %v3485_v32 }
 0x2b1   : > { %v3578_v58 = vpack.c.bf16 %v3490_v3, %v3486_v29  ;;  %v2582_v62 = vpop.f32.mrb[40].mxu0 }
 0x2b2   : > { %v5380_v22 = vadd.f32 %v2582_v62, %v2004_v17  ;;  %v2584_v63 = vpop.f32.mrb[41].mxu0 }
 0x2b3   : > { %v5382_v16 = vadd.f32 %v2584_v63, %v2006_v44  ;;  %v2586_v35 = vpop.f32.mrb[42].mxu0  ;;  %4123 = vmatprep.mubr.bf16.mxu0 %v3578_v58  ;;  %v2036_v44 = vadd.f32 %v7537_v50, %v7942_v23  ;;  %v6371_v50 = vld [vmem:[%s8425_s5 + $0x40] sm:$0xff]  }
 0x2b4   : > { %v5384_v9 = vadd.f32 %v2586_v35, %v2008_v52  ;;  %v2588_v30 = vpop.f32.mrb[43].mxu0  ;;  %4124 = vmatmul.mubr.bf16.gmra.mrb[100].mxu0 %v3577_v55  ;;  %v3493_v13 = vmax.f32 %v5380_v22, 0.0  ;;  %v2034_v55 = vadd.f32 %v7532_v28, %v7937_v10  ;;  %v8439_v52 = vld [vmem:[#allocation3_spill] sm:$0xff]  ;;  %5187 = vmatprep.subr.bf16.mxu1 %v6371_v50 }
 0x2b5   : > { %v5386_v8 = vadd.f32 %v2588_v30, %v2010_v43  ;;  %v3494_v31 = vmax.f32 %v5382_v16, 0.0  ;;  %v2038_v22 = vadd.f32 %v8439_v52, %v7937_v10  ;;  %v8440_v16 = vld [vmem:[#allocation4_spill] sm:$0xff] }
 0x2b6   : > { %v3497_v15 = vmax.f32 %v5384_v9, 0.0  ;;  %v2040_v35 = vadd.f32 %v8440_v16, %v7942_v23 }
 0x2b7   : > { %v3498_v42 = vmax.f32 %v5386_v8, 0.0 }
 0x2b8   : > { %v3581_v7 = vpack.c.bf16 %v3497_v15, %v3493_v13 }
 0x2b9   : > { %v3582_v51 = vpack.c.bf16 %v3498_v42, %v3494_v31  ;;  %v2592_v36 = vpop.f32.mrb[44].mxu0 }
 0x2ba   : > { %v5388_v25 = vadd.f32 %v2592_v36, %v2014_v57  ;;  %v2594_v0 = vpop.f32.mrb[45].mxu0  ;;  %v6372_v36 = vld [vmem:[%s8425_s5] sm:$0xff]  }
 0x2bb   : > { %v5390_v24 = vadd.f32 %v2594_v0, %v2016_v6  ;;  %v2596_v20 = vpop.f32.mrb[46].mxu0  ;;  %4133 = vmatprep.mubr.bf16.mxu0 %v3582_v51  ;;  %5188 = vmatpush3.bf16.msra.mxu1 %v6372_v36 }
 0x2bc   : > { %v5392_v12 = vadd.f32 %v2596_v20, %v2018_v49  ;;  %v2598_v19 = vpop.f32.mrb[47].mxu0  ;;  %4134 = vmatmul.mubr.bf16.gmra.mrb[104].mxu0 %v3581_v7  ;;  %v3501_v14 = vmax.f32 %v5388_v25, 0.0  ;;  %v8441_v7 = vld [vmem:[#allocation5_spill] sm:$0xff]  ;;  %v8442_v49 = vld [vmem:[#allocation6_spill] sm:$0xff] }
 0x2bd   : > { %v5394_v46 = vadd.f32 %v2598_v19, %v2020_v2  ;;  %v3502_v61 = vmax.f32 %v5390_v24, 0.0  ;;  %v2044_v6 = vadd.f32 %v8441_v7, %v7937_v10  ;;  %v2046_v25 = vadd.f32 %v8442_v49, %v7942_v23  ;;  %v8443_v24 = vld [vmem:[#allocation7_spill] sm:$0xff]  ;;  %v6377_v7 = vld [vmem:[%s8425_s5 + $0x58] sm:$0xff]  }
 0x2be   : > { %v3505_v21 = vmax.f32 %v5392_v12, 0.0  ;;  %v2048_v20 = vadd.f32 %v8443_v24, %v7937_v10  ;;  %v6379_v24 = vld [vmem:[%s8425_s5 + $0x60] sm:$0xff]  }
 0x2bf   : > { %v3506_v34 = vmax.f32 %v5394_v46, 0.0  ;;  %v8444_v46 = vld [vmem:[#allocation8_spill] sm:$0xff] }
 0x2c0   : > { %v3585_v4 = vpack.c.bf16 %v3505_v21, %v3501_v14  ;;  %v2050_v14 = vadd.f32 %v8444_v46, %v7942_v23 }
 0x2c1   : > { %v3586_v33 = vpack.c.bf16 %v3506_v34, %v3502_v61  ;;  %v2602_v38 = vpop.f32.mrb[48].mxu0 }
 0x2c2   : > { %v5396_v53 = vadd.f32 %v2602_v38, %v2024_v45  ;;  %v2604_v41 = vpop.f32.mrb[49].mxu0 }
 0x2c3   : > { %v5398_v27 = vadd.f32 %v2604_v41, %v2026_v26  ;;  %v2606_v54 = vpop.f32.mrb[50].mxu0  ;;  %4143 = vmatprep.mubr.bf16.mxu0 %v3586_v33 }
 0x2c4   : > { %v5400_v32 = vadd.f32 %v2606_v54, %v2028_v47  ;;  %v2608_v5 = vpop.f32.mrb[51].mxu0  ;;  %4144 = vmatmul.mubr.bf16.gmra.mrb[108].mxu0 %v3585_v4  ;;  %v3509_v29 = vmax.f32 %v5396_v53, 0.0  ;;  %v2054_v53 = vadd.f32 %v7575_v48, %v7937_v10  ;;  %v834_v48 = vsub.s32 3, %v7922_v18 }
 0x2c5   : > { %v5402_v40 = vadd.f32 %v2608_v5, %v2030_v60  ;;  %v3510_v56 = vmax.f32 %v5398_v27, 0.0  ;;  %v2056_v60 = vadd.f32 %v8445_v39, %v7942_v23 }
 0x2c6   : > { %v3513_v3 = vmax.f32 %v5400_v32, 0.0  ;;  %v8446_v32 = vld [vmem:[#allocation10_spill] sm:$0xff]  ;;  %v8162_v16 = vrot.slane %v7928_v59, %v834_v48 }
 0x2c7   : > { %v3514_v17 = vmax.f32 %v5402_v40, 0.0  ;;  %v2058_v5 = vadd.f32 %v8446_v32, %v7937_v10  ;;  %v6373_v10 = vld [vmem:[%s8425_s5 + $0x48] sm:$0xff]  }
 0x2c8   : > { %v3589_v11 = vpack.c.bf16 %v3513_v3, %v3509_v29  ;;  %v830_v3 = vsub.s32 2, %v7922_v18  ;;  %5189 = vmatprep.subr.bf16.mxu1 %v6373_v10  ;;  %v6386_v10 = vld [vmem:[%s8425_s5 + $0x38] sm:$0xff]  }
 0x2c9   : > { %v3590_v58 = vpack.c.bf16 %v3514_v17, %v3510_v56  ;;  %v2612_v62 = vpop.f32.mrb[52].mxu0  ;;  %v8447_v56 = vld [vmem:[#allocation11_spill] sm:$0xff] }
 0x2ca   : > { %v5404_v63 = vadd.f32 %v2612_v62, %v2034_v55  ;;  %v2614_v43 = vpop.f32.mrb[53].mxu0  ;;  %v2060_v17 = vadd.f32 %v8447_v56, %v7942_v23 }
 0x2cb   : > { %v5406_v9 = vadd.f32 %v2614_v43, %v2036_v44  ;;  %v2616_v30 = vpop.f32.mrb[54].mxu0  ;;  %4153 = vmatprep.mubr.bf16.mxu0 %v3590_v58 }
 0x2cc   : > { %v5408_v8 = vadd.f32 %v2616_v30, %v2038_v22  ;;  %v2618_v13 = vpop.f32.mrb[55].mxu0  ;;  %4154 = vmatmul.mubr.bf16.gmra.mrb[112].mxu0 %v3589_v11  ;;  %v3517_v15 = vmax.f32 %v5404_v63, 0.0  ;;  %v8159_v63 = vrot.slane %v7928_v59, %v830_v3  ;;  %v6384_v3 = vld [vmem:[%s8425_s5 + $0x30] sm:$0xff]  }
 0x2cd   : > { %v5410_v28 = vadd.f32 %v2618_v13, %v2040_v35  ;;  %v3518_v42 = vmax.f32 %v5406_v9, 0.0  ;;  %v6374_v9 = vld [vmem:[%s8425_s5 + $0x8] sm:$0xff]  }
 0x2ce   : > { %v3521_v31 = vmax.f32 %v5408_v8, 0.0  ;;  %5190 = vmatpush3.bf16.msra.mxu1 %v6374_v9 }
 0x2cf   : > { %v3522_v57 = vmax.f32 %v5410_v28, 0.0 }
 0x2d0   : > { %v3593_v51 = vpack.c.bf16 %v3521_v31, %v3517_v15 }
 0x2d1   : > { %v3594_v0 = vpack.c.bf16 %v3522_v57, %v3518_v42  ;;  %v2622_v2 = vpop.f32.mrb[56].mxu0  ;;  %v6375_v42 = vld [vmem:[%s8425_s5 + $0x50] sm:$0xff]  }
 0x2d2   : > { %v5412_v12 = vadd.f32 %v2622_v2, %v2044_v6  ;;  %v2624_v19 = vpop.f32.mrb[57].mxu0  ;;  %v6376_v57 = vld [vmem:[%s8425_s5 + $0x10] sm:$0xff]   ;;  %5191 = vmatprep.subr.bf16.mxu1 %v6375_v42 }
 0x2d3   : > { %v5414_v21 = vadd.f32 %v2624_v19, %v2046_v25  ;;  %v2626_v61 = vpop.f32.mrb[58].mxu0  ;;  %4163 = vmatprep.mubr.bf16.mxu0 %v3594_v0  ;;  %5192 = vmatpush3.bf16.msra.mxu1 %v6376_v57  ;;  %v6378_v0 = vld [vmem:[%s8425_s5 + $0x18] sm:$0xff]  }
 0x2d4   : > { %v5416_v34 = vadd.f32 %v2626_v61, %v2048_v20  ;;  %v2628_v45 = vpop.f32.mrb[59].mxu0  ;;  %4164 = vmatmul.mubr.bf16.gmra.mrb[116].mxu0 %v3593_v51  ;;  %v3525_v26 = vmax.f32 %v5412_v12, 0.0  ;;  %5193 = vmatprep.subr.bf16.mxu1 %v6377_v7  ;;  %v6380_v61 = vld [vmem:[%s8425_s5 + $0x20] sm:$0xff]  }
 0x2d5   : > { %v5418_v4 = vadd.f32 %v2628_v45, %v2050_v14  ;;  %v3526_v38 = vmax.f32 %v5414_v21, 0.0 }
 0x2d6   : > { %v3529_v33 = vmax.f32 %v5416_v34, 0.0 }
 0x2d7   : > { %v3530_v47 = vmax.f32 %v5418_v4, 0.0  ;;  %5194 = vmatpush3.bf16.msra.mxu1 %v6378_v0  ;;  %v6381_v4 = vld [vmem:[%s8425_s5 + $0x68] sm:$0xff]  }
 0x2d8   : > { %v3597_v41 = vpack.c.bf16 %v3529_v33, %v3525_v26  ;;  %5195 = vmatprep.subr.bf16.mxu1 %v6379_v24 }
 0x2d9   : > { %v3598_v27 = vpack.c.bf16 %v3530_v47, %v3526_v38  ;;  %v2632_v54 = vpop.f32.mrb[60].mxu0 }
 0x2da   : > { %v5420_v40 = vadd.f32 %v2632_v54, %v2054_v53  ;;  %v2634_v29 = vpop.f32.mrb[61].mxu0 }
 0x2db   : > { %v5422_v55 = vadd.f32 %v2634_v29, %v2056_v60  ;;  %v2636_v11 = vpop.f32.mrb[62].mxu0  ;;  %4173 = vmatprep.mubr.bf16.mxu0 %v3598_v27  ;;  %5196 = vmatpush3.bf16.msra.mxu1 %v6380_v61  ;;  %v6383_v60 = vld [vmem:[%s8425_s5 + $0x70] sm:$0xff]  }
 0x2dc   : > { %v5424_v44 = vadd.f32 %v2636_v11, %v2058_v5  ;;  %v2638_v58 = vpop.f32.mrb[63].mxu0  ;;  %4174 = vmatmul.mubr.bf16.gmra.mrb[120].mxu0 %v3597_v41  ;;  %v3533_v52 = vmax.f32 %v5420_v40, 0.0  ;;  %v6382_v41 = vld [vmem:[%s8425_s5 + $0x28] sm:$0xff]   ;;  %5197 = vmatprep.subr.bf16.mxu1 %v6381_v4 }
 0x2dd   : > { %v5426_v62 = vadd.f32 %v2638_v58, %v2060_v17  ;;  %v3534_v43 = vmax.f32 %v5422_v55, 0.0  ;;  %v6385_v55 = vld [vmem:[%s8425_s5 + $0x78] sm:$0xff]  }
 0x2de   : > { %v3537_v22 = vmax.f32 %v5424_v44, 0.0 }
 0x2df   : > { %v3538_v23 = vmax.f32 %v5426_v62, 0.0  ;;  %5198 = vmatpush3.bf16.msra.mxu1 %v6382_v41 }
 0x2e0   : > { %v3601_v35 = vpack.c.bf16 %v3537_v22, %v3533_v52  ;;  %5199 = vmatprep.subr.bf16.mxu1 %v6383_v60 }
 0x2e1   : > { %v3602_v30 = vpack.c.bf16 %v3538_v23, %v3534_v43  ;;  %v3254_v8 = vpop.f32.mrb[32].mxu1 }
 0x2e2   : > { %v5427_v13 = vadd.f32 %v3254_v8, %v8159_v63  ;;  %v3256_v28 = vpop.f32.mrb[33].mxu1 }
 0x2e3   : > { %v5428_v50 = vadd.f32 %v3256_v28, %v8162_v16  ;;  %v3258_v15 = vpop.f32.mrb[34].mxu1  ;;  %4183 = vmatprep.mubr.bf16.mxu0 %v3602_v30  ;;  %5200 = vmatpush3.bf16.msra.mxu1 %v6384_v3 }
 0x2e4   : > { %v5429_v31 = vadd.f32 %v3258_v15, %v8159_v63  ;;  %v3260_v59 = vpop.f32.mrb[35].mxu1  ;;  %4184 = vmatmul.mubr.bf16.gmra.mrb[124].mxu0 %v3601_v35  ;;  %v3415_v51 = vmax.f32 %v5427_v13, 0.0  ;;  %5201 = vmatprep.subr.bf16.mxu1 %v6385_v55 }
 0x2e5   : > { %v5430_v6 = vadd.f32 %v3260_v59, %v8162_v16  ;;  %v3416_v49 = vmax.f32 %v5428_v50, 0.0 }
 0x2e6   : > { %v3419_v36 = vmax.f32 %v5429_v31, 0.0 }
 0x2e7   : > { %v3420_v25 = vmax.f32 %v5430_v6, 0.0  ;;  %5202 = vmatpush3.bf16.msra.mxu1 %v6386_v10 }
 0x2e8   : > { %v3543_v2 = vpack.c.bf16 %v3419_v36, %v3415_v51 }
 0x2e9   : > { %v3544_v20 = vpack.c.bf16 %v3420_v25, %v3416_v49  ;;  %v3264_v12 = vpop.f32.mrb[36].mxu1 }
 0x2ea   : > { %v5431_v19 = vadd.f32 %v3264_v12, %v8159_v63  ;;  %v3266_v46 = vpop.f32.mrb[37].mxu1 }
 0x2eb   : > { %v5432_v14 = vadd.f32 %v3266_v46, %v8162_v16  ;;  %v3268_v21 = vpop.f32.mrb[38].mxu1  ;;  %4226 = vmatprep.mubr.bf16.mxu0 %v3544_v20 }
 0x2ec   : > { %v5433_v34 = vadd.f32 %v3268_v21, %v8159_v63  ;;  %v3270_v45 = vpop.f32.mrb[39].mxu1  ;;  %4227 = vmatmul.mubr.bf16.vlgmr.msra.gmra.mrb[64].mxu0 %v3543_v2  ;;  %v3423_v33 = vmax.f32 %v5431_v19, 0.0 }
 0x2ed   : > { %v5434_v26 = vadd.f32 %v3270_v45, %v8162_v16  ;;  %v3424_v47 = vmax.f32 %v5432_v14, 0.0 }
 0x2ee   : > { %v3427_v38 = vmax.f32 %v5433_v34, 0.0 }
 0x2ef   : > { %v3428_v53 = vmax.f32 %v5434_v26, 0.0 }
 0x2f0   : > { %v3547_v39 = vpack.c.bf16 %v3427_v38, %v3423_v33 }
 0x2f1   : > { %v3548_v27 = vpack.c.bf16 %v3428_v53, %v3424_v47  ;;  %v3274_v54 = vpop.f32.mrb[40].mxu1 }
 0x2f2   : > { %v5435_v32 = vadd.f32 %v3274_v54, %v8159_v63  ;;  %v3276_v5 = vpop.f32.mrb[41].mxu1 }
 0x2f3   : > { %v5436_v40 = vadd.f32 %v3276_v5, %v8162_v16  ;;  %v3278_v29 = vpop.f32.mrb[42].mxu1  ;;  %4236 = vmatprep.mubr.bf16.mxu0 %v3548_v27 }
 0x2f4   : > { %v5437_v56 = vadd.f32 %v3278_v29, %v8159_v63  ;;  %v3280_v17 = vpop.f32.mrb[43].mxu1  ;;  %4237 = vmatmul.mubr.bf16.gmra.mrb[68].mxu0 %v3547_v39  ;;  %v3431_v48 = vmax.f32 %v5435_v32, 0.0 }
 0x2f5   : > { %v5438_v11 = vadd.f32 %v3280_v17, %v8162_v16  ;;  %v3432_v58 = vmax.f32 %v5436_v40, 0.0 }
 0x2f6   : > { %v3435_v44 = vmax.f32 %v5437_v56, 0.0 }
 0x2f7   : > { %v3436_v62 = vmax.f32 %v5438_v11, 0.0 }
 0x2f8   : > { %v3551_v52 = vpack.c.bf16 %v3435_v44, %v3431_v48 }
 0x2f9   : > { %v3552_v22 = vpack.c.bf16 %v3436_v62, %v3432_v58  ;;  %v3284_v43 = vpop.f32.mrb[44].mxu1 }
 0x2fa   : > { %v5439_v23 = vadd.f32 %v3284_v43, %v8159_v63  ;;  %v3286_v35 = vpop.f32.mrb[45].mxu1 }
 0x2fb   : > { %v5440_v9 = vadd.f32 %v3286_v35, %v8162_v16  ;;  %v3288_v30 = vpop.f32.mrb[46].mxu1  ;;  %4246 = vmatprep.mubr.bf16.mxu0 %v3552_v22 }
 0x2fc   : > { %v5441_v8 = vadd.f32 %v3288_v30, %v8159_v63  ;;  %v3290_v13 = vpop.f32.mrb[47].mxu1  ;;  %4247 = vmatmul.mubr.bf16.gmra.mrb[72].mxu0 %v3551_v52  ;;  %v3439_v50 = vmax.f32 %v5439_v23, 0.0 }
 0x2fd   : > { %v5442_v28 = vadd.f32 %v3290_v13, %v8162_v16  ;;  %v3440_v31 = vmax.f32 %v5440_v9, 0.0 }
 0x2fe   : > { %v3443_v15 = vmax.f32 %v5441_v8, 0.0 }
 0x2ff   : > { %v3444_v59 = vmax.f32 %v5442_v28, 0.0 }
 0x300   : > { %v3555_v42 = vpack.c.bf16 %v3443_v15, %v3439_v50 }
 0x301   : > { %v3556_v57 = vpack.c.bf16 %v3444_v59, %v3440_v31  ;;  %v3294_v7 = vpop.f32.mrb[48].mxu1 }
 0x302   : > { %v5443_v6 = vadd.f32 %v3294_v7, %v8159_v63  ;;  %v3296_v51 = vpop.f32.mrb[49].mxu1 }
 0x303   : > { %v5444_v36 = vadd.f32 %v3296_v51, %v8162_v16  ;;  %v3298_v49 = vpop.f32.mrb[50].mxu1  ;;  %4256 = vmatprep.mubr.bf16.mxu0 %v3556_v57 }
 0x304   : > { %v5445_v25 = vadd.f32 %v3298_v49, %v8159_v63  ;;  %v3300_v0 = vpop.f32.mrb[51].mxu1  ;;  %4257 = vmatmul.mubr.bf16.gmra.mrb[76].mxu0 %v3555_v42  ;;  %v3447_v24 = vmax.f32 %v5443_v6, 0.0 }
 0x305   : > { %v5446_v2 = vadd.f32 %v3300_v0, %v8162_v16  ;;  %v3448_v12 = vmax.f32 %v5444_v36, 0.0 }
 0x306   : > { %v3451_v20 = vmax.f32 %v5445_v25, 0.0 }
 0x307   : > { %v3452_v19 = vmax.f32 %v5446_v2, 0.0 }
 0x308   : > { %v3559_v46 = vpack.c.bf16 %v3451_v20, %v3447_v24 }
 0x309   : > { %v3560_v14 = vpack.c.bf16 %v3452_v19, %v3448_v12  ;;  %v3304_v21 = vpop.f32.mrb[52].mxu1 }
 0x30a   : > { %v5447_v61 = vadd.f32 %v3304_v21, %v8159_v63  ;;  %v3306_v34 = vpop.f32.mrb[53].mxu1 }
 0x30b   : > { %v5448_v45 = vadd.f32 %v3306_v34, %v8162_v16  ;;  %v3308_v4 = vpop.f32.mrb[54].mxu1  ;;  %4266 = vmatprep.mubr.bf16.mxu0 %v3560_v14 }
 0x30c   : > { %v5449_v26 = vadd.f32 %v3308_v4, %v8159_v63  ;;  %v3310_v33 = vpop.f32.mrb[55].mxu1  ;;  %4267 = vmatmul.mubr.bf16.gmra.mrb[80].mxu0 %v3559_v46  ;;  %v3455_v47 = vmax.f32 %v5447_v61, 0.0 }
 0x30d   : > { %v5450_v38 = vadd.f32 %v3310_v33, %v8162_v16  ;;  %v3456_v41 = vmax.f32 %v5448_v45, 0.0 }
 0x30e   : > { %v3459_v53 = vmax.f32 %v5449_v26, 0.0 }
 0x30f   : > { %v3460_v39 = vmax.f32 %v5450_v38, 0.0 }
 0x310   : > { %v3563_v60 = vpack.c.bf16 %v3459_v53, %v3455_v47 }
 0x311   : > { %v3564_v27 = vpack.c.bf16 %v3460_v39, %v3456_v41  ;;  %v3314_v54 = vpop.f32.mrb[56].mxu1 }
 0x312   : > { %v5451_v32 = vadd.f32 %v3314_v54, %v8159_v63  ;;  %v3316_v5 = vpop.f32.mrb[57].mxu1 }
 0x313   : > { %v5452_v40 = vadd.f32 %v3316_v5, %v8162_v16  ;;  %v3318_v29 = vpop.f32.mrb[58].mxu1  ;;  %4276 = vmatprep.mubr.bf16.mxu0 %v3564_v27 }
 0x314   : > { %v5453_v3 = vadd.f32 %v3318_v29, %v8159_v63  ;;  %v3320_v56 = vpop.f32.mrb[59].mxu1  ;;  %4277 = vmatmul.mubr.bf16.gmra.mrb[84].mxu0 %v3563_v60  ;;  %v3463_v55 = vmax.f32 %v5451_v32, 0.0 }
 0x315   : > { %v5454_v17 = vadd.f32 %v3320_v56, %v8162_v16  ;;  %v3464_v48 = vmax.f32 %v5452_v40, 0.0 }
 0x316   : > { %v3467_v11 = vmax.f32 %v5453_v3, 0.0 }
 0x317   : > { %v3468_v44 = vmax.f32 %v5454_v17, 0.0 }
 0x318   : > { %v3567_v58 = vpack.c.bf16 %v3467_v11, %v3463_v55 }
 0x319   : > { %v3568_v62 = vpack.c.bf16 %v3468_v44, %v3464_v48  ;;  %v3324_v10 = vpop.f32.mrb[60].mxu1 }
 0x31a   : > { %v5455_v52 = vadd.f32 %v3324_v10, %v8159_v63  ;;  %v3326_v22 = vpop.f32.mrb[61].mxu1 }
 0x31b   : > { %v5456_v43 = vadd.f32 %v3326_v22, %v8162_v16  ;;  %v3328_v23 = vpop.f32.mrb[62].mxu1  ;;  %4286 = vmatprep.mubr.bf16.mxu0 %v3568_v62 }
 0x31c   : > { %v5457_v35 = vadd.f32 %v3328_v23, %v8159_v63  ;;  %v3330_v9 = vpop.f32.mrb[63].mxu1  ;;  %4287 = vmatmul.mubr.bf16.gmra.mrb[88].mxu0 %v3567_v58  ;;  %v3471_v8 = vmax.f32 %v5455_v52, 0.0 }
 0x31d   : > { %v5458_v30 = vadd.f32 %v3330_v9, %v8162_v16  ;;  %v3472_v28 = vmax.f32 %v5456_v43, 0.0 }
 0x31e   : > { %v3475_v13 = vmax.f32 %v5457_v35, 0.0 }
 0x31f   : > { %v3476_v50 = vmax.f32 %v5458_v30, 0.0 }
 0x320   : > { %v3571_v15 = vpack.c.bf16 %v3475_v13, %v3471_v8 }
 0x321   : > { %v3572_v31 = vpack.c.bf16 %v3476_v50, %v3472_v28  ;;  %v3334_v59 = vpop.f32.mrb[64].mxu1 }
 0x322   : > { %v5459_v42 = vadd.f32 %v3334_v59, %v8159_v63  ;;  %v3336_v57 = vpop.f32.mrb[65].mxu1 }
 0x323   : > { %v5460_v7 = vadd.f32 %v3336_v57, %v8162_v16  ;;  %v3338_v6 = vpop.f32.mrb[66].mxu1  ;;  %4296 = vmatprep.mubr.bf16.mxu0 %v3572_v31 }
 0x324   : > { %v5461_v51 = vadd.f32 %v3338_v6, %v8159_v63  ;;  %v3340_v36 = vpop.f32.mrb[67].mxu1  ;;  %4297 = vmatmul.mubr.bf16.gmra.mrb[92].mxu0 %v3571_v15  ;;  %v3479_v25 = vmax.f32 %v5459_v42, 0.0 }
 0x325   : > { %v5462_v49 = vadd.f32 %v3340_v36, %v8162_v16  ;;  %v3480_v2 = vmax.f32 %v5460_v7, 0.0 }
 0x326   : > { %v3483_v0 = vmax.f32 %v5461_v51, 0.0 }
 0x327   : > { %v3484_v24 = vmax.f32 %v5462_v49, 0.0 }
 0x328   : > { %v3575_v20 = vpack.c.bf16 %v3483_v0, %v3479_v25 }
 0x329   : > { %v3576_v12 = vpack.c.bf16 %v3484_v24, %v3480_v2  ;;  %v3344_v19 = vpop.f32.mrb[68].mxu1 }
 0x32a   : > { %v5463_v46 = vadd.f32 %v3344_v19, %v8159_v63  ;;  %v3346_v14 = vpop.f32.mrb[69].mxu1 }
 0x32b   : > { %v5464_v21 = vadd.f32 %v3346_v14, %v8162_v16  ;;  %v3348_v61 = vpop.f32.mrb[70].mxu1  ;;  %4306 = vmatprep.mubr.bf16.mxu0 %v3576_v12 }
 0x32c   : > { %v5465_v34 = vadd.f32 %v3348_v61, %v8159_v63  ;;  %v3350_v45 = vpop.f32.mrb[71].mxu1  ;;  %4307 = vmatmul.mubr.bf16.gmra.mrb[96].mxu0 %v3575_v20  ;;  %v3487_v26 = vmax.f32 %v5463_v46, 0.0 }
 0x32d   : > { %v5466_v4 = vadd.f32 %v3350_v45, %v8162_v16  ;;  %v3488_v38 = vmax.f32 %v5464_v21, 0.0 }
 0x32e   : > { %v3491_v33 = vmax.f32 %v5465_v34, 0.0 }
 0x32f   : > { %v3492_v47 = vmax.f32 %v5466_v4, 0.0 }
 0x330   : > { %v3579_v53 = vpack.c.bf16 %v3491_v33, %v3487_v26 }
 0x331   : > { %v3580_v41 = vpack.c.bf16 %v3492_v47, %v3488_v38  ;;  %v3354_v39 = vpop.f32.mrb[72].mxu1 }
 0x332   : > { %v5467_v60 = vadd.f32 %v3354_v39, %v8159_v63  ;;  %v3356_v27 = vpop.f32.mrb[73].mxu1 }
 0x333   : > { %v5468_v54 = vadd.f32 %v3356_v27, %v8162_v16  ;;  %v3358_v32 = vpop.f32.mrb[74].mxu1  ;;  %4316 = vmatprep.mubr.bf16.mxu0 %v3580_v41 }
 0x334   : > { %v5469_v5 = vadd.f32 %v3358_v32, %v8159_v63  ;;  %v3360_v40 = vpop.f32.mrb[75].mxu1  ;;  %4317 = vmatmul.mubr.bf16.gmra.mrb[100].mxu0 %v3579_v53  ;;  %v3495_v3 = vmax.f32 %v5467_v60, 0.0 }
 0x335   : > { %v5470_v29 = vadd.f32 %v3360_v40, %v8162_v16  ;;  %v3496_v17 = vmax.f32 %v5468_v54, 0.0 }
 0x336   : > { %v3499_v56 = vmax.f32 %v5469_v5, 0.0 }
 0x337   : > { %v3500_v55 = vmax.f32 %v5470_v29, 0.0 }
 0x338   : > { %v3583_v11 = vpack.c.bf16 %v3499_v56, %v3495_v3 }
 0x339   : > { %v3584_v48 = vpack.c.bf16 %v3500_v55, %v3496_v17  ;;  %v3364_v44 = vpop.f32.mrb[76].mxu1 }
 0x33a   : > { %v5471_v58 = vadd.f32 %v3364_v44, %v8159_v63  ;;  %v3366_v62 = vpop.f32.mrb[77].mxu1 }
 0x33b   : > { %v5472_v10 = vadd.f32 %v3366_v62, %v8162_v16  ;;  %v3368_v52 = vpop.f32.mrb[78].mxu1  ;;  %4326 = vmatprep.mubr.bf16.mxu0 %v3584_v48 }
 0x33c   : > { %v5473_v22 = vadd.f32 %v3368_v52, %v8159_v63  ;;  %v3370_v43 = vpop.f32.mrb[79].mxu1  ;;  %4327 = vmatmul.mubr.bf16.gmra.mrb[104].mxu0 %v3583_v11  ;;  %v3503_v35 = vmax.f32 %v5471_v58, 0.0 }
 0x33d   : > { %v5474_v23 = vadd.f32 %v3370_v43, %v8162_v16  ;;  %v3504_v30 = vmax.f32 %v5472_v10, 0.0 }
 0x33e   : > { %v3507_v9 = vmax.f32 %v5473_v22, 0.0 }
 0x33f   : > { %v3508_v8 = vmax.f32 %v5474_v23, 0.0 }
 0x340   : > { %v3587_v13 = vpack.c.bf16 %v3507_v9, %v3503_v35 }
 0x341   : > { %v3588_v28 = vpack.c.bf16 %v3508_v8, %v3504_v30  ;;  %v3374_v50 = vpop.f32.mrb[80].mxu1  ;;  %v3669_v8 = vld [vmem:[%s8424_s4] sm:$0x3] }
 0x342   : > { %v5475_v15 = vadd.f32 %v3374_v50, %v8159_v63  ;;  %v3376_v31 = vpop.f32.mrb[81].mxu1 }
 0x343   : > { %v5476_v59 = vadd.f32 %v3376_v31, %v8162_v16  ;;  %v3378_v42 = vpop.f32.mrb[82].mxu1  ;;  %4336 = vmatprep.mubr.bf16.mxu0 %v3588_v28 }
 0x344   : > { %v5477_v57 = vadd.f32 %v3378_v42, %v8159_v63  ;;  %v3380_v7 = vpop.f32.mrb[83].mxu1  ;;  %4337 = vmatmul.mubr.bf16.gmra.mrb[108].mxu0 %v3587_v13  ;;  %v3511_v51 = vmax.f32 %v5475_v15, 0.0  ;;  %v8272_v13 = vrot.slane %v3669_v8, %v822_v37 }
 0x345   : > { %v5478_v6 = vadd.f32 %v3380_v7, %v8162_v16  ;;  %v3512_v49 = vmax.f32 %v5476_v59, 0.0 }
 0x346   : > { %v3515_v36 = vmax.f32 %v5477_v57, 0.0 }
 0x347   : > { %v3516_v25 = vmax.f32 %v5478_v6, 0.0 }
 0x348   : > { %v3591_v0 = vpack.c.bf16 %v3515_v36, %v3511_v51 }
 0x349   : > { %v3592_v2 = vpack.c.bf16 %v3516_v25, %v3512_v49  ;;  %v3384_v24 = vpop.f32.mrb[84].mxu1 }
 0x34a   : > { %v5479_v20 = vadd.f32 %v3384_v24, %v8159_v63  ;;  %v3386_v12 = vpop.f32.mrb[85].mxu1 }
 0x34b   : > { %v5480_v19 = vadd.f32 %v3386_v12, %v8162_v16  ;;  %v3388_v46 = vpop.f32.mrb[86].mxu1  ;;  %4346 = vmatprep.mubr.bf16.mxu0 %v3592_v2 }
 0x34c   : > { %v5481_v14 = vadd.f32 %v3388_v46, %v8159_v63  ;;  %v3390_v21 = vpop.f32.mrb[87].mxu1  ;;  %4347 = vmatmul.mubr.bf16.gmra.mrb[112].mxu0 %v3591_v0  ;;  %v3519_v34 = vmax.f32 %v5479_v20, 0.0 }
 0x34d   : > { %v5482_v61 = vadd.f32 %v3390_v21, %v8162_v16  ;;  %v3520_v4 = vmax.f32 %v5480_v19, 0.0 }
 0x34e   : > { %v3523_v45 = vmax.f32 %v5481_v14, 0.0 }
 0x34f   : > { %v3524_v26 = vmax.f32 %v5482_v61, 0.0 }
 0x350   : > { %v3595_v33 = vpack.c.bf16 %v3523_v45, %v3519_v34 }
 0x351   : > { %v3596_v38 = vpack.c.bf16 %v3524_v26, %v3520_v4  ;;  %v3394_v47 = vpop.f32.mrb[88].mxu1 }
 0x352   : > { %v5483_v53 = vadd.f32 %v3394_v47, %v8159_v63  ;;  %v3396_v41 = vpop.f32.mrb[89].mxu1 }
 0x353   : > { %v5484_v39 = vadd.f32 %v3396_v41, %v8162_v16  ;;  %v3398_v60 = vpop.f32.mrb[90].mxu1  ;;  %4356 = vmatprep.mubr.bf16.mxu0 %v3596_v38 }
 0x354   : > { %v5485_v27 = vadd.f32 %v3398_v60, %v8159_v63  ;;  %v3400_v54 = vpop.f32.mrb[91].mxu1  ;;  %4357 = vmatmul.mubr.bf16.gmra.mrb[116].mxu0 %v3595_v33  ;;  %v3527_v5 = vmax.f32 %v5483_v53, 0.0 }
 0x355   : > { %v5486_v32 = vadd.f32 %v3400_v54, %v8162_v16  ;;  %v3528_v29 = vmax.f32 %v5484_v39, 0.0 }
 0x356   : > { %v3531_v40 = vmax.f32 %v5485_v27, 0.0 }
 0x357   : > { %v3532_v3 = vmax.f32 %v5486_v32, 0.0 }
 0x358   : > { %v3599_v56 = vpack.c.bf16 %v3531_v40, %v3527_v5 }
 0x359   : > { %v3600_v17 = vpack.c.bf16 %v3532_v3, %v3528_v29  ;;  %v3404_v55 = vpop.f32.mrb[92].mxu1 }
 0x35a   : > { %v5487_v11 = vadd.f32 %v3404_v55, %v8159_v63  ;;  %v3406_v48 = vpop.f32.mrb[93].mxu1 }
 0x35b   : > { %v5488_v44 = vadd.f32 %v3406_v48, %v8162_v16  ;;  %v3408_v58 = vpop.f32.mrb[94].mxu1  ;;  %4366 = vmatprep.mubr.bf16.mxu0 %v3600_v17 }
 0x35c   : > { %v5489_v62 = vadd.f32 %v3408_v58, %v8159_v63  ;;  %v3410_v10 = vpop.f32.mrb[95].mxu1  ;;  %4367 = vmatmul.mubr.bf16.gmra.mrb[120].mxu0 %v3599_v56  ;;  %v3535_v22 = vmax.f32 %v5487_v11, 0.0  ;;  %v8276_v63 = vrot.slane %v3669_v8, %v826_v1 }
 0x35d   : > { %v5490_v52 = vadd.f32 %v3410_v10, %v8162_v16  ;;  %v3536_v23 = vmax.f32 %v5488_v44, 0.0 }
 0x35e   : > { %v3539_v43 = vmax.f32 %v5489_v62, 0.0 }
 0x35f   : > { %v3540_v35 = vmax.f32 %v5490_v52, 0.0 }
 0x360   : > { %v3603_v9 = vpack.c.bf16 %v3539_v43, %v3535_v22 }
 0x361   : > { %v3604_v30 = vpack.c.bf16 %v3540_v35, %v3536_v23 }
 0x363   : > { %4376 = vmatprep.mubr.bf16.mxu0 %v3604_v30 }
 0x364   : > { %4377 = vmatmul.mubr.bf16.gmra.mrb[124].mxu0 %v3603_v9 }
 0x3bf   : > { %v4228_v16 = vpop.f32.mrb[64].mxu0 }
 0x3c0   : > { %v5491_v28 = vadd.f32 %v4228_v16, %v8272_v13  ;;  %v4230_v50 = vpop.f32.mrb[65].mxu0 }
 0x3c1   : > { %v5492_v15 = vadd.f32 %v4230_v50, %v8276_v63  ;;  %v4232_v31 = vpop.f32.mrb[66].mxu0 }
 0x3c2   : > { %v5493_v59 = vadd.f32 %v4232_v31, %v8272_v13  ;;  %v4234_v42 = vpop.f32.mrb[67].mxu0  ;;  %v4387_v7 = vmax.f32 %v5491_v28, 0.0 }
 0x3c3   : > { %v5494_v57 = vadd.f32 %v4234_v42, %v8276_v63  ;;  %v4388_v37 = vmax.f32 %v5492_v15, 0.0 }
 0x3c4   : > { %v4389_v6 = vmax.f32 %v5493_v59, 0.0 }
 0x3c5   : > { %v4390_v51 = vmax.f32 %v5494_v57, 0.0 }
 0x3c6   : > { %v4451_v36 = vpack.c.bf16 %v4389_v6, %v4387_v7 }
 0x3c7   : > { %v4452_v18 = vpack.c.bf16 %v4390_v51, %v4388_v37  ;;  %v4238_v1 = vpop.f32.mrb[68].mxu0 }
 0x3c8   : > { %v5495_v49 = vadd.f32 %v4238_v1, %v8272_v13  ;;  %v4240_v25 = vpop.f32.mrb[69].mxu0 }
 0x3c9   : > { %v5496_v0 = vadd.f32 %v4240_v25, %v8276_v63  ;;  %v4242_v2 = vpop.f32.mrb[70].mxu0  ;;  %4650 = vmatprep.mubr.bf16.mxu1 %v4452_v18 }
 0x3ca   : > { %v5497_v24 = vadd.f32 %v4242_v2, %v8272_v13  ;;  %v4244_v20 = vpop.f32.mrb[71].mxu0  ;;  %4651 = vmatmul.mubr.bf16.vlgmr.msra.gmra.mrb[96].mxu1 %v4451_v36  ;;  %v4391_v19 = vmax.f32 %v5495_v49, 0.0 }
 0x3cb   : > { %v5498_v12 = vadd.f32 %v4244_v20, %v8276_v63  ;;  %v4392_v14 = vmax.f32 %v5496_v0, 0.0 }
 0x3cc   : > { %v4393_v46 = vmax.f32 %v5497_v24, 0.0 }
 0x3cd   : > { %v4394_v21 = vmax.f32 %v5498_v12, 0.0 }
 0x3ce   : > { %v4453_v61 = vpack.c.bf16 %v4393_v46, %v4391_v19 }
 0x3cf   : > { %v4454_v34 = vpack.c.bf16 %v4394_v21, %v4392_v14  ;;  %v4248_v45 = vpop.f32.mrb[72].mxu0 }
 0x3d0   : > { %v5499_v4 = vadd.f32 %v4248_v45, %v8272_v13  ;;  %v4250_v26 = vpop.f32.mrb[73].mxu0 }
 0x3d1   : > { %v5500_v33 = vadd.f32 %v4250_v26, %v8276_v63  ;;  %v4252_v38 = vpop.f32.mrb[74].mxu0  ;;  %4658 = vmatprep.mubr.bf16.mxu1 %v4454_v34 }
 0x3d2   : > { %v5501_v47 = vadd.f32 %v4252_v38, %v8272_v13  ;;  %v4254_v53 = vpop.f32.mrb[75].mxu0  ;;  %4659 = vmatmul.mubr.bf16.gmra.mrb[100].mxu1 %v4453_v61  ;;  %v4395_v39 = vmax.f32 %v5499_v4, 0.0 }
 0x3d3   : > { %v5502_v41 = vadd.f32 %v4254_v53, %v8276_v63  ;;  %v4396_v27 = vmax.f32 %v5500_v33, 0.0 }
 0x3d4   : > { %v4397_v60 = vmax.f32 %v5501_v47, 0.0 }
 0x3d5   : > { %v4398_v54 = vmax.f32 %v5502_v41, 0.0 }
 0x3d6   : > { %v4455_v32 = vpack.c.bf16 %v4397_v60, %v4395_v39 }
 0x3d7   : > { %v4456_v5 = vpack.c.bf16 %v4398_v54, %v4396_v27  ;;  %v4258_v40 = vpop.f32.mrb[76].mxu0 }
 0x3d8   : > { %v5503_v29 = vadd.f32 %v4258_v40, %v8272_v13  ;;  %v4260_v3 = vpop.f32.mrb[77].mxu0 }
 0x3d9   : > { %v5504_v56 = vadd.f32 %v4260_v3, %v8276_v63  ;;  %v4262_v17 = vpop.f32.mrb[78].mxu0  ;;  %4666 = vmatprep.mubr.bf16.mxu1 %v4456_v5 }
 0x3da   : > { %v5505_v55 = vadd.f32 %v4262_v17, %v8272_v13  ;;  %v4264_v11 = vpop.f32.mrb[79].mxu0  ;;  %4667 = vmatmul.mubr.bf16.gmra.mrb[104].mxu1 %v4455_v32  ;;  %v4399_v44 = vmax.f32 %v5503_v29, 0.0 }
 0x3db   : > { %v5506_v48 = vadd.f32 %v4264_v11, %v8276_v63  ;;  %v4400_v62 = vmax.f32 %v5504_v56, 0.0 }
 0x3dc   : > { %v4401_v58 = vmax.f32 %v5505_v55, 0.0 }
 0x3dd   : > { %v4402_v10 = vmax.f32 %v5506_v48, 0.0 }
 0x3de   : > { %v4457_v52 = vpack.c.bf16 %v4401_v58, %v4399_v44 }
 0x3df   : > { %v4458_v22 = vpack.c.bf16 %v4402_v10, %v4400_v62  ;;  %v4268_v43 = vpop.f32.mrb[80].mxu0 }
 0x3e0   : > { %v5507_v23 = vadd.f32 %v4268_v43, %v8272_v13  ;;  %v4270_v35 = vpop.f32.mrb[81].mxu0 }
 0x3e1   : > { %v5508_v9 = vadd.f32 %v4270_v35, %v8276_v63  ;;  %v4272_v30 = vpop.f32.mrb[82].mxu0  ;;  %4674 = vmatprep.mubr.bf16.mxu1 %v4458_v22 }
 0x3e2   : > { %v5509_v8 = vadd.f32 %v4272_v30, %v8272_v13  ;;  %v4274_v16 = vpop.f32.mrb[83].mxu0  ;;  %4675 = vmatmul.mubr.bf16.gmra.mrb[108].mxu1 %v4457_v52  ;;  %v4403_v50 = vmax.f32 %v5507_v23, 0.0 }
 0x3e3   : > { %v5510_v28 = vadd.f32 %v4274_v16, %v8276_v63  ;;  %v4404_v31 = vmax.f32 %v5508_v9, 0.0 }
 0x3e4   : > { %v4405_v15 = vmax.f32 %v5509_v8, 0.0 }
 0x3e5   : > { %v4406_v59 = vmax.f32 %v5510_v28, 0.0 }
 0x3e6   : > { %v4459_v42 = vpack.c.bf16 %v4405_v15, %v4403_v50 }
 0x3e7   : > { %v4460_v57 = vpack.c.bf16 %v4406_v59, %v4404_v31  ;;  %v4278_v7 = vpop.f32.mrb[84].mxu0 }
 0x3e8   : > { %v5511_v6 = vadd.f32 %v4278_v7, %v8272_v13  ;;  %v4280_v37 = vpop.f32.mrb[85].mxu0 }
 0x3e9   : > { %v5512_v51 = vadd.f32 %v4280_v37, %v8276_v63  ;;  %v4282_v36 = vpop.f32.mrb[86].mxu0  ;;  %4682 = vmatprep.mubr.bf16.mxu1 %v4460_v57 }
 0x3ea   : > { %v5513_v18 = vadd.f32 %v4282_v36, %v8272_v13  ;;  %v4284_v1 = vpop.f32.mrb[87].mxu0  ;;  %4683 = vmatmul.mubr.bf16.gmra.mrb[112].mxu1 %v4459_v42  ;;  %v4407_v25 = vmax.f32 %v5511_v6, 0.0 }
 0x3eb   : > { %v5514_v49 = vadd.f32 %v4284_v1, %v8276_v63  ;;  %v4408_v2 = vmax.f32 %v5512_v51, 0.0 }
 0x3ec   : > { %v4409_v0 = vmax.f32 %v5513_v18, 0.0 }
 0x3ed   : > { %v4410_v24 = vmax.f32 %v5514_v49, 0.0 }
 0x3ee   : > { %v4461_v20 = vpack.c.bf16 %v4409_v0, %v4407_v25 }
 0x3ef   : > { %v4462_v12 = vpack.c.bf16 %v4410_v24, %v4408_v2  ;;  %v4288_v19 = vpop.f32.mrb[88].mxu0 }
 0x3f0   : > { %v5515_v46 = vadd.f32 %v4288_v19, %v8272_v13  ;;  %v4290_v14 = vpop.f32.mrb[89].mxu0 }
 0x3f1   : > { %v5516_v21 = vadd.f32 %v4290_v14, %v8276_v63  ;;  %v4292_v61 = vpop.f32.mrb[90].mxu0  ;;  %4690 = vmatprep.mubr.bf16.mxu1 %v4462_v12 }
 0x3f2   : > { %v5517_v34 = vadd.f32 %v4292_v61, %v8272_v13  ;;  %v4294_v45 = vpop.f32.mrb[91].mxu0  ;;  %4691 = vmatmul.mubr.bf16.gmra.mrb[116].mxu1 %v4461_v20  ;;  %v4411_v26 = vmax.f32 %v5515_v46, 0.0 }
 0x3f3   : > { %v5518_v4 = vadd.f32 %v4294_v45, %v8276_v63  ;;  %v4412_v38 = vmax.f32 %v5516_v21, 0.0 }
 0x3f4   : > { %v4413_v33 = vmax.f32 %v5517_v34, 0.0 }
 0x3f5   : > { %v4414_v47 = vmax.f32 %v5518_v4, 0.0 }
 0x3f6   : > { %v4463_v53 = vpack.c.bf16 %v4413_v33, %v4411_v26 }
 0x3f7   : > { %v4464_v41 = vpack.c.bf16 %v4414_v47, %v4412_v38  ;;  %v4298_v39 = vpop.f32.mrb[92].mxu0 }
 0x3f8   : > { %v5519_v60 = vadd.f32 %v4298_v39, %v8272_v13  ;;  %v4300_v27 = vpop.f32.mrb[93].mxu0 }
 0x3f9   : > { %v5520_v54 = vadd.f32 %v4300_v27, %v8276_v63  ;;  %v4302_v32 = vpop.f32.mrb[94].mxu0  ;;  %4698 = vmatprep.mubr.bf16.mxu1 %v4464_v41 }
 0x3fa   : > { %v5521_v5 = vadd.f32 %v4302_v32, %v8272_v13  ;;  %v4304_v40 = vpop.f32.mrb[95].mxu0  ;;  %4699 = vmatmul.mubr.bf16.gmra.mrb[120].mxu1 %v4463_v53  ;;  %v4415_v3 = vmax.f32 %v5519_v60, 0.0 }
 0x3fb   : > { %v5522_v29 = vadd.f32 %v4304_v40, %v8276_v63  ;;  %v4416_v17 = vmax.f32 %v5520_v54, 0.0 }
 0x3fc   : > { %v4417_v56 = vmax.f32 %v5521_v5, 0.0 }
 0x3fd   : > { %v4418_v55 = vmax.f32 %v5522_v29, 0.0 }
 0x3fe   : > { %v4465_v11 = vpack.c.bf16 %v4417_v56, %v4415_v3 }
 0x3ff   : > { %v4466_v48 = vpack.c.bf16 %v4418_v55, %v4416_v17  ;;  %v4308_v44 = vpop.f32.mrb[96].mxu0 }
 0x400   : > { %v5523_v58 = vadd.f32 %v4308_v44, %v8272_v13  ;;  %v4310_v62 = vpop.f32.mrb[97].mxu0 }
 0x401   : > { %v5524_v10 = vadd.f32 %v4310_v62, %v8276_v63  ;;  %v4312_v52 = vpop.f32.mrb[98].mxu0  ;;  %4706 = vmatprep.mubr.bf16.mxu1 %v4466_v48 }
 0x402   : > { %v5525_v22 = vadd.f32 %v4312_v52, %v8272_v13  ;;  %v4314_v43 = vpop.f32.mrb[99].mxu0  ;;  %4707 = vmatmul.mubr.bf16.gmra.mrb[124].mxu1 %v4465_v11  ;;  %v4419_v35 = vmax.f32 %v5523_v58, 0.0 }
 0x403   : > { %v5526_v23 = vadd.f32 %v4314_v43, %v8276_v63  ;;  %v4420_v30 = vmax.f32 %v5524_v10, 0.0 }
 0x404   : > { %v4421_v9 = vmax.f32 %v5525_v22, 0.0 }
 0x405   : > { %v4422_v8 = vmax.f32 %v5526_v23, 0.0 }
 0x406   : > { %v4467_v16 = vpack.c.bf16 %v4421_v9, %v4419_v35 }
 0x407   : > { %v4468_v28 = vpack.c.bf16 %v4422_v8, %v4420_v30  ;;  %v4318_v50 = vpop.f32.mrb[100].mxu0 }
 0x408   : > { %v5527_v15 = vadd.f32 %v4318_v50, %v8272_v13  ;;  %v4320_v31 = vpop.f32.mrb[101].mxu0 }
 0x409   : > { %v5528_v59 = vadd.f32 %v4320_v31, %v8276_v63  ;;  %v4322_v42 = vpop.f32.mrb[102].mxu0  ;;  %4714 = vmatprep.mubr.bf16.mxu1 %v4468_v28 }
 0x40a   : > { %v5529_v57 = vadd.f32 %v4322_v42, %v8272_v13  ;;  %v4324_v7 = vpop.f32.mrb[103].mxu0  ;;  %4715 = vmatmul.mubr.bf16.gmra.mrb[128].mxu1 %v4467_v16  ;;  %v4423_v37 = vmax.f32 %v5527_v15, 0.0 }
 0x40b   : > { %v5530_v6 = vadd.f32 %v4324_v7, %v8276_v63  ;;  %v4424_v36 = vmax.f32 %v5528_v59, 0.0 }
 0x40c   : > { %v4425_v51 = vmax.f32 %v5529_v57, 0.0 }
 0x40d   : > { %v4426_v18 = vmax.f32 %v5530_v6, 0.0 }
 0x40e   : > { %v4469_v1 = vpack.c.bf16 %v4425_v51, %v4423_v37 }
 0x40f   : > { %v4470_v49 = vpack.c.bf16 %v4426_v18, %v4424_v36  ;;  %v4328_v25 = vpop.f32.mrb[104].mxu0 }
 0x410   : > { %v5531_v0 = vadd.f32 %v4328_v25, %v8272_v13  ;;  %v4330_v2 = vpop.f32.mrb[105].mxu0 }
 0x411   : > { %v5532_v24 = vadd.f32 %v4330_v2, %v8276_v63  ;;  %v4332_v20 = vpop.f32.mrb[106].mxu0  ;;  %4722 = vmatprep.mubr.bf16.mxu1 %v4470_v49 }
 0x412   : > { %v5533_v12 = vadd.f32 %v4332_v20, %v8272_v13  ;;  %v4334_v19 = vpop.f32.mrb[107].mxu0  ;;  %4723 = vmatmul.mubr.bf16.gmra.mrb[132].mxu1 %v4469_v1  ;;  %v4427_v14 = vmax.f32 %v5531_v0, 0.0 }
 0x413   : > { %v5534_v46 = vadd.f32 %v4334_v19, %v8276_v63  ;;  %v4428_v61 = vmax.f32 %v5532_v24, 0.0 }
 0x414   : > { %v4429_v21 = vmax.f32 %v5533_v12, 0.0 }
 0x415   : > { %v4430_v34 = vmax.f32 %v5534_v46, 0.0 }
 0x416   : > { %v4471_v45 = vpack.c.bf16 %v4429_v21, %v4427_v14 }
 0x417   : > { %v4472_v4 = vpack.c.bf16 %v4430_v34, %v4428_v61  ;;  %v4338_v26 = vpop.f32.mrb[108].mxu0 }
 0x418   : > { %v5535_v33 = vadd.f32 %v4338_v26, %v8272_v13  ;;  %v4340_v38 = vpop.f32.mrb[109].mxu0 }
 0x419   : > { %v5536_v47 = vadd.f32 %v4340_v38, %v8276_v63  ;;  %v4342_v53 = vpop.f32.mrb[110].mxu0  ;;  %4730 = vmatprep.mubr.bf16.mxu1 %v4472_v4 }
 0x41a   : > { %v5537_v41 = vadd.f32 %v4342_v53, %v8272_v13  ;;  %v4344_v39 = vpop.f32.mrb[111].mxu0  ;;  %4731 = vmatmul.mubr.bf16.gmra.mrb[136].mxu1 %v4471_v45  ;;  %v4431_v27 = vmax.f32 %v5535_v33, 0.0 }
 0x41b   : > { %v5538_v60 = vadd.f32 %v4344_v39, %v8276_v63  ;;  %v4432_v32 = vmax.f32 %v5536_v47, 0.0 }
 0x41c   : > { %v4433_v54 = vmax.f32 %v5537_v41, 0.0 }
 0x41d   : > { %v4434_v5 = vmax.f32 %v5538_v60, 0.0 }
 0x41e   : > { %v4473_v40 = vpack.c.bf16 %v4433_v54, %v4431_v27  ;;  %v8346_v54 = vld [vmem:[%s8426_s6] ss:$0 sm:$0xff] }
 0x41f   : > { %v4474_v29 = vpack.c.bf16 %v4434_v5, %v4432_v32  ;;  %v4348_v3 = vpop.f32.mrb[112].mxu0 }
 0x420   : > { %v5539_v56 = vadd.f32 %v4348_v3, %v8272_v13  ;;  %v4350_v17 = vpop.f32.mrb[113].mxu0 }
 0x421   : > { %v5540_v55 = vadd.f32 %v4350_v17, %v8276_v63  ;;  %v4352_v11 = vpop.f32.mrb[114].mxu0  ;;  %4738 = vmatprep.mubr.bf16.mxu1 %v4474_v29 }
 0x422   : > { %v5541_v48 = vadd.f32 %v4352_v11, %v8272_v13  ;;  %v4354_v44 = vpop.f32.mrb[115].mxu0  ;;  %4739 = vmatmul.mubr.bf16.gmra.mrb[140].mxu1 %v4473_v40  ;;  %v4435_v62 = vmax.f32 %v5539_v56, 0.0 }
 0x423   : > { %v5542_v58 = vadd.f32 %v4354_v44, %v8276_v63  ;;  %v4436_v52 = vmax.f32 %v5540_v55, 0.0 }
 0x424   : > { %v4437_v10 = vmax.f32 %v5541_v48, 0.0 }
 0x425   : > { %v4438_v22 = vmax.f32 %v5542_v58, 0.0 }
 0x426   : > { %v4475_v43 = vpack.c.bf16 %v4437_v10, %v4435_v62 }
 0x427   : > { %v4476_v23 = vpack.c.bf16 %v4438_v22, %v4436_v52  ;;  %v4358_v35 = vpop.f32.mrb[116].mxu0 }
 0x428   : > { %v5543_v9 = vadd.f32 %v4358_v35, %v8272_v13  ;;  %v4360_v30 = vpop.f32.mrb[117].mxu0 }
 0x429   : > { %v5544_v8 = vadd.f32 %v4360_v30, %v8276_v63  ;;  %v4362_v16 = vpop.f32.mrb[118].mxu0  ;;  %4746 = vmatprep.mubr.bf16.mxu1 %v4476_v23 }
 0x42a   : > { %v5545_v28 = vadd.f32 %v4362_v16, %v8272_v13  ;;  %v4364_v50 = vpop.f32.mrb[119].mxu0  ;;  %4747 = vmatmul.mubr.bf16.gmra.mrb[144].mxu1 %v4475_v43  ;;  %v4439_v31 = vmax.f32 %v5543_v9, 0.0 }
 0x42b   : > { %v5546_v15 = vadd.f32 %v4364_v50, %v8276_v63  ;;  %v4440_v42 = vmax.f32 %v5544_v8, 0.0 }
 0x42c   : > { %v4441_v59 = vmax.f32 %v5545_v28, 0.0 }
 0x42d   : > { %v4442_v57 = vmax.f32 %v5546_v15, 0.0 }
 0x42e   : > { %v4477_v7 = vpack.c.bf16 %v4441_v59, %v4439_v31 }
 0x42f   : > { %v4478_v6 = vpack.c.bf16 %v4442_v57, %v4440_v42  ;;  %v4368_v37 = vpop.f32.mrb[120].mxu0 }
 0x430   : > { %v5547_v51 = vadd.f32 %v4368_v37, %v8272_v13  ;;  %v4370_v36 = vpop.f32.mrb[121].mxu0 }
 0x431   : > { %v5548_v18 = vadd.f32 %v4370_v36, %v8276_v63  ;;  %v4372_v1 = vpop.f32.mrb[122].mxu0  ;;  %4754 = vmatprep.mubr.bf16.mxu1 %v4478_v6 }
 0x432   : > { %v5549_v49 = vadd.f32 %v4372_v1, %v8272_v13  ;;  %v4374_v25 = vpop.f32.mrb[123].mxu0  ;;  %4755 = vmatmul.mubr.bf16.gmra.mrb[148].mxu1 %v4477_v7  ;;  %v4443_v2 = vmax.f32 %v5547_v51, 0.0 }
 0x433   : > { %v5550_v0 = vadd.f32 %v4374_v25, %v8276_v63  ;;  %v4444_v20 = vmax.f32 %v5548_v18, 0.0 }
 0x434   : > { %v4445_v24 = vmax.f32 %v5549_v49, 0.0 }
 0x435   : > { %v4446_v12 = vmax.f32 %v5550_v0, 0.0 }
 0x436   : > { %v4479_v19 = vpack.c.bf16 %v4445_v24, %v4443_v2 }
 0x437   : > { %v4480_v46 = vpack.c.bf16 %v4446_v12, %v4444_v20  ;;  %v4378_v14 = vpop.f32.mrb[124].mxu0 }
 0x438   : > { %v5551_v21 = vadd.f32 %v4378_v14, %v8272_v13  ;;  %v4380_v61 = vpop.f32.mrb[125].mxu0 }
 0x439   : > { %v5552_v34 = vadd.f32 %v4380_v61, %v8276_v63  ;;  %v4382_v45 = vpop.f32.mrb[126].mxu0  ;;  %4762 = vmatprep.mubr.bf16.mxu1 %v4480_v46 }
 0x43a   : > { %v5553_v4 = vadd.f32 %v4382_v45, %v8272_v13  ;;  %v4384_v26 = vpop.f32.mrb[127].mxu0  ;;  %4763 = vmatmul.mubr.bf16.gmra.mrb[152].mxu1 %v4479_v19  ;;  %v4447_v38 = vmax.f32 %v5551_v21, 0.0 }
 0x43b   : > { %v5554_v33 = vadd.f32 %v4384_v26, %v8276_v63  ;;  %v4448_v53 = vmax.f32 %v5552_v34, 0.0 }
 0x43c   : > { %v4449_v47 = vmax.f32 %v5553_v4, 0.0 }
 0x43d   : > { %v4450_v41 = vmax.f32 %v5554_v33, 0.0 }
 0x43e   : > { %v4481_v39 = vpack.c.bf16 %v4449_v47, %v4447_v38 }
 0x43f   : > { %v4482_v60 = vpack.c.bf16 %v4450_v41, %v4448_v53 }
 0x441   : > { %4770 = vmatprep.mubr.bf16.mxu1 %v4482_v60 }
 0x442   : > { %4771 = vmatmul.mubr.bf16.gmra.mrb[156].mxu1 %v4481_v39 }
 0x49d   : > { %v5203_v27 = vpop.f32.mrb[96].mxu1 }
 0x49e   : > { %v5204_v13 = vpop.f32.mrb[97].mxu1 }
 0x49f   : > { %v5205_v32 = vadd.f32 %v5204_v13, %v5203_v27  ;;  %v5206_v5 = vpop.f32.mrb[98].mxu1 }
 0x4a0   : > { %v5207_v63 = vpop.f32.mrb[99].mxu1 }
 0x4a1   : > { %v4653_v40 = vadd.f32 %v5205_v32, %v8346_v54  ;;  %v5208_v29 = vadd.f32 %v5207_v63, %v5206_v5 }
 0x4a3   : > { %4779 = vst [vmem:[%s8351_s23] sm:$0xff] %v4653_v40  ;;  %v4656_v3 = vadd.f32 %v5208_v29, %v8346_v54 }
 0x4a5   : > { %4780 = vst [vmem:[%s8351_s23 + $0x8] sm:$0xff] %v4656_v3  ;;  %v5209_v56 = vpop.f32.mrb[100].mxu1 }
 0x4a6   : > { %v5210_v17 = vpop.f32.mrb[101].mxu1 }
 0x4a7   : > { %v5211_v55 = vadd.f32 %v5210_v17, %v5209_v56  ;;  %v5212_v11 = vpop.f32.mrb[102].mxu1 }
 0x4a8   : > { %v5213_v48 = vpop.f32.mrb[103].mxu1 }
 0x4a9   : > { %v4661_v44 = vadd.f32 %v5211_v55, %v8346_v54  ;;  %v5214_v58 = vadd.f32 %v5213_v48, %v5212_v11 }
 0x4ab   : > { %4781 = vst [vmem:[%s8351_s23 + $0x10] sm:$0xff] %v4661_v44  ;;  %v4664_v62 = vadd.f32 %v5214_v58, %v8346_v54 }
 0x4ad   : > { %4782 = vst [vmem:[%s8351_s23 + $0x18] sm:$0xff] %v4664_v62  ;;  %v5215_v10 = vpop.f32.mrb[104].mxu1 }
 0x4ae   : > { %v5216_v52 = vpop.f32.mrb[105].mxu1 }
 0x4af   : > { %v5217_v22 = vadd.f32 %v5216_v52, %v5215_v10  ;;  %v5218_v43 = vpop.f32.mrb[106].mxu1 }
 0x4b0   : > { %v5219_v23 = vpop.f32.mrb[107].mxu1 }
 0x4b1   : > { %v4669_v35 = vadd.f32 %v5217_v22, %v8346_v54  ;;  %v5220_v9 = vadd.f32 %v5219_v23, %v5218_v43 }
 0x4b3   : > { %4783 = vst [vmem:[%s8351_s23 + $0x20] sm:$0xff] %v4669_v35  ;;  %v4672_v30 = vadd.f32 %v5220_v9, %v8346_v54 }
 0x4b5   : > { %4784 = vst [vmem:[%s8351_s23 + $0x28] sm:$0xff] %v4672_v30  ;;  %v5221_v8 = vpop.f32.mrb[108].mxu1 }
 0x4b6   : > { %v5222_v16 = vpop.f32.mrb[109].mxu1 }
 0x4b7   : > { %v5223_v28 = vadd.f32 %v5222_v16, %v5221_v8  ;;  %v5224_v50 = vpop.f32.mrb[110].mxu1 }
 0x4b8   : > { %v5225_v15 = vpop.f32.mrb[111].mxu1 }
 0x4b9   : > { %v4677_v31 = vadd.f32 %v5223_v28, %v8346_v54  ;;  %v5226_v59 = vadd.f32 %v5225_v15, %v5224_v50 }
 0x4bb   : > { %4785 = vst [vmem:[%s8351_s23 + $0x30] sm:$0xff] %v4677_v31  ;;  %v4680_v42 = vadd.f32 %v5226_v59, %v8346_v54 }
 0x4bd   : > { %4786 = vst [vmem:[%s8351_s23 + $0x38] sm:$0xff] %v4680_v42  ;;  %v5227_v57 = vpop.f32.mrb[112].mxu1 }
 0x4be   : > { %v5228_v7 = vpop.f32.mrb[113].mxu1 }
 0x4bf   : > { %v5229_v6 = vadd.f32 %v5228_v7, %v5227_v57  ;;  %v5230_v37 = vpop.f32.mrb[114].mxu1 }
 0x4c0   : > { %v5231_v51 = vpop.f32.mrb[115].mxu1 }
 0x4c1   : > { %v4685_v36 = vadd.f32 %v5229_v6, %v8346_v54  ;;  %v5232_v18 = vadd.f32 %v5231_v51, %v5230_v37 }
 0x4c3   : > { %4787 = vst [vmem:[%s8351_s23 + $0x40] sm:$0xff] %v4685_v36  ;;  %v4688_v1 = vadd.f32 %v5232_v18, %v8346_v54 }
 0x4c5   : > { %4788 = vst [vmem:[%s8351_s23 + $0x48] sm:$0xff] %v4688_v1  ;;  %v5233_v49 = vpop.f32.mrb[116].mxu1 }
 0x4c6   : > { %v5234_v25 = vpop.f32.mrb[117].mxu1 }
 0x4c7   : > { %v5235_v0 = vadd.f32 %v5234_v25, %v5233_v49  ;;  %v5236_v2 = vpop.f32.mrb[118].mxu1 }
 0x4c8   : > { %v5237_v24 = vpop.f32.mrb[119].mxu1 }
 0x4c9   : > { %v4693_v20 = vadd.f32 %v5235_v0, %v8346_v54  ;;  %v5238_v12 = vadd.f32 %v5237_v24, %v5236_v2 }
 0x4cb   : > { %4789 = vst [vmem:[%s8351_s23 + $0x50] sm:$0xff] %v4693_v20  ;;  %v4696_v19 = vadd.f32 %v5238_v12, %v8346_v54 }
 0x4cd   : > { %4790 = vst [vmem:[%s8351_s23 + $0x58] sm:$0xff] %v4696_v19  ;;  %v5239_v46 = vpop.f32.mrb[120].mxu1 }
 0x4ce   : > { %v5240_v14 = vpop.f32.mrb[121].mxu1 }
 0x4cf   : > { %v5241_v21 = vadd.f32 %v5240_v14, %v5239_v46  ;;  %v5242_v61 = vpop.f32.mrb[122].mxu1 }
 0x4d0   : > { %v5243_v34 = vpop.f32.mrb[123].mxu1 }
 0x4d1   : > { %v4701_v45 = vadd.f32 %v5241_v21, %v8346_v54  ;;  %v5244_v4 = vadd.f32 %v5243_v34, %v5242_v61 }
 0x4d3   : > { %4791 = vst [vmem:[%s8351_s23 + $0x60] sm:$0xff] %v4701_v45  ;;  %v4704_v26 = vadd.f32 %v5244_v4, %v8346_v54 }
 0x4d5   : > { %4792 = vst [vmem:[%s8351_s23 + $0x68] sm:$0xff] %v4704_v26  ;;  %v5245_v33 = vpop.f32.mrb[124].mxu1 }
 0x4d6   : > { %v5246_v38 = vpop.f32.mrb[125].mxu1 }
 0x4d7   : > { %v5247_v47 = vadd.f32 %v5246_v38, %v5245_v33  ;;  %v5248_v53 = vpop.f32.mrb[126].mxu1 }
 0x4d8   : > { %v5249_v41 = vpop.f32.mrb[127].mxu1 }
 0x4d9   : > { %v4709_v39 = vadd.f32 %v5247_v47, %v8346_v54  ;;  %v5250_v60 = vadd.f32 %v5249_v41, %v5248_v53 }
 0x4db   : > { %4793 = vst [vmem:[%s8351_s23 + $0x70] sm:$0xff] %v4709_v39  ;;  %v4712_v27 = vadd.f32 %v5250_v60, %v8346_v54 }
 0x4dd   : > { %4794 = vst [vmem:[%s8351_s23 + $0x78] sm:$0xff] %v4712_v27  ;;  %v5251_v13 = vpop.f32.mrb[128].mxu1 }
 0x4de   : > { %v5252_v32 = vpop.f32.mrb[129].mxu1 }
 0x4df   : > { %v5253_v5 = vadd.f32 %v5252_v32, %v5251_v13  ;;  %v5254_v63 = vpop.f32.mrb[130].mxu1 }
 0x4e0   : > { %v5255_v40 = vpop.f32.mrb[131].mxu1 }
 0x4e1   : > { %v4717_v29 = vadd.f32 %v5253_v5, %v8346_v54  ;;  %v5256_v3 = vadd.f32 %v5255_v40, %v5254_v63 }
 0x4e3   : > { %4795 = vst [vmem:[%s8351_s23 + $0x80] sm:$0xff] %v4717_v29  ;;  %v4720_v56 = vadd.f32 %v5256_v3, %v8346_v54 }
 0x4e5   : > { %4796 = vst [vmem:[%s8351_s23 + $0x88] sm:$0xff] %v4720_v56  ;;  %v5257_v17 = vpop.f32.mrb[132].mxu1 }
 0x4e6   : > { %v5258_v55 = vpop.f32.mrb[133].mxu1 }
 0x4e7   : > { %v5259_v11 = vadd.f32 %v5258_v55, %v5257_v17  ;;  %v5260_v48 = vpop.f32.mrb[134].mxu1 }
 0x4e8   : > { %v5261_v44 = vpop.f32.mrb[135].mxu1 }
 0x4e9   : > { %v4725_v58 = vadd.f32 %v5259_v11, %v8346_v54  ;;  %v5262_v62 = vadd.f32 %v5261_v44, %v5260_v48 }
 0x4eb   : > { %4797 = vst [vmem:[%s8351_s23 + $0x90] sm:$0xff] %v4725_v58  ;;  %v4728_v10 = vadd.f32 %v5262_v62, %v8346_v54 }
 0x4ed   : > { %4798 = vst [vmem:[%s8351_s23 + $0x98] sm:$0xff] %v4728_v10  ;;  %v5263_v52 = vpop.f32.mrb[136].mxu1 }
 0x4ee   : > { %v5264_v22 = vpop.f32.mrb[137].mxu1 }
 0x4ef   : > { %v5265_v43 = vadd.f32 %v5264_v22, %v5263_v52  ;;  %v5266_v23 = vpop.f32.mrb[138].mxu1 }
 0x4f0   : > { %v5267_v35 = vpop.f32.mrb[139].mxu1 }
 0x4f1   : > { %v4733_v9 = vadd.f32 %v5265_v43, %v8346_v54  ;;  %v5268_v30 = vadd.f32 %v5267_v35, %v5266_v23 }
 0x4f3   : > { %4799 = vst [vmem:[%s8351_s23 + $0xa0] sm:$0xff] %v4733_v9  ;;  %v4736_v8 = vadd.f32 %v5268_v30, %v8346_v54 }
 0x4f5   : > { %4800 = vst [vmem:[%s8351_s23 + $0xa8] sm:$0xff] %v4736_v8  ;;  %v5269_v16 = vpop.f32.mrb[140].mxu1 }
 0x4f6   : > { %v5270_v28 = vpop.f32.mrb[141].mxu1 }
 0x4f7   : > { %v5271_v50 = vadd.f32 %v5270_v28, %v5269_v16  ;;  %v5272_v15 = vpop.f32.mrb[142].mxu1 }
 0x4f8   : > { %v5273_v31 = vpop.f32.mrb[143].mxu1 }
 0x4f9   : > { %v4741_v59 = vadd.f32 %v5271_v50, %v8346_v54  ;;  %v5274_v42 = vadd.f32 %v5273_v31, %v5272_v15 }
 0x4fb   : > { %4801 = vst [vmem:[%s8351_s23 + $0xb0] sm:$0xff] %v4741_v59  ;;  %v4744_v57 = vadd.f32 %v5274_v42, %v8346_v54 }
 0x4fd   : > { %4802 = vst [vmem:[%s8351_s23 + $0xb8] sm:$0xff] %v4744_v57  ;;  %v5275_v7 = vpop.f32.mrb[144].mxu1 }
 0x4fe   : > { %v5276_v6 = vpop.f32.mrb[145].mxu1 }
 0x4ff   : > { %v5277_v37 = vadd.f32 %v5276_v6, %v5275_v7  ;;  %v5278_v51 = vpop.f32.mrb[146].mxu1 }
 0x500   : > { %v5279_v36 = vpop.f32.mrb[147].mxu1 }
 0x501   : > { %v4749_v18 = vadd.f32 %v5277_v37, %v8346_v54  ;;  %v5280_v1 = vadd.f32 %v5279_v36, %v5278_v51 }
 0x503   : > { %4803 = vst [vmem:[%s8351_s23 + $0xc0] sm:$0xff] %v4749_v18  ;;  %v4752_v49 = vadd.f32 %v5280_v1, %v8346_v54 }
 0x505   : > { %4804 = vst [vmem:[%s8351_s23 + $0xc8] sm:$0xff] %v4752_v49  ;;  %v5281_v25 = vpop.f32.mrb[148].mxu1 }
 0x506   : > { %v5282_v0 = vpop.f32.mrb[149].mxu1 }
 0x507   : > { %v5283_v2 = vadd.f32 %v5282_v0, %v5281_v25  ;;  %v5284_v24 = vpop.f32.mrb[150].mxu1 }
 0x508   : > { %v5285_v20 = vpop.f32.mrb[151].mxu1 }
 0x509   : > { %v4757_v12 = vadd.f32 %v5283_v2, %v8346_v54  ;;  %v5286_v19 = vadd.f32 %v5285_v20, %v5284_v24 }
 0x50b   : > { %4805 = vst [vmem:[%s8351_s23 + $0xd0] sm:$0xff] %v4757_v12  ;;  %v4760_v46 = vadd.f32 %v5286_v19, %v8346_v54 }
 0x50d   : > { %4806 = vst [vmem:[%s8351_s23 + $0xd8] sm:$0xff] %v4760_v46  ;;  %v5287_v14 = vpop.f32.mrb[152].mxu1 }
 0x50e   : > { %v5288_v21 = vpop.f32.mrb[153].mxu1 }
 0x50f   : > { %v5289_v61 = vadd.f32 %v5288_v21, %v5287_v14  ;;  %v5290_v34 = vpop.f32.mrb[154].mxu1 }
 0x510   : > { %v5291_v45 = vpop.f32.mrb[155].mxu1 }
 0x511   : > { %v4765_v4 = vadd.f32 %v5289_v61, %v8346_v54  ;;  %v5292_v26 = vadd.f32 %v5291_v45, %v5290_v34 }
 0x513   : > { %4807 = vst [vmem:[%s8351_s23 + $0xe0] sm:$0xff] %v4765_v4  ;;  %v4768_v33 = vadd.f32 %v5292_v26, %v8346_v54 }
 0x515   : > { %4808 = vst [vmem:[%s8351_s23 + $0xe8] sm:$0xff] %v4768_v33  ;;  %v5293_v38 = vpop.f32.mrb[156].mxu1 }
 0x516   : > { %v5294_v47 = vpop.f32.mrb[157].mxu1 }
 0x517   : > { %v5295_v53 = vadd.f32 %v5294_v47, %v5293_v38  ;;  %v5296_v41 = vpop.f32.mrb[158].mxu1 }
 0x518   : > { %v5297_v39 = vpop.f32.mrb[159].mxu1 }
 0x519   : > { %v4773_v60 = vadd.f32 %v5295_v53, %v8346_v54  ;;  %v5298_v27 = vadd.f32 %v5297_v39, %v5296_v41 }
 0x51b   : > { %4809 = vst [vmem:[%s8351_s23 + $0xf0] sm:$0xff] %v4773_v60  ;;  %v4776_v13 = vadd.f32 %v5298_v27, %v8346_v54 }
 0x51d   : > { %4810 = vst [vmem:[%s8351_s23 + $0xf8] sm:$0xff] %v4776_v13 }
 0x51e PF: > { %s17_s24 = sadd.s32 1, %s6393_s24  }
 0x51f   : > { %p14_p4 = scmp.ge.s32.totalorder %s17_s24, 4  }
 0x521   :  { %16 = sbr.rel (!%p14_p4) target bundleno = 1 (0x1), region = 78 }

</bundles_post_ra>
